<compile_context>
chip_gen: v6e
topology: v6e:2x2x1
jax: 0.10.0
libtpu: 0.0.40
codegen_flags: <defaults>
</compile_context>

<pallas_src>
import functools

import jax
import jax.numpy as jnp
from jax.experimental import pallas as pl
from jax.experimental.pallas import tpu as pltpu

EPS = 1e-5
# M-tile (rows = N*Ho*Wo). K is small (<= 9*C) so a 1024-row bf16 tile is only
# a few MiB; double-buffered it fits comfortably in v7x's 64 MiB VMEM as well
# as v5e/v6e's 128 MiB while amortizing per-grid-step overhead.
TM = 1024

_COMPILER_PARAMS = pltpu.CompilerParams(
    dimension_semantics=("parallel",),      # shard the grid across TCs on v7x
    vmem_limit_bytes=48 * 1024 * 1024,      # < 64 MiB physical (v7x), ample elsewhere
)


def _round_up(x, m):
    return (x + m - 1) // m * m


# ----------------------------- Pallas kernels ------------------------------

def _matmul_stats_kernel(p_ref, w_ref, y_ref, sum_ref, sq_ref):
    """Conv-as-matmul (bf16 MXU, f32 accumulate) + per-tile BN partial sums.

    Padded rows are exact zeros (the conv bias is dropped - it cancels through
    the BatchNorm), so they do not perturb the statistics; the finalize divides
    by the true row count.
    """
    y = jnp.dot(p_ref[...], w_ref[...], preferred_element_type=jnp.float32)
    y_ref[...] = y
    sum_ref[...] = jnp.sum(y, axis=0, keepdims=True)[None]
    sq_ref[...] = jnp.sum(y * y, axis=0, keepdims=True)[None]


def _matmul_bias_kernel(x_ref, w_ref, b_ref, o_ref):
    """1x1 conv: y = x @ w + b (bf16 MXU inputs, f32 accumulate/output)."""
    o_ref[...] = (
        jnp.dot(x_ref[...], w_ref[...], preferred_element_type=jnp.float32)
        + b_ref[...]
    )


def _res_mid_kernel(p_ref, w_ref, x2_ref, y1_ref, sum_ref, sq_ref, *, mid):
    """ResBlock middle stage: 3x3-conv-as-matmul (first half of the channels,
    bias dropped - it cancels through the block's BN) plus BN partial sums for
    the full, virtually concatenated channel width (y1 | x2)."""
    y1 = jnp.dot(p_ref[...], w_ref[...], preferred_element_type=jnp.float32)
    y1_ref[...] = y1
    x2 = x2_ref[...]
    sum_ref[:, :, :mid] = jnp.sum(y1, axis=0, keepdims=True)[None]
    sq_ref[:, :, :mid] = jnp.sum(y1 * y1, axis=0, keepdims=True)[None]
    sum_ref[:, :, mid:] = jnp.sum(x2, axis=0, keepdims=True)[None]
    sq_ref[:, :, mid:] = jnp.sum(x2 * x2, axis=0, keepdims=True)[None]


def _affine_relu_kernel(y_ref, s_ref, b_ref, o_ref):
    """Finalized BatchNorm as per-channel y*scale+shift, fused with ReLU."""
    o_ref[...] = jnp.maximum(y_ref[...] * s_ref[...] + b_ref[...], 0.0)


def _res_epilogue_kernel(res_ref, y1_ref, x2_ref, s_ref, b_ref, o_ref, *, mid):
    """ResBlock epilogue: out = residual + BN(cat(y1, x2)).

    The torch.cat is fused into the two lane-range stores."""
    s = s_ref[...]
    b = b_ref[...]
    o_ref[:, :mid] = res_ref[:, :mid] + y1_ref[...] * s[:, :mid] + b[:, :mid]
    o_ref[:, mid:] = res_ref[:, mid:] + x2_ref[...] * s[:, mid:] + b[:, mid:]


# ------------------------------ helpers -------------------------------------

def _tiling(m):
    tm = min(TM, _round_up(m, 8))
    m_pad = _round_up(m, tm)
    return tm, m_pad, m_pad // tm


def _pad_rows(a, m_pad):
    m = a.shape[0]
    if m_pad == m:
        return a
    return jnp.pad(a, ((0, m_pad - m), (0, 0)))


def _bn_scale_shift(sums, sqs, count, gamma, beta):
    """Finalize BN (training-mode batch stats, biased variance, eps=1e-5)."""
    mean = jnp.sum(sums, axis=(0, 1)) / count
    var = jnp.maximum(jnp.sum(sqs, axis=(0, 1)) / count - mean * mean, 0.0)
    scale = gamma[0] * jax.lax.rsqrt(var + EPS)
    shift = beta[0] - mean * scale
    return scale[None], shift[None]                       # (1, C) each


def _im2col(x, k, s, p):
    """x: (N, H, W, C) -> (N*Ho*Wo, k*k*C) patches, plus (Ho, Wo).

    TODO(synk): patch construction is XLA glue (pad + strided slices + concat);
    a halo-windowed fused conv kernel would avoid the k*k patch matrix in HBM,
    at the cost of in-kernel relayouts that are riskier to lower.
    """
    n, h, w, c = x.shape
    xp = jnp.pad(x, ((0, 0), (p, p), (p, p), (0, 0)))
    ho = (h + 2 * p - k) // s + 1
    wo = (w + 2 * p - k) // s + 1
    cols = []
    for i in range(k):
        for j in range(k):
            cols.append(xp[:, i:i + s * (ho - 1) + 1:s,
                           j:j + s * (wo - 1) + 1:s, :])
    patches = jnp.concatenate(cols, axis=-1)              # (N,Ho,Wo,k*k*C)
    return patches.reshape(n * ho * wo, k * k * c), ho, wo


# ------------------------------ module ops -----------------------------------

def conv_bn_relu(x, prm, k, s):
    """ConvBNRelu: Conv2d(k, stride=s, pad=1 if k==3 else 0) + BN + ReLU.

    The conv bias is omitted: a per-channel constant added before the BN mean
    subtraction cancels exactly (Conv(bias)+BN == Conv(no-bias)+BN).
    """
    pad = 1 if k == 3 else 0
    n, h, w, c = x.shape
    cout = prm["w"].shape[-1]
    patches, ho, wo = _im2col(x.astype(jnp.bfloat16), k, s, pad)
    m, kk = patches.shape
    tm, m_pad, nt = _tiling(m)
    patches = _pad_rows(patches, m_pad)
    wmat = prm["w"].reshape(kk, cout).astype(jnp.bfloat16)

    y, sums, sqs = pl.pallas_call(
        _matmul_stats_kernel,
        out_shape=(jax.ShapeDtypeStruct((m_pad, cout), jnp.float32),
                   jax.ShapeDtypeStruct((nt, 1, cout), jnp.float32),
                   jax.ShapeDtypeStruct((nt, 1, cout), jnp.float32)),
        grid=(nt,),
        in_specs=[pl.BlockSpec((tm, kk), lambda i: (i, 0)),
                  pl.BlockSpec((kk, cout), lambda i: (0, 0))],  # resident weights
        out_specs=(pl.BlockSpec((tm, cout), lambda i: (i, 0)),
                   pl.BlockSpec((1, 1, cout), lambda i: (i, 0, 0)),
                   pl.BlockSpec((1, 1, cout), lambda i: (i, 0, 0))),
        compiler_params=_COMPILER_PARAMS,
    )(patches, wmat)

    scale, shift = _bn_scale_shift(sums, sqs, m, prm["gamma"], prm["beta"])

    out = pl.pallas_call(
        _affine_relu_kernel,
        out_shape=jax.ShapeDtypeStruct((m_pad, cout), jnp.float32),
        grid=(nt,),
        in_specs=[pl.BlockSpec((tm, cout), lambda i: (i, 0)),
                  pl.BlockSpec((1, cout), lambda i: (0, 0)),
                  pl.BlockSpec((1, cout), lambda i: (0, 0))],
        out_specs=pl.BlockSpec((tm, cout), lambda i: (i, 0)),
        compiler_params=_COMPILER_PARAMS,
    )(y, scale, shift)
    return out[:m].reshape(n, ho, wo, cout)


def res_block(x, prm):
    """ResBlock: 1x1 conv -> split -> 3x3 conv(first half) -> cat -> BN -> +x."""
    n, h, w, c = x.shape
    mid = c // 2
    m = n * h * w
    xf = x.reshape(m, c)
    tm, m_pad, nt = _tiling(m)

    # 1) 1x1 conv (c -> c).  Bias kept: it does NOT cancel through the padded
    #    3x3 conv on the first half (border effects).
    y0 = pl.pallas_call(
        _matmul_bias_kernel,
        out_shape=jax.ShapeDtypeStruct((m_pad, c), jnp.float32),
        grid=(nt,),
        in_specs=[pl.BlockSpec((tm, c), lambda i: (i, 0)),
                  pl.BlockSpec((c, c), lambda i: (0, 0)),
                  pl.BlockSpec((1, c), lambda i: (0, 0))],
        out_specs=pl.BlockSpec((tm, c), lambda i: (i, 0)),
        compiler_params=_COMPILER_PARAMS,
    )(_pad_rows(xf.astype(jnp.bfloat16), m_pad),
      prm["w1"].astype(jnp.bfloat16), prm["b1"])[:m]

    x1 = y0[:, :mid].reshape(n, h, w, mid)
    x2 = _pad_rows(y0[:, mid:], m_pad)            # zero-padded: stats stay exact

    # 2) 3x3 conv (stride 1, pad 1, bias dropped) on the first half as an
    #    im2col matmul; BN partial sums for the full channel width in-kernel.
    patches, _, _ = _im2col(x1.astype(jnp.bfloat16), 3, 1, 1)
    kk = patches.shape[1]
    w3 = prm["w3"].reshape(kk, mid).astype(jnp.bfloat16)
    y1, sums, sqs = pl.pallas_call(
        functools.partial(_res_mid_kernel, mid=mid),
        out_shape=(jax.ShapeDtypeStruct((m_pad, mid), jnp.float32),
                   jax.ShapeDtypeStruct((nt, 1, c), jnp.float32),
                   jax.ShapeDtypeStruct((nt, 1, c), jnp.float32)),
        grid=(nt,),
        in_specs=[pl.BlockSpec((tm, kk), lambda i: (i, 0)),
                  pl.BlockSpec((kk, mid), lambda i: (0, 0)),
                  pl.BlockSpec((tm, c - mid), lambda i: (i, 0))],
        out_specs=(pl.BlockSpec((tm, mid), lambda i: (i, 0)),
                   pl.BlockSpec((1, 1, c), lambda i: (i, 0, 0)),
                   pl.BlockSpec((1, 1, c), lambda i: (i, 0, 0))),
        compiler_params=_COMPILER_PARAMS,
    )(_pad_rows(patches, m_pad), w3, x2)

    # 3) finalize BN; apply it fused with the channel concat + residual add.
    scale, shift = _bn_scale_shift(sums, sqs, m, prm["gamma"], prm["beta"])
    out = pl.pallas_call(
        functools.partial(_res_epilogue_kernel, mid=mid),
        out_shape=jax.ShapeDtypeStruct((m_pad, c), jnp.float32),
        grid=(nt,),
        in_specs=[pl.BlockSpec((tm, c), lambda i: (i, 0)),
                  pl.BlockSpec((tm, mid), lambda i: (i, 0)),
                  pl.BlockSpec((tm, c - mid), lambda i: (i, 0)),
                  pl.BlockSpec((1, c), lambda i: (0, 0)),
                  pl.BlockSpec((1, c), lambda i: (0, 0))],
        out_specs=pl.BlockSpec((tm, c), lambda i: (i, 0)),
        compiler_params=_COMPILER_PARAMS,
    )(_pad_rows(xf, m_pad), y1, x2, scale, shift)
    return out[:m].reshape(n, h, w, c)


def resnet_forward(x_nchw, params):
    """Matches ResNet.forward: returns a list of 5 feature maps (NCHW)."""
    x = jnp.transpose(x_nchw, (0, 2, 3, 1)).astype(jnp.float32)   # NCHW -> NHWC
    feats = []
    for blk in params:
        x = conv_bn_relu(x, blk["stem"], 3, 2)
        for rp in blk["res"]:
            x = res_block(x, rp)
        feats.append(jnp.transpose(x, (0, 3, 1, 2)))               # back to NCHW
    return feats


# ---------------------------- parameter init --------------------------------

def init_params(key, repets=(2, 3, 4, 2), channels=(16, 32, 64, 96, 128)):
    keys = iter(jax.random.split(key, 512))

    def nxt():
        return next(keys)

    def conv_bn(cin, cout, k):
        fan = k * k * cin
        # Conv bias omitted: it cancels exactly through the following BatchNorm.
        return {
            "w": jax.random.normal(nxt(), (k, k, cin, cout), jnp.float32)
            * (1.0 / fan ** 0.5),
            "gamma": 1.0 + 0.1 * jax.random.normal(nxt(), (1, cout), jnp.float32),
            "beta": 0.1 * jax.random.normal(nxt(), (1, cout), jnp.float32),
        }

    def res(c):
        mid = c // 2
        # conv3x3 bias omitted: it cancels exactly through the block's BatchNorm.
        return {
            "w1": jax.random.normal(nxt(), (c, c), jnp.float32) * (1.0 / c ** 0.5),
            "b1": 0.1 * jax.random.normal(nxt(), (1, c), jnp.float32),
            "w3": jax.random.normal(nxt(), (3, 3, mid, mid), jnp.float32)
            * (1.0 / (9 * mid) ** 0.5),
            "gamma": 1.0 + 0.1 * jax.random.normal(nxt(), (1, c), jnp.float32),
            "beta": 0.1 * jax.random.normal(nxt(), (1, c), jnp.float32),
        }

    params = [{"stem": conv_bn(3, channels[0], 3), "res": []}]
    for idx, repet in enumerate(repets):
        cin, cout = channels[idx], channels[idx + 1]
        params.append({
            "stem": conv_bn(cin, cout, 3),
            "res": [res(cout) for _ in range(repet)],
        })
    return params


# --------------------------------- main --------------------------------------

if __name__ == "__main__":
    key = jax.random.PRNGKey(0)
    kp, kx = jax.random.split(key)
    params = init_params(kp)
    x = jax.random.normal(kx, (2, 3, 16, 16), jnp.float32)    # NCHW like PyTorch

    feats = jax.jit(resnet_forward)(x, params)
    feats = [jax.block_until_ready(f) for f in feats]

    expected = [(2, 16, 8, 8), (2, 32, 4, 4), (2, 64, 2, 2),
                (2, 96, 1, 1), (2, 128, 1, 1)]
    assert [tuple(f.shape) for f in feats] == expected, \
        [tuple(f.shape) for f in feats]
    assert all(bool(jnp.all(jnp.isfinite(f))) for f in feats)
    print("KERNEL_OK")
</pallas_src>

<mosaic_0001>
module attributes {stable_mosaic.version = 11 : i64} {
  func.func @_matmul_stats_kernel(%arg0: i32, %arg1: memref<128x27xbf16, #tpu.memory_space<vmem>>, %arg2: memref<27x16xbf16, #tpu.memory_space<vmem>>, %arg3: memref<128x16xf32, #tpu.memory_space<vmem>>, %arg4: memref<1x1x16xf32, #tpu.memory_space<vmem>>, %arg5: memref<1x1x16xf32, #tpu.memory_space<vmem>>) attributes {dimension_semantics = [#tpu.dimension_semantics<parallel>], iteration_bounds = array<i64: 1>, scalar_prefetch = 0 : i64, scratch_operands = 0 : i64, tpu.core_type = #tpu.core_type<tc>, window_params = [{transform_indices = @transform_0, window_bounds = array<i64: 128, 27>}, {pipeline_mode = #tpu.pipeline_mode<synchronous>, transform_indices = @transform_1, window_bounds = array<i64: 27, 16>}, {transform_indices = @transform_2, window_bounds = array<i64: 128, 16>}, {transform_indices = @transform_3, window_bounds = array<i64: 1, 1, 16>}, {transform_indices = @transform_4, window_bounds = array<i64: 1, 1, 16>}]} {
    %c0 = arith.constant 0 : index
    %c0_0 = arith.constant 0 : index
    %0 = vector.load %arg1[%c0, %c0_0] : memref<128x27xbf16, #tpu.memory_space<vmem>>, vector<128x27xbf16>
    %c0_1 = arith.constant 0 : index
    %c0_2 = arith.constant 0 : index
    %1 = vector.load %arg2[%c0_1, %c0_2] : memref<27x16xbf16, #tpu.memory_space<vmem>>, vector<27x16xbf16>
    %cst = arith.constant dense<0.000000e+00> : vector<128x16xf32>
    %2 = tpu.matmul %0, %1, %cst {dimension_numbers = #tpu.dot_dimension_numbers<[1], [0], [0], [1], [0, 0, 1, 1], [], []>} : vector<128x27xbf16>, vector<27x16xbf16>, vector<128x16xf32> -> vector<128x16xf32>
    %c0_3 = arith.constant 0 : index
    %c0_4 = arith.constant 0 : index
    %3 = vector.load %arg3[%c0_3, %c0_4] : memref<128x16xf32, #tpu.memory_space<vmem>>, vector<128x16xf32>
    tpu.vector_store %arg3[%c0_3, %c0_4], %2 {strides = array<i32>} : memref<128x16xf32, #tpu.memory_space<vmem>>, vector<128x16xf32>,
    %cst_5 = arith.constant dense<0.000000e+00> : vector<16xf32>
    %4 = vector.multi_reduction <add>, %2, %cst_5 [0] : vector<128x16xf32> to vector<16xf32>
    %5 = vector.shape_cast %4 : vector<16xf32> to vector<1x16xf32>
    %6 = vector.shape_cast %5 : vector<1x16xf32> to vector<1x1x16xf32>
    %c0_6 = arith.constant 0 : index
    %c0_7 = arith.constant 0 : index
    %c0_8 = arith.constant 0 : index
    %7 = vector.load %arg4[%c0_6, %c0_7, %c0_8] : memref<1x1x16xf32, #tpu.memory_space<vmem>>, vector<1x1x16xf32>
    tpu.vector_store %arg4[%c0_6, %c0_7, %c0_8], %6 {strides = array<i32>} : memref<1x1x16xf32, #tpu.memory_space<vmem>>, vector<1x1x16xf32>,
    %8 = arith.mulf %2, %2 : vector<128x16xf32>
    %cst_9 = arith.constant dense<0.000000e+00> : vector<16xf32>
    %9 = vector.multi_reduction <add>, %8, %cst_9 [0] : vector<128x16xf32> to vector<16xf32>
    %10 = vector.shape_cast %9 : vector<16xf32> to vector<1x16xf32>
    %11 = vector.shape_cast %10 : vector<1x16xf32> to vector<1x1x16xf32>
    %c0_10 = arith.constant 0 : index
    %c0_11 = arith.constant 0 : index
    %c0_12 = arith.constant 0 : index
    %12 = vector.load %arg5[%c0_10, %c0_11, %c0_12] : memref<1x1x16xf32, #tpu.memory_space<vmem>>, vector<1x1x16xf32>
    tpu.vector_store %arg5[%c0_10, %c0_11, %c0_12], %11 {strides = array<i32>} : memref<1x1x16xf32, #tpu.memory_space<vmem>>, vector<1x1x16xf32>,
    return
  }
  func.func @transform_0(%arg0: i32) -> (i32, i32) {
    %c0_i32 = arith.constant 0 : i32
    %c0_i32_0 = arith.constant 0 : i32
    return %arg0, %c0_i32 : i32, i32
  }
  func.func @transform_1(%arg0: i32) -> (i32, i32) {
    %c0_i32 = arith.constant 0 : i32
    %c0_i32_0 = arith.constant 0 : i32
    %c0_i32_1 = arith.constant 0 : i32
    return %c0_i32, %c0_i32_0 : i32, i32
  }
  func.func @transform_2(%arg0: i32) -> (i32, i32) {
    %c0_i32 = arith.constant 0 : i32
    %c0_i32_0 = arith.constant 0 : i32
    return %arg0, %c0_i32 : i32, i32
  }
  func.func @transform_3(%arg0: i32) -> (i32, i32, i32) {
    %c0_i32 = arith.constant 0 : i32
    %c0_i32_0 = arith.constant 0 : i32
    %c0_i32_1 = arith.constant 0 : i32
    return %arg0, %c0_i32, %c0_i32_0 : i32, i32, i32
  }
  func.func @transform_4(%arg0: i32) -> (i32, i32, i32) {
    %c0_i32 = arith.constant 0 : i32
    %c0_i32_0 = arith.constant 0 : i32
    %c0_i32_1 = arith.constant 0 : i32
    return %arg0, %c0_i32, %c0_i32_0 : i32, i32, i32
  }
}

module attributes {stable_mosaic.version = 11 : i64} {
  func.func @_affine_relu_kernel(%arg0: i32, %arg1: memref<128x16xf32, #tpu.memory_space<vmem>>, %arg2: memref<1x16xf32, #tpu.memory_space<vmem>>, %arg3: memref<1x16xf32, #tpu.memory_space<vmem>>, %arg4: memref<128x16xf32, #tpu.memory_space<vmem>>) attributes {dimension_semantics = [#tpu.dimension_semantics<parallel>], iteration_bounds = array<i64: 1>, scalar_prefetch = 0 : i64, scratch_operands = 0 : i64, tpu.core_type = #tpu.core_type<tc>, window_params = [{transform_indices = @transform_0, window_bounds = array<i64: 128, 16>}, {pipeline_mode = #tpu.pipeline_mode<synchronous>, transform_indices = @transform_1, window_bounds = array<i64: 1, 16>}, {pipeline_mode = #tpu.pipeline_mode<synchronous>, transform_indices = @transform_2, window_bounds = array<i64: 1, 16>}, {transform_indices = @transform_3, window_bounds = array<i64: 128, 16>}]} {
    %c0 = arith.constant 0 : index
    %c0_0 = arith.constant 0 : index
    %0 = vector.load %arg1[%c0, %c0_0] : memref<128x16xf32, #tpu.memory_space<vmem>>, vector<128x16xf32>
    %c0_1 = arith.constant 0 : index
    %c0_2 = arith.constant 0 : index
    %1 = vector.load %arg2[%c0_1, %c0_2] : memref<1x16xf32, #tpu.memory_space<vmem>>, vector<1x16xf32>
    %2 = vector.broadcast %1 : vector<1x16xf32> to vector<128x16xf32>
    %3 = arith.mulf %0, %2 : vector<128x16xf32>
    %c0_3 = arith.constant 0 : index
    %c0_4 = arith.constant 0 : index
    %4 = vector.load %arg3[%c0_3, %c0_4] : memref<1x16xf32, #tpu.memory_space<vmem>>, vector<1x16xf32>
    %5 = vector.broadcast %4 : vector<1x16xf32> to vector<128x16xf32>
    %6 = arith.addf %3, %5 : vector<128x16xf32>
    %cst = arith.constant 0.000000e+00 : f32
    %7 = vector.broadcast %cst : f32 to vector<128x16xf32>
    %8 = arith.maximumf %6, %7 : vector<128x16xf32>
    %c0_5 = arith.constant 0 : index
    %c0_6 = arith.constant 0 : index
    %9 = vector.load %arg4[%c0_5, %c0_6] : memref<128x16xf32, #tpu.memory_space<vmem>>, vector<128x16xf32>
    tpu.vector_store %arg4[%c0_5, %c0_6], %8 {strides = array<i32>} : memref<128x16xf32, #tpu.memory_space<vmem>>, vector<128x16xf32>,
    return
  }
  func.func @transform_0(%arg0: i32) -> (i32, i32) {
    %c0_i32 = arith.constant 0 : i32
    %c0_i32_0 = arith.constant 0 : i32
    return %arg0, %c0_i32 : i32, i32
  }
  func.func @transform_1(%arg0: i32) -> (i32, i32) {
    %c0_i32 = arith.constant 0 : i32
    %c0_i32_0 = arith.constant 0 : i32
    %c0_i32_1 = arith.constant 0 : i32
    return %c0_i32, %c0_i32_0 : i32, i32
  }
  func.func @transform_2(%arg0: i32) -> (i32, i32) {
    %c0_i32 = arith.constant 0 : i32
    %c0_i32_0 = arith.constant 0 : i32
    %c0_i32_1 = arith.constant 0 : i32
    return %c0_i32, %c0_i32_0 : i32, i32
  }
  func.func @transform_3(%arg0: i32) -> (i32, i32) {
    %c0_i32 = arith.constant 0 : i32
    %c0_i32_0 = arith.constant 0 : i32
    return %arg0, %c0_i32 : i32, i32
  }
}

module attributes {stable_mosaic.version = 11 : i64} {
  func.func @_affine_relu_kernel(%arg0: i32, %arg1: memref<32x32xf32, #tpu.memory_space<vmem>>, %arg2: memref<1x32xf32, #tpu.memory_space<vmem>>, %arg3: memref<1x32xf32, #tpu.memory_space<vmem>>, %arg4: memref<32x32xf32, #tpu.memory_space<vmem>>) attributes {dimension_semantics = [#tpu.dimension_semantics<parallel>], iteration_bounds = array<i64: 1>, scalar_prefetch = 0 : i64, scratch_operands = 0 : i64, tpu.core_type = #tpu.core_type<tc>, window_params = [{transform_indices = @transform_0, window_bounds = array<i64: 32, 32>}, {pipeline_mode = #tpu.pipeline_mode<synchronous>, transform_indices = @transform_1, window_bounds = array<i64: 1, 32>}, {pipeline_mode = #tpu.pipeline_mode<synchronous>, transform_indices = @transform_2, window_bounds = array<i64: 1, 32>}, {transform_indices = @transform_3, window_bounds = array<i64: 32, 32>}]} {
    %c0 = arith.constant 0 : index
    %c0_0 = arith.constant 0 : index
    %0 = vector.load %arg1[%c0, %c0_0] : memref<32x32xf32, #tpu.memory_space<vmem>>, vector<32x32xf32>
    %c0_1 = arith.constant 0 : index
    %c0_2 = arith.constant 0 : index
    %1 = vector.load %arg2[%c0_1, %c0_2] : memref<1x32xf32, #tpu.memory_space<vmem>>, vector<1x32xf32>
    %2 = vector.broadcast %1 : vector<1x32xf32> to vector<32x32xf32>
    %3 = arith.mulf %0, %2 : vector<32x32xf32>
    %c0_3 = arith.constant 0 : index
    %c0_4 = arith.constant 0 : index
    %4 = vector.load %arg3[%c0_3, %c0_4] : memref<1x32xf32, #tpu.memory_space<vmem>>, vector<1x32xf32>
    %5 = vector.broadcast %4 : vector<1x32xf32> to vector<32x32xf32>
    %6 = arith.addf %3, %5 : vector<32x32xf32>
    %cst = arith.constant 0.000000e+00 : f32
    %7 = vector.broadcast %cst : f32 to vector<32x32xf32>
    %8 = arith.maximumf %6, %7 : vector<32x32xf32>
    %c0_5 = arith.constant 0 : index
    %c0_6 = arith.constant 0 : index
    %9 = vector.load %arg4[%c0_5, %c0_6] : memref<32x32xf32, #tpu.memory_space<vmem>>, vector<32x32xf32>
    tpu.vector_store %arg4[%c0_5, %c0_6], %8 {strides = array<i32>} : memref<32x32xf32, #tpu.memory_space<vmem>>, vector<32x32xf32>,
    return
  }
  func.func @transform_0(%arg0: i32) -> (i32, i32) {
    %c0_i32 = arith.constant 0 : i32
    %c0_i32_0 = arith.constant 0 : i32
    return %arg0, %c0_i32 : i32, i32
  }
  func.func @transform_1(%arg0: i32) -> (i32, i32) {
    %c0_i32 = arith.constant 0 : i32
    %c0_i32_0 = arith.constant 0 : i32
    %c0_i32_1 = arith.constant 0 : i32
    return %c0_i32, %c0_i32_0 : i32, i32
  }
  func.func @transform_2(%arg0: i32) -> (i32, i32) {
    %c0_i32 = arith.constant 0 : i32
    %c0_i32_0 = arith.constant 0 : i32
    %c0_i32_1 = arith.constant 0 : i32
    return %c0_i32, %c0_i32_0 : i32, i32
  }
  func.func @transform_3(%arg0: i32) -> (i32, i32) {
    %c0_i32 = arith.constant 0 : i32
    %c0_i32_0 = arith.constant 0 : i32
    return %arg0, %c0_i32 : i32, i32
  }
}

module attributes {stable_mosaic.version = 11 : i64} {
  func.func @_matmul_stats_kernel(%arg0: i32, %arg1: memref<32x144xbf16, #tpu.memory_space<vmem>>, %arg2: memref<144x32xbf16, #tpu.memory_space<vmem>>, %arg3: memref<32x32xf32, #tpu.memory_space<vmem>>, %arg4: memref<1x1x32xf32, #tpu.memory_space<vmem>>, %arg5: memref<1x1x32xf32, #tpu.memory_space<vmem>>) attributes {dimension_semantics = [#tpu.dimension_semantics<parallel>], iteration_bounds = array<i64: 1>, scalar_prefetch = 0 : i64, scratch_operands = 0 : i64, tpu.core_type = #tpu.core_type<tc>, window_params = [{transform_indices = @transform_0, window_bounds = array<i64: 32, 144>}, {pipeline_mode = #tpu.pipeline_mode<synchronous>, transform_indices = @transform_1, window_bounds = array<i64: 144, 32>}, {transform_indices = @transform_2, window_bounds = array<i64: 32, 32>}, {transform_indices = @transform_3, window_bounds = array<i64: 1, 1, 32>}, {transform_indices = @transform_4, window_bounds = array<i64: 1, 1, 32>}]} {
    %c0 = arith.constant 0 : index
    %c0_0 = arith.constant 0 : index
    %0 = vector.load %arg1[%c0, %c0_0] : memref<32x144xbf16, #tpu.memory_space<vmem>>, vector<32x144xbf16>
    %c0_1 = arith.constant 0 : index
    %c0_2 = arith.constant 0 : index
    %1 = vector.load %arg2[%c0_1, %c0_2] : memref<144x32xbf16, #tpu.memory_space<vmem>>, vector<144x32xbf16>
    %cst = arith.constant dense<0.000000e+00> : vector<32x32xf32>
    %2 = tpu.matmul %0, %1, %cst {dimension_numbers = #tpu.dot_dimension_numbers<[1], [0], [0], [1], [0, 0, 1, 1], [], []>} : vector<32x144xbf16>, vector<144x32xbf16>, vector<32x32xf32> -> vector<32x32xf32>
    %c0_3 = arith.constant 0 : index
    %c0_4 = arith.constant 0 : index
    %3 = vector.load %arg3[%c0_3, %c0_4] : memref<32x32xf32, #tpu.memory_space<vmem>>, vector<32x32xf32>
    tpu.vector_store %arg3[%c0_3, %c0_4], %2 {strides = array<i32>} : memref<32x32xf32, #tpu.memory_space<vmem>>, vector<32x32xf32>,
    %cst_5 = arith.constant dense<0.000000e+00> : vector<32xf32>
    %4 = vector.multi_reduction <add>, %2, %cst_5 [0] : vector<32x32xf32> to vector<32xf32>
    %5 = vector.shape_cast %4 : vector<32xf32> to vector<1x32xf32>
    %6 = vector.shape_cast %5 : vector<1x32xf32> to vector<1x1x32xf32>
    %c0_6 = arith.constant 0 : index
    %c0_7 = arith.constant 0 : index
    %c0_8 = arith.constant 0 : index
    %7 = vector.load %arg4[%c0_6, %c0_7, %c0_8] : memref<1x1x32xf32, #tpu.memory_space<vmem>>, vector<1x1x32xf32>
    tpu.vector_store %arg4[%c0_6, %c0_7, %c0_8], %6 {strides = array<i32>} : memref<1x1x32xf32, #tpu.memory_space<vmem>>, vector<1x1x32xf32>,
    %8 = arith.mulf %2, %2 : vector<32x32xf32>
    %cst_9 = arith.constant dense<0.000000e+00> : vector<32xf32>
    %9 = vector.multi_reduction <add>, %8, %cst_9 [0] : vector<32x32xf32> to vector<32xf32>
    %10 = vector.shape_cast %9 : vector<32xf32> to vector<1x32xf32>
    %11 = vector.shape_cast %10 : vector<1x32xf32> to vector<1x1x32xf32>
    %c0_10 = arith.constant 0 : index
    %c0_11 = arith.constant 0 : index
    %c0_12 = arith.constant 0 : index
    %12 = vector.load %arg5[%c0_10, %c0_11, %c0_12] : memref<1x1x32xf32, #tpu.memory_space<vmem>>, vector<1x1x32xf32>
    tpu.vector_store %arg5[%c0_10, %c0_11, %c0_12], %11 {strides = array<i32>} : memref<1x1x32xf32, #tpu.memory_space<vmem>>, vector<1x1x32xf32>,
    return
  }
  func.func @transform_0(%arg0: i32) -> (i32, i32) {
    %c0_i32 = arith.constant 0 : i32
    %c0_i32_0 = arith.constant 0 : i32
    return %arg0, %c0_i32 : i32, i32
  }
  func.func @transform_1(%arg0: i32) -> (i32, i32) {
    %c0_i32 = arith.constant 0 : i32
    %c0_i32_0 = arith.constant 0 : i32
    %c0_i32_1 = arith.constant 0 : i32
    return %c0_i32, %c0_i32_0 : i32, i32
  }
  func.func @transform_2(%arg0: i32) -> (i32, i32) {
    %c0_i32 = arith.constant 0 : i32
    %c0_i32_0 = arith.constant 0 : i32
    return %arg0, %c0_i32 : i32, i32
  }
  func.func @transform_3(%arg0: i32) -> (i32, i32, i32) {
    %c0_i32 = arith.constant 0 : i32
    %c0_i32_0 = arith.constant 0 : i32
    %c0_i32_1 = arith.constant 0 : i32
    return %arg0, %c0_i32, %c0_i32_0 : i32, i32, i32
  }
  func.func @transform_4(%arg0: i32) -> (i32, i32, i32) {
    %c0_i32 = arith.constant 0 : i32
    %c0_i32_0 = arith.constant 0 : i32
    %c0_i32_1 = arith.constant 0 : i32
    return %arg0, %c0_i32, %c0_i32_0 : i32, i32, i32
  }
}

module attributes {stable_mosaic.version = 11 : i64} {
  func.func @_matmul_bias_kernel(%arg0: i32, %arg1: memref<32x32xbf16, #tpu.memory_space<vmem>>, %arg2: memref<32x32xbf16, #tpu.memory_space<vmem>>, %arg3: memref<1x32xf32, #tpu.memory_space<vmem>>, %arg4: memref<32x32xf32, #tpu.memory_space<vmem>>) attributes {dimension_semantics = [#tpu.dimension_semantics<parallel>], iteration_bounds = array<i64: 1>, scalar_prefetch = 0 : i64, scratch_operands = 0 : i64, tpu.core_type = #tpu.core_type<tc>, window_params = [{transform_indices = @transform_0, window_bounds = array<i64: 32, 32>}, {pipeline_mode = #tpu.pipeline_mode<synchronous>, transform_indices = @transform_1, window_bounds = array<i64: 32, 32>}, {pipeline_mode = #tpu.pipeline_mode<synchronous>, transform_indices = @transform_2, window_bounds = array<i64: 1, 32>}, {transform_indices = @transform_3, window_bounds = array<i64: 32, 32>}]} {
    %c0 = arith.constant 0 : index
    %c0_0 = arith.constant 0 : index
    %0 = vector.load %arg1[%c0, %c0_0] : memref<32x32xbf16, #tpu.memory_space<vmem>>, vector<32x32xbf16>
    %c0_1 = arith.constant 0 : index
    %c0_2 = arith.constant 0 : index
    %1 = vector.load %arg2[%c0_1, %c0_2] : memref<32x32xbf16, #tpu.memory_space<vmem>>, vector<32x32xbf16>
    %cst = arith.constant dense<0.000000e+00> : vector<32x32xf32>
    %2 = tpu.matmul %0, %1, %cst {dimension_numbers = #tpu.dot_dimension_numbers<[1], [0], [0], [1], [0, 0, 1, 1], [], []>} : vector<32x32xbf16>, vector<32x32xbf16>, vector<32x32xf32> -> vector<32x32xf32>
    %c0_3 = arith.constant 0 : index
    %c0_4 = arith.constant 0 : index
    %3 = vector.load %arg3[%c0_3, %c0_4] : memref<1x32xf32, #tpu.memory_space<vmem>>, vector<1x32xf32>
    %4 = vector.broadcast %3 : vector<1x32xf32> to vector<32x32xf32>
    %5 = arith.addf %2, %4 : vector<32x32xf32>
    %c0_5 = arith.constant 0 : index
    %c0_6 = arith.constant 0 : index
    %6 = vector.load %arg4[%c0_5, %c0_6] : memref<32x32xf32, #tpu.memory_space<vmem>>, vector<32x32xf32>
    tpu.vector_store %arg4[%c0_5, %c0_6], %5 {strides = array<i32>} : memref<32x32xf32, #tpu.memory_space<vmem>>, vector<32x32xf32>,
    return
  }
  func.func @transform_0(%arg0: i32) -> (i32, i32) {
    %c0_i32 = arith.constant 0 : i32
    %c0_i32_0 = arith.constant 0 : i32
    return %arg0, %c0_i32 : i32, i32
  }
  func.func @transform_1(%arg0: i32) -> (i32, i32) {
    %c0_i32 = arith.constant 0 : i32
    %c0_i32_0 = arith.constant 0 : i32
    %c0_i32_1 = arith.constant 0 : i32
    return %c0_i32, %c0_i32_0 : i32, i32
  }
  func.func @transform_2(%arg0: i32) -> (i32, i32) {
    %c0_i32 = arith.constant 0 : i32
    %c0_i32_0 = arith.constant 0 : i32
    %c0_i32_1 = arith.constant 0 : i32
    return %c0_i32, %c0_i32_0 : i32, i32
  }
  func.func @transform_3(%arg0: i32) -> (i32, i32) {
    %c0_i32 = arith.constant 0 : i32
    %c0_i32_0 = arith.constant 0 : i32
    return %arg0, %c0_i32 : i32, i32
  }
}

module attributes {stable_mosaic.version = 11 : i64} {
  func.func @_res_epilogue_kernel(%arg0: i32, %arg1: memref<32x32xf32, #tpu.memory_space<vmem>>, %arg2: memref<32x16xf32, #tpu.memory_space<vmem>>, %arg3: memref<32x16xf32, #tpu.memory_space<vmem>>, %arg4: memref<1x32xf32, #tpu.memory_space<vmem>>, %arg5: memref<1x32xf32, #tpu.memory_space<vmem>>, %arg6: memref<32x32xf32, #tpu.memory_space<vmem>>) attributes {dimension_semantics = [#tpu.dimension_semantics<parallel>], iteration_bounds = array<i64: 1>, scalar_prefetch = 0 : i64, scratch_operands = 0 : i64, tpu.core_type = #tpu.core_type<tc>, window_params = [{transform_indices = @transform_0, window_bounds = array<i64: 32, 32>}, {transform_indices = @transform_1, window_bounds = array<i64: 32, 16>}, {transform_indices = @transform_2, window_bounds = array<i64: 32, 16>}, {pipeline_mode = #tpu.pipeline_mode<synchronous>, transform_indices = @transform_3, window_bounds = array<i64: 1, 32>}, {pipeline_mode = #tpu.pipeline_mode<synchronous>, transform_indices = @transform_4, window_bounds = array<i64: 1, 32>}, {transform_indices = @transform_5, window_bounds = array<i64: 32, 32>}]} {
    %c0 = arith.constant 0 : index
    %c0_0 = arith.constant 0 : index
    %0 = vector.load %arg4[%c0, %c0_0] : memref<1x32xf32, #tpu.memory_space<vmem>>, vector<1x32xf32>
    %c0_1 = arith.constant 0 : index
    %c0_2 = arith.constant 0 : index
    %1 = vector.load %arg5[%c0_1, %c0_2] : memref<1x32xf32, #tpu.memory_space<vmem>>, vector<1x32xf32>
    %c0_3 = arith.constant 0 : index
    %c0_4 = arith.constant 0 : index
    %2 = vector.load %arg1[%c0_3, %c0_4] : memref<32x32xf32, #tpu.memory_space<vmem>>, vector<32x16xf32>
    %c0_5 = arith.constant 0 : index
    %c0_6 = arith.constant 0 : index
    %3 = vector.load %arg2[%c0_5, %c0_6] : memref<32x16xf32, #tpu.memory_space<vmem>>, vector<32x16xf32>
    %4 = vector.extract_strided_slice %0 {offsets = [0, 0], sizes = [1, 16], strides = [1, 1]} : vector<1x32xf32> to vector<1x16xf32>
    %5 = vector.broadcast %4 : vector<1x16xf32> to vector<32x16xf32>
    %6 = arith.mulf %3, %5 : vector<32x16xf32>
    %7 = arith.addf %2, %6 : vector<32x16xf32>
    %8 = vector.extract_strided_slice %1 {offsets = [0, 0], sizes = [1, 16], strides = [1, 1]} : vector<1x32xf32> to vector<1x16xf32>
    %9 = vector.broadcast %8 : vector<1x16xf32> to vector<32x16xf32>
    %10 = arith.addf %7, %9 : vector<32x16xf32>
    %c0_7 = arith.constant 0 : index
    %c0_8 = arith.constant 0 : index
    %11 = vector.load %arg6[%c0_7, %c0_8] : memref<32x32xf32, #tpu.memory_space<vmem>>, vector<32x16xf32>
    tpu.vector_store %arg6[%c0_7, %c0_8], %10 {strides = array<i32>} : memref<32x32xf32, #tpu.memory_space<vmem>>, vector<32x16xf32>,
    %c0_9 = arith.constant 0 : index
    %c16 = arith.constant 16 : index
    %12 = vector.load %arg1[%c0_9, %c16] : memref<32x32xf32, #tpu.memory_space<vmem>>, vector<32x16xf32>
    %c0_10 = arith.constant 0 : index
    %c0_11 = arith.constant 0 : index
    %13 = vector.load %arg3[%c0_10, %c0_11] : memref<32x16xf32, #tpu.memory_space<vmem>>, vector<32x16xf32>
    %14 = vector.extract_strided_slice %0 {offsets = [0, 16], sizes = [1, 16], strides = [1, 1]} : vector<1x32xf32> to vector<1x16xf32>
    %15 = vector.broadcast %14 : vector<1x16xf32> to vector<32x16xf32>
    %16 = arith.mulf %13, %15 : vector<32x16xf32>
    %17 = arith.addf %12, %16 : vector<32x16xf32>
    %18 = vector.extract_strided_slice %1 {offsets = [0, 16], sizes = [1, 16], strides = [1, 1]} : vector<1x32xf32> to vector<1x16xf32>
    %19 = vector.broadcast %18 : vector<1x16xf32> to vector<32x16xf32>
    %20 = arith.addf %17, %19 : vector<32x16xf32>
    %c0_12 = arith.constant 0 : index
    %c16_13 = arith.constant 16 : index
    %21 = vector.load %arg6[%c0_12, %c16_13] : memref<32x32xf32, #tpu.memory_space<vmem>>, vector<32x16xf32>
    tpu.vector_store %arg6[%c0_12, %c16_13], %20 {strides = array<i32>} : memref<32x32xf32, #tpu.memory_space<vmem>>, vector<32x16xf32>,
    return
  }
  func.func @transform_0(%arg0: i32) -> (i32, i32) {
    %c0_i32 = arith.constant 0 : i32
    %c0_i32_0 = arith.constant 0 : i32
    return %arg0, %c0_i32 : i32, i32
  }
  func.func @transform_1(%arg0: i32) -> (i32, i32) {
    %c0_i32 = arith.constant 0 : i32
    %c0_i32_0 = arith.constant 0 : i32
    return %arg0, %c0_i32 : i32, i32
  }
  func.func @transform_2(%arg0: i32) -> (i32, i32) {
    %c0_i32 = arith.constant 0 : i32
    %c0_i32_0 = arith.constant 0 : i32
    return %arg0, %c0_i32 : i32, i32
  }
  func.func @transform_3(%arg0: i32) -> (i32, i32) {
    %c0_i32 = arith.constant 0 : i32
    %c0_i32_0 = arith.constant 0 : i32
    %c0_i32_1 = arith.constant 0 : i32
    return %c0_i32, %c0_i32_0 : i32, i32
  }
  func.func @transform_4(%arg0: i32) -> (i32, i32) {
    %c0_i32 = arith.constant 0 : i32
    %c0_i32_0 = arith.constant 0 : i32
    %c0_i32_1 = arith.constant 0 : i32
    return %c0_i32, %c0_i32_0 : i32, i32
  }
  func.func @transform_5(%arg0: i32) -> (i32, i32) {
    %c0_i32 = arith.constant 0 : i32
    %c0_i32_0 = arith.constant 0 : i32
    return %arg0, %c0_i32 : i32, i32
  }
}

module attributes {stable_mosaic.version = 11 : i64} {
  func.func @_res_mid_kernel(%arg0: i32, %arg1: memref<32x144xbf16, #tpu.memory_space<vmem>>, %arg2: memref<144x16xbf16, #tpu.memory_space<vmem>>, %arg3: memref<32x16xf32, #tpu.memory_space<vmem>>, %arg4: memref<32x16xf32, #tpu.memory_space<vmem>>, %arg5: memref<1x1x32xf32, #tpu.memory_space<vmem>>, %arg6: memref<1x1x32xf32, #tpu.memory_space<vmem>>) attributes {dimension_semantics = [#tpu.dimension_semantics<parallel>], iteration_bounds = array<i64: 1>, scalar_prefetch = 0 : i64, scratch_operands = 0 : i64, tpu.core_type = #tpu.core_type<tc>, window_params = [{transform_indices = @transform_0, window_bounds = array<i64: 32, 144>}, {pipeline_mode = #tpu.pipeline_mode<synchronous>, transform_indices = @transform_1, window_bounds = array<i64: 144, 16>}, {transform_indices = @transform_2, window_bounds = array<i64: 32, 16>}, {transform_indices = @transform_3, window_bounds = array<i64: 32, 16>}, {transform_indices = @transform_4, window_bounds = array<i64: 1, 1, 32>}, {transform_indices = @transform_5, window_bounds = array<i64: 1, 1, 32>}]} {
    %c0 = arith.constant 0 : index
    %c0_0 = arith.constant 0 : index
    %0 = vector.load %arg1[%c0, %c0_0] : memref<32x144xbf16, #tpu.memory_space<vmem>>, vector<32x144xbf16>
    %c0_1 = arith.constant 0 : index
    %c0_2 = arith.constant 0 : index
    %1 = vector.load %arg2[%c0_1, %c0_2] : memref<144x16xbf16, #tpu.memory_space<vmem>>, vector<144x16xbf16>
    %cst = arith.constant dense<0.000000e+00> : vector<32x16xf32>
    %2 = tpu.matmul %0, %1, %cst {dimension_numbers = #tpu.dot_dimension_numbers<[1], [0], [0], [1], [0, 0, 1, 1], [], []>} : vector<32x144xbf16>, vector<144x16xbf16>, vector<32x16xf32> -> vector<32x16xf32>
    %c0_3 = arith.constant 0 : index
    %c0_4 = arith.constant 0 : index
    %3 = vector.load %arg4[%c0_3, %c0_4] : memref<32x16xf32, #tpu.memory_space<vmem>>, vector<32x16xf32>
    tpu.vector_store %arg4[%c0_3, %c0_4], %2 {strides = array<i32>} : memref<32x16xf32, #tpu.memory_space<vmem>>, vector<32x16xf32>,
    %c0_5 = arith.constant 0 : index
    %c0_6 = arith.constant 0 : index
    %4 = vector.load %arg3[%c0_5, %c0_6] : memref<32x16xf32, #tpu.memory_space<vmem>>, vector<32x16xf32>
    %cst_7 = arith.constant dense<0.000000e+00> : vector<16xf32>
    %5 = vector.multi_reduction <add>, %2, %cst_7 [0] : vector<32x16xf32> to vector<16xf32>
    %6 = vector.shape_cast %5 : vector<16xf32> to vector<1x16xf32>
    %7 = vector.shape_cast %6 : vector<1x16xf32> to vector<1x1x16xf32>
    %c0_8 = arith.constant 0 : index
    %c0_9 = arith.constant 0 : index
    %c0_10 = arith.constant 0 : index
    %8 = vector.load %arg5[%c0_8, %c0_9, %c0_10] : memref<1x1x32xf32, #tpu.memory_space<vmem>>, vector<1x1x16xf32>
    tpu.vector_store %arg5[%c0_8, %c0_9, %c0_10], %7 {strides = array<i32>} : memref<1x1x32xf32, #tpu.memory_space<vmem>>, vector<1x1x16xf32>,
    %9 = arith.mulf %2, %2 : vector<32x16xf32>
    %cst_11 = arith.constant dense<0.000000e+00> : vector<16xf32>
    %10 = vector.multi_reduction <add>, %9, %cst_11 [0] : vector<32x16xf32> to vector<16xf32>
    %11 = vector.shape_cast %10 : vector<16xf32> to vector<1x16xf32>
    %12 = vector.shape_cast %11 : vector<1x16xf32> to vector<1x1x16xf32>
    %c0_12 = arith.constant 0 : index
    %c0_13 = arith.constant 0 : index
    %c0_14 = arith.constant 0 : index
    %13 = vector.load %arg6[%c0_12, %c0_13, %c0_14] : memref<1x1x32xf32, #tpu.memory_space<vmem>>, vector<1x1x16xf32>
    tpu.vector_store %arg6[%c0_12, %c0_13, %c0_14], %12 {strides = array<i32>} : memref<1x1x32xf32, #tpu.memory_space<vmem>>, vector<1x1x16xf32>,
    %cst_15 = arith.constant dense<0.000000e+00> : vector<16xf32>
    %14 = vector.multi_reduction <add>, %4, %cst_15 [0] : vector<32x16xf32> to vector<16xf32>
    %15 = vector.shape_cast %14 : vector<16xf32> to vector<1x16xf32>
    %16 = vector.shape_cast %15 : vector<1x16xf32> to vector<1x1x16xf32>
    %c0_16 = arith.constant 0 : index
    %c0_17 = arith.constant 0 : index
    %c16 = arith.constant 16 : index
    %17 = vector.load %arg5[%c0_16, %c0_17, %c16] : memref<1x1x32xf32, #tpu.memory_space<vmem>>, vector<1x1x16xf32>
    tpu.vector_store %arg5[%c0_16, %c0_17, %c16], %16 {strides = array<i32>} : memref<1x1x32xf32, #tpu.memory_space<vmem>>, vector<1x1x16xf32>,
    %18 = arith.mulf %4, %4 : vector<32x16xf32>
    %cst_18 = arith.constant dense<0.000000e+00> : vector<16xf32>
    %19 = vector.multi_reduction <add>, %18, %cst_18 [0] : vector<32x16xf32> to vector<16xf32>
    %20 = vector.shape_cast %19 : vector<16xf32> to vector<1x16xf32>
    %21 = vector.shape_cast %20 : vector<1x16xf32> to vector<1x1x16xf32>
    %c0_19 = arith.constant 0 : index
    %c0_20 = arith.constant 0 : index
    %c16_21 = arith.constant 16 : index
    %22 = vector.load %arg6[%c0_19, %c0_20, %c16_21] : memref<1x1x32xf32, #tpu.memory_space<vmem>>, vector<1x1x16xf32>
    tpu.vector_store %arg6[%c0_19, %c0_20, %c16_21], %21 {strides = array<i32>} : memref<1x1x32xf32, #tpu.memory_space<vmem>>, vector<1x1x16xf32>,
    return
  }
  func.func @transform_0(%arg0: i32) -> (i32, i32) {
    %c0_i32 = arith.constant 0 : i32
    %c0_i32_0 = arith.constant 0 : i32
    return %arg0, %c0_i32 : i32, i32
  }
  func.func @transform_1(%arg0: i32) -> (i32, i32) {
    %c0_i32 = arith.constant 0 : i32
    %c0_i32_0 = arith.constant 0 : i32
    %c0_i32_1 = arith.constant 0 : i32
    return %c0_i32, %c0_i32_0 : i32, i32
  }
  func.func @transform_2(%arg0: i32) -> (i32, i32) {
    %c0_i32 = arith.constant 0 : i32
    %c0_i32_0 = arith.constant 0 : i32
    return %arg0, %c0_i32 : i32, i32
  }
  func.func @transform_3(%arg0: i32) -> (i32, i32) {
    %c0_i32 = arith.constant 0 : i32
    %c0_i32_0 = arith.constant 0 : i32
    return %arg0, %c0_i32 : i32, i32
  }
  func.func @transform_4(%arg0: i32) -> (i32, i32, i32) {
    %c0_i32 = arith.constant 0 : i32
    %c0_i32_0 = arith.constant 0 : i32
    %c0_i32_1 = arith.constant 0 : i32
    return %arg0, %c0_i32, %c0_i32_0 : i32, i32, i32
  }
  func.func @transform_5(%arg0: i32) -> (i32, i32, i32) {
    %c0_i32 = arith.constant 0 : i32
    %c0_i32_0 = arith.constant 0 : i32
    %c0_i32_1 = arith.constant 0 : i32
    return %arg0, %c0_i32, %c0_i32_0 : i32, i32, i32
  }
}

module attributes {stable_mosaic.version = 11 : i64} {
  func.func @_matmul_stats_kernel(%arg0: i32, %arg1: memref<8x288xbf16, #tpu.memory_space<vmem>>, %arg2: memref<288x64xbf16, #tpu.memory_space<vmem>>, %arg3: memref<8x64xf32, #tpu.memory_space<vmem>>, %arg4: memref<1x1x64xf32, #tpu.memory_space<vmem>>, %arg5: memref<1x1x64xf32, #tpu.memory_space<vmem>>) attributes {dimension_semantics = [#tpu.dimension_semantics<parallel>], iteration_bounds = array<i64: 1>, scalar_prefetch = 0 : i64, scratch_operands = 0 : i64, tpu.core_type = #tpu.core_type<tc>, window_params = [{transform_indices = @transform_0, window_bounds = array<i64: 8, 288>}, {pipeline_mode = #tpu.pipeline_mode<synchronous>, transform_indices = @transform_1, window_bounds = array<i64: 288, 64>}, {transform_indices = @transform_2, window_bounds = array<i64: 8, 64>}, {transform_indices = @transform_3, window_bounds = array<i64: 1, 1, 64>}, {transform_indices = @transform_4, window_bounds = array<i64: 1, 1, 64>}]} {
    %c0 = arith.constant 0 : index
    %c0_0 = arith.constant 0 : index
    %0 = vector.load %arg1[%c0, %c0_0] : memref<8x288xbf16, #tpu.memory_space<vmem>>, vector<8x288xbf16>
    %c0_1 = arith.constant 0 : index
    %c0_2 = arith.constant 0 : index
    %1 = vector.load %arg2[%c0_1, %c0_2] : memref<288x64xbf16, #tpu.memory_space<vmem>>, vector<288x64xbf16>
    %cst = arith.constant dense<0.000000e+00> : vector<8x64xf32>
    %2 = tpu.matmul %0, %1, %cst {dimension_numbers = #tpu.dot_dimension_numbers<[1], [0], [0], [1], [0, 0, 1, 1], [], []>} : vector<8x288xbf16>, vector<288x64xbf16>, vector<8x64xf32> -> vector<8x64xf32>
    %c0_3 = arith.constant 0 : index
    %c0_4 = arith.constant 0 : index
    %3 = vector.load %arg3[%c0_3, %c0_4] : memref<8x64xf32, #tpu.memory_space<vmem>>, vector<8x64xf32>
    tpu.vector_store %arg3[%c0_3, %c0_4], %2 {strides = array<i32>} : memref<8x64xf32, #tpu.memory_space<vmem>>, vector<8x64xf32>,
    %cst_5 = arith.constant dense<0.000000e+00> : vector<64xf32>
    %4 = vector.multi_reduction <add>, %2, %cst_5 [0] : vector<8x64xf32> to vector<64xf32>
    %5 = vector.shape_cast %4 : vector<64xf32> to vector<1x64xf32>
    %6 = vector.shape_cast %5 : vector<1x64xf32> to vector<1x1x64xf32>
    %c0_6 = arith.constant 0 : index
    %c0_7 = arith.constant 0 : index
    %c0_8 = arith.constant 0 : index
    %7 = vector.load %arg4[%c0_6, %c0_7, %c0_8] : memref<1x1x64xf32, #tpu.memory_space<vmem>>, vector<1x1x64xf32>
    tpu.vector_store %arg4[%c0_6, %c0_7, %c0_8], %6 {strides = array<i32>} : memref<1x1x64xf32, #tpu.memory_space<vmem>>, vector<1x1x64xf32>,
    %8 = arith.mulf %2, %2 : vector<8x64xf32>
    %cst_9 = arith.constant dense<0.000000e+00> : vector<64xf32>
    %9 = vector.multi_reduction <add>, %8, %cst_9 [0] : vector<8x64xf32> to vector<64xf32>
    %10 = vector.shape_cast %9 : vector<64xf32> to vector<1x64xf32>
    %11 = vector.shape_cast %10 : vector<1x64xf32> to vector<1x1x64xf32>
    %c0_10 = arith.constant 0 : index
    %c0_11 = arith.constant 0 : index
    %c0_12 = arith.constant 0 : index
    %12 = vector.load %arg5[%c0_10, %c0_11, %c0_12] : memref<1x1x64xf32, #tpu.memory_space<vmem>>, vector<1x1x64xf32>
    tpu.vector_store %arg5[%c0_10, %c0_11, %c0_12], %11 {strides = array<i32>} : memref<1x1x64xf32, #tpu.memory_space<vmem>>, vector<1x1x64xf32>,
    return
  }
  func.func @transform_0(%arg0: i32) -> (i32, i32) {
    %c0_i32 = arith.constant 0 : i32
    %c0_i32_0 = arith.constant 0 : i32
    return %arg0, %c0_i32 : i32, i32
  }
  func.func @transform_1(%arg0: i32) -> (i32, i32) {
    %c0_i32 = arith.constant 0 : i32
    %c0_i32_0 = arith.constant 0 : i32
    %c0_i32_1 = arith.constant 0 : i32
    return %c0_i32, %c0_i32_0 : i32, i32
  }
  func.func @transform_2(%arg0: i32) -> (i32, i32) {
    %c0_i32 = arith.constant 0 : i32
    %c0_i32_0 = arith.constant 0 : i32
    return %arg0, %c0_i32 : i32, i32
  }
  func.func @transform_3(%arg0: i32) -> (i32, i32, i32) {
    %c0_i32 = arith.constant 0 : i32
    %c0_i32_0 = arith.constant 0 : i32
    %c0_i32_1 = arith.constant 0 : i32
    return %arg0, %c0_i32, %c0_i32_0 : i32, i32, i32
  }
  func.func @transform_4(%arg0: i32) -> (i32, i32, i32) {
    %c0_i32 = arith.constant 0 : i32
    %c0_i32_0 = arith.constant 0 : i32
    %c0_i32_1 = arith.constant 0 : i32
    return %arg0, %c0_i32, %c0_i32_0 : i32, i32, i32
  }
}

module attributes {stable_mosaic.version = 11 : i64} {
  func.func @_affine_relu_kernel(%arg0: i32, %arg1: memref<8x64xf32, #tpu.memory_space<vmem>>, %arg2: memref<1x64xf32, #tpu.memory_space<vmem>>, %arg3: memref<1x64xf32, #tpu.memory_space<vmem>>, %arg4: memref<8x64xf32, #tpu.memory_space<vmem>>) attributes {dimension_semantics = [#tpu.dimension_semantics<parallel>], iteration_bounds = array<i64: 1>, scalar_prefetch = 0 : i64, scratch_operands = 0 : i64, tpu.core_type = #tpu.core_type<tc>, window_params = [{transform_indices = @transform_0, window_bounds = array<i64: 8, 64>}, {pipeline_mode = #tpu.pipeline_mode<synchronous>, transform_indices = @transform_1, window_bounds = array<i64: 1, 64>}, {pipeline_mode = #tpu.pipeline_mode<synchronous>, transform_indices = @transform_2, window_bounds = array<i64: 1, 64>}, {transform_indices = @transform_3, window_bounds = array<i64: 8, 64>}]} {
    %c0 = arith.constant 0 : index
    %c0_0 = arith.constant 0 : index
    %0 = vector.load %arg1[%c0, %c0_0] : memref<8x64xf32, #tpu.memory_space<vmem>>, vector<8x64xf32>
    %c0_1 = arith.constant 0 : index
    %c0_2 = arith.constant 0 : index
    %1 = vector.load %arg2[%c0_1, %c0_2] : memref<1x64xf32, #tpu.memory_space<vmem>>, vector<1x64xf32>
    %2 = vector.broadcast %1 : vector<1x64xf32> to vector<8x64xf32>
    %3 = arith.mulf %0, %2 : vector<8x64xf32>
    %c0_3 = arith.constant 0 : index
    %c0_4 = arith.constant 0 : index
    %4 = vector.load %arg3[%c0_3, %c0_4] : memref<1x64xf32, #tpu.memory_space<vmem>>, vector<1x64xf32>
    %5 = vector.broadcast %4 : vector<1x64xf32> to vector<8x64xf32>
    %6 = arith.addf %3, %5 : vector<8x64xf32>
    %cst = arith.constant 0.000000e+00 : f32
    %7 = vector.broadcast %cst : f32 to vector<8x64xf32>
    %8 = arith.maximumf %6, %7 : vector<8x64xf32>
    %c0_5 = arith.constant 0 : index
    %c0_6 = arith.constant 0 : index
    %9 = vector.load %arg4[%c0_5, %c0_6] : memref<8x64xf32, #tpu.memory_space<vmem>>, vector<8x64xf32>
    tpu.vector_store %arg4[%c0_5, %c0_6], %8 {strides = array<i32>} : memref<8x64xf32, #tpu.memory_space<vmem>>, vector<8x64xf32>,
    return
  }
  func.func @transform_0(%arg0: i32) -> (i32, i32) {
    %c0_i32 = arith.constant 0 : i32
    %c0_i32_0 = arith.constant 0 : i32
    return %arg0, %c0_i32 : i32, i32
  }
  func.func @transform_1(%arg0: i32) -> (i32, i32) {
    %c0_i32 = arith.constant 0 : i32
    %c0_i32_0 = arith.constant 0 : i32
    %c0_i32_1 = arith.constant 0 : i32
    return %c0_i32, %c0_i32_0 : i32, i32
  }
  func.func @transform_2(%arg0: i32) -> (i32, i32) {
    %c0_i32 = arith.constant 0 : i32
    %c0_i32_0 = arith.constant 0 : i32
    %c0_i32_1 = arith.constant 0 : i32
    return %c0_i32, %c0_i32_0 : i32, i32
  }
  func.func @transform_3(%arg0: i32) -> (i32, i32) {
    %c0_i32 = arith.constant 0 : i32
    %c0_i32_0 = arith.constant 0 : i32
    return %arg0, %c0_i32 : i32, i32
  }
}

module attributes {stable_mosaic.version = 11 : i64} {
  func.func @_matmul_bias_kernel(%arg0: i32, %arg1: memref<8x64xbf16, #tpu.memory_space<vmem>>, %arg2: memref<64x64xbf16, #tpu.memory_space<vmem>>, %arg3: memref<1x64xf32, #tpu.memory_space<vmem>>, %arg4: memref<8x64xf32, #tpu.memory_space<vmem>>) attributes {dimension_semantics = [#tpu.dimension_semantics<parallel>], iteration_bounds = array<i64: 1>, scalar_prefetch = 0 : i64, scratch_operands = 0 : i64, tpu.core_type = #tpu.core_type<tc>, window_params = [{transform_indices = @transform_0, window_bounds = array<i64: 8, 64>}, {pipeline_mode = #tpu.pipeline_mode<synchronous>, transform_indices = @transform_1, window_bounds = array<i64: 64, 64>}, {pipeline_mode = #tpu.pipeline_mode<synchronous>, transform_indices = @transform_2, window_bounds = array<i64: 1, 64>}, {transform_indices = @transform_3, window_bounds = array<i64: 8, 64>}]} {
    %c0 = arith.constant 0 : index
    %c0_0 = arith.constant 0 : index
    %0 = vector.load %arg1[%c0, %c0_0] : memref<8x64xbf16, #tpu.memory_space<vmem>>, vector<8x64xbf16>
    %c0_1 = arith.constant 0 : index
    %c0_2 = arith.constant 0 : index
    %1 = vector.load %arg2[%c0_1, %c0_2] : memref<64x64xbf16, #tpu.memory_space<vmem>>, vector<64x64xbf16>
    %cst = arith.constant dense<0.000000e+00> : vector<8x64xf32>
    %2 = tpu.matmul %0, %1, %cst {dimension_numbers = #tpu.dot_dimension_numbers<[1], [0], [0], [1], [0, 0, 1, 1], [], []>} : vector<8x64xbf16>, vector<64x64xbf16>, vector<8x64xf32> -> vector<8x64xf32>
    %c0_3 = arith.constant 0 : index
    %c0_4 = arith.constant 0 : index
    %3 = vector.load %arg3[%c0_3, %c0_4] : memref<1x64xf32, #tpu.memory_space<vmem>>, vector<1x64xf32>
    %4 = vector.broadcast %3 : vector<1x64xf32> to vector<8x64xf32>
    %5 = arith.addf %2, %4 : vector<8x64xf32>
    %c0_5 = arith.constant 0 : index
    %c0_6 = arith.constant 0 : index
    %6 = vector.load %arg4[%c0_5, %c0_6] : memref<8x64xf32, #tpu.memory_space<vmem>>, vector<8x64xf32>
    tpu.vector_store %arg4[%c0_5, %c0_6], %5 {strides = array<i32>} : memref<8x64xf32, #tpu.memory_space<vmem>>, vector<8x64xf32>,
    return
  }
  func.func @transform_0(%arg0: i32) -> (i32, i32) {
    %c0_i32 = arith.constant 0 : i32
    %c0_i32_0 = arith.constant 0 : i32
    return %arg0, %c0_i32 : i32, i32
  }
  func.func @transform_1(%arg0: i32) -> (i32, i32) {
    %c0_i32 = arith.constant 0 : i32
    %c0_i32_0 = arith.constant 0 : i32
    %c0_i32_1 = arith.constant 0 : i32
    return %c0_i32, %c0_i32_0 : i32, i32
  }
  func.func @transform_2(%arg0: i32) -> (i32, i32) {
    %c0_i32 = arith.constant 0 : i32
    %c0_i32_0 = arith.constant 0 : i32
    %c0_i32_1 = arith.constant 0 : i32
    return %c0_i32, %c0_i32_0 : i32, i32
  }
  func.func @transform_3(%arg0: i32) -> (i32, i32) {
    %c0_i32 = arith.constant 0 : i32
    %c0_i32_0 = arith.constant 0 : i32
    return %arg0, %c0_i32 : i32, i32
  }
}

module attributes {stable_mosaic.version = 11 : i64} {
  func.func @_res_mid_kernel(%arg0: i32, %arg1: memref<8x288xbf16, #tpu.memory_space<vmem>>, %arg2: memref<288x32xbf16, #tpu.memory_space<vmem>>, %arg3: memref<8x32xf32, #tpu.memory_space<vmem>>, %arg4: memref<8x32xf32, #tpu.memory_space<vmem>>, %arg5: memref<1x1x64xf32, #tpu.memory_space<vmem>>, %arg6: memref<1x1x64xf32, #tpu.memory_space<vmem>>) attributes {dimension_semantics = [#tpu.dimension_semantics<parallel>], iteration_bounds = array<i64: 1>, scalar_prefetch = 0 : i64, scratch_operands = 0 : i64, tpu.core_type = #tpu.core_type<tc>, window_params = [{transform_indices = @transform_0, window_bounds = array<i64: 8, 288>}, {pipeline_mode = #tpu.pipeline_mode<synchronous>, transform_indices = @transform_1, window_bounds = array<i64: 288, 32>}, {transform_indices = @transform_2, window_bounds = array<i64: 8, 32>}, {transform_indices = @transform_3, window_bounds = array<i64: 8, 32>}, {transform_indices = @transform_4, window_bounds = array<i64: 1, 1, 64>}, {transform_indices = @transform_5, window_bounds = array<i64: 1, 1, 64>}]} {
    %c0 = arith.constant 0 : index
    %c0_0 = arith.constant 0 : index
    %0 = vector.load %arg1[%c0, %c0_0] : memref<8x288xbf16, #tpu.memory_space<vmem>>, vector<8x288xbf16>
    %c0_1 = arith.constant 0 : index
    %c0_2 = arith.constant 0 : index
    %1 = vector.load %arg2[%c0_1, %c0_2] : memref<288x32xbf16, #tpu.memory_space<vmem>>, vector<288x32xbf16>
    %cst = arith.constant dense<0.000000e+00> : vector<8x32xf32>
    %2 = tpu.matmul %0, %1, %cst {dimension_numbers = #tpu.dot_dimension_numbers<[1], [0], [0], [1], [0, 0, 1, 1], [], []>} : vector<8x288xbf16>, vector<288x32xbf16>, vector<8x32xf32> -> vector<8x32xf32>
    %c0_3 = arith.constant 0 : index
    %c0_4 = arith.constant 0 : index
    %3 = vector.load %arg4[%c0_3, %c0_4] : memref<8x32xf32, #tpu.memory_space<vmem>>, vector<8x32xf32>
    tpu.vector_store %arg4[%c0_3, %c0_4], %2 {strides = array<i32>} : memref<8x32xf32, #tpu.memory_space<vmem>>, vector<8x32xf32>,
    %c0_5 = arith.constant 0 : index
    %c0_6 = arith.constant 0 : index
    %4 = vector.load %arg3[%c0_5, %c0_6] : memref<8x32xf32, #tpu.memory_space<vmem>>, vector<8x32xf32>
    %cst_7 = arith.constant dense<0.000000e+00> : vector<32xf32>
    %5 = vector.multi_reduction <add>, %2, %cst_7 [0] : vector<8x32xf32> to vector<32xf32>
    %6 = vector.shape_cast %5 : vector<32xf32> to vector<1x32xf32>
    %7 = vector.shape_cast %6 : vector<1x32xf32> to vector<1x1x32xf32>
    %c0_8 = arith.constant 0 : index
    %c0_9 = arith.constant 0 : index
    %c0_10 = arith.constant 0 : index
    %8 = vector.load %arg5[%c0_8, %c0_9, %c0_10] : memref<1x1x64xf32, #tpu.memory_space<vmem>>, vector<1x1x32xf32>
    tpu.vector_store %arg5[%c0_8, %c0_9, %c0_10], %7 {strides = array<i32>} : memref<1x1x64xf32, #tpu.memory_space<vmem>>, vector<1x1x32xf32>,
    %9 = arith.mulf %2, %2 : vector<8x32xf32>
    %cst_11 = arith.constant dense<0.000000e+00> : vector<32xf32>
    %10 = vector.multi_reduction <add>, %9, %cst_11 [0] : vector<8x32xf32> to vector<32xf32>
    %11 = vector.shape_cast %10 : vector<32xf32> to vector<1x32xf32>
    %12 = vector.shape_cast %11 : vector<1x32xf32> to vector<1x1x32xf32>
    %c0_12 = arith.constant 0 : index
    %c0_13 = arith.constant 0 : index
    %c0_14 = arith.constant 0 : index
    %13 = vector.load %arg6[%c0_12, %c0_13, %c0_14] : memref<1x1x64xf32, #tpu.memory_space<vmem>>, vector<1x1x32xf32>
    tpu.vector_store %arg6[%c0_12, %c0_13, %c0_14], %12 {strides = array<i32>} : memref<1x1x64xf32, #tpu.memory_space<vmem>>, vector<1x1x32xf32>,
    %cst_15 = arith.constant dense<0.000000e+00> : vector<32xf32>
    %14 = vector.multi_reduction <add>, %4, %cst_15 [0] : vector<8x32xf32> to vector<32xf32>
    %15 = vector.shape_cast %14 : vector<32xf32> to vector<1x32xf32>
    %16 = vector.shape_cast %15 : vector<1x32xf32> to vector<1x1x32xf32>
    %c0_16 = arith.constant 0 : index
    %c0_17 = arith.constant 0 : index
    %c32 = arith.constant 32 : index
    %17 = vector.load %arg5[%c0_16, %c0_17, %c32] : memref<1x1x64xf32, #tpu.memory_space<vmem>>, vector<1x1x32xf32>
    tpu.vector_store %arg5[%c0_16, %c0_17, %c32], %16 {strides = array<i32>} : memref<1x1x64xf32, #tpu.memory_space<vmem>>, vector<1x1x32xf32>,
    %18 = arith.mulf %4, %4 : vector<8x32xf32>
    %cst_18 = arith.constant dense<0.000000e+00> : vector<32xf32>
    %19 = vector.multi_reduction <add>, %18, %cst_18 [0] : vector<8x32xf32> to vector<32xf32>
    %20 = vector.shape_cast %19 : vector<32xf32> to vector<1x32xf32>
    %21 = vector.shape_cast %20 : vector<1x32xf32> to vector<1x1x32xf32>
    %c0_19 = arith.constant 0 : index
    %c0_20 = arith.constant 0 : index
    %c32_21 = arith.constant 32 : index
    %22 = vector.load %arg6[%c0_19, %c0_20, %c32_21] : memref<1x1x64xf32, #tpu.memory_space<vmem>>, vector<1x1x32xf32>
    tpu.vector_store %arg6[%c0_19, %c0_20, %c32_21], %21 {strides = array<i32>} : memref<1x1x64xf32, #tpu.memory_space<vmem>>, vector<1x1x32xf32>,
    return
  }
  func.func @transform_0(%arg0: i32) -> (i32, i32) {
    %c0_i32 = arith.constant 0 : i32
    %c0_i32_0 = arith.constant 0 : i32
    return %arg0, %c0_i32 : i32, i32
  }
  func.func @transform_1(%arg0: i32) -> (i32, i32) {
    %c0_i32 = arith.constant 0 : i32
    %c0_i32_0 = arith.constant 0 : i32
    %c0_i32_1 = arith.constant 0 : i32
    return %c0_i32, %c0_i32_0 : i32, i32
  }
  func.func @transform_2(%arg0: i32) -> (i32, i32) {
    %c0_i32 = arith.constant 0 : i32
    %c0_i32_0 = arith.constant 0 : i32
    return %arg0, %c0_i32 : i32, i32
  }
  func.func @transform_3(%arg0: i32) -> (i32, i32) {
    %c0_i32 = arith.constant 0 : i32
    %c0_i32_0 = arith.constant 0 : i32
    return %arg0, %c0_i32 : i32, i32
  }
  func.func @transform_4(%arg0: i32) -> (i32, i32, i32) {
    %c0_i32 = arith.constant 0 : i32
    %c0_i32_0 = arith.constant 0 : i32
    %c0_i32_1 = arith.constant 0 : i32
    return %arg0, %c0_i32, %c0_i32_0 : i32, i32, i32
  }
  func.func @transform_5(%arg0: i32) -> (i32, i32, i32) {
    %c0_i32 = arith.constant 0 : i32
    %c0_i32_0 = arith.constant 0 : i32
    %c0_i32_1 = arith.constant 0 : i32
    return %arg0, %c0_i32, %c0_i32_0 : i32, i32, i32
  }
}

module attributes {stable_mosaic.version = 11 : i64} {
  func.func @_res_epilogue_kernel(%arg0: i32, %arg1: memref<8x64xf32, #tpu.memory_space<vmem>>, %arg2: memref<8x32xf32, #tpu.memory_space<vmem>>, %arg3: memref<8x32xf32, #tpu.memory_space<vmem>>, %arg4: memref<1x64xf32, #tpu.memory_space<vmem>>, %arg5: memref<1x64xf32, #tpu.memory_space<vmem>>, %arg6: memref<8x64xf32, #tpu.memory_space<vmem>>) attributes {dimension_semantics = [#tpu.dimension_semantics<parallel>], iteration_bounds = array<i64: 1>, scalar_prefetch = 0 : i64, scratch_operands = 0 : i64, tpu.core_type = #tpu.core_type<tc>, window_params = [{transform_indices = @transform_0, window_bounds = array<i64: 8, 64>}, {transform_indices = @transform_1, window_bounds = array<i64: 8, 32>}, {transform_indices = @transform_2, window_bounds = array<i64: 8, 32>}, {pipeline_mode = #tpu.pipeline_mode<synchronous>, transform_indices = @transform_3, window_bounds = array<i64: 1, 64>}, {pipeline_mode = #tpu.pipeline_mode<synchronous>, transform_indices = @transform_4, window_bounds = array<i64: 1, 64>}, {transform_indices = @transform_5, window_bounds = array<i64: 8, 64>}]} {
    %c0 = arith.constant 0 : index
    %c0_0 = arith.constant 0 : index
    %0 = vector.load %arg4[%c0, %c0_0] : memref<1x64xf32, #tpu.memory_space<vmem>>, vector<1x64xf32>
    %c0_1 = arith.constant 0 : index
    %c0_2 = arith.constant 0 : index
    %1 = vector.load %arg5[%c0_1, %c0_2] : memref<1x64xf32, #tpu.memory_space<vmem>>, vector<1x64xf32>
    %c0_3 = arith.constant 0 : index
    %c0_4 = arith.constant 0 : index
    %2 = vector.load %arg1[%c0_3, %c0_4] : memref<8x64xf32, #tpu.memory_space<vmem>>, vector<8x32xf32>
    %c0_5 = arith.constant 0 : index
    %c0_6 = arith.constant 0 : index
    %3 = vector.load %arg2[%c0_5, %c0_6] : memref<8x32xf32, #tpu.memory_space<vmem>>, vector<8x32xf32>
    %4 = vector.extract_strided_slice %0 {offsets = [0, 0], sizes = [1, 32], strides = [1, 1]} : vector<1x64xf32> to vector<1x32xf32>
    %5 = vector.broadcast %4 : vector<1x32xf32> to vector<8x32xf32>
    %6 = arith.mulf %3, %5 : vector<8x32xf32>
    %7 = arith.addf %2, %6 : vector<8x32xf32>
    %8 = vector.extract_strided_slice %1 {offsets = [0, 0], sizes = [1, 32], strides = [1, 1]} : vector<1x64xf32> to vector<1x32xf32>
    %9 = vector.broadcast %8 : vector<1x32xf32> to vector<8x32xf32>
    %10 = arith.addf %7, %9 : vector<8x32xf32>
    %c0_7 = arith.constant 0 : index
    %c0_8 = arith.constant 0 : index
    %11 = vector.load %arg6[%c0_7, %c0_8] : memref<8x64xf32, #tpu.memory_space<vmem>>, vector<8x32xf32>
    tpu.vector_store %arg6[%c0_7, %c0_8], %10 {strides = array<i32>} : memref<8x64xf32, #tpu.memory_space<vmem>>, vector<8x32xf32>,
    %c0_9 = arith.constant 0 : index
    %c32 = arith.constant 32 : index
    %12 = vector.load %arg1[%c0_9, %c32] : memref<8x64xf32, #tpu.memory_space<vmem>>, vector<8x32xf32>
    %c0_10 = arith.constant 0 : index
    %c0_11 = arith.constant 0 : index
    %13 = vector.load %arg3[%c0_10, %c0_11] : memref<8x32xf32, #tpu.memory_space<vmem>>, vector<8x32xf32>
    %14 = vector.extract_strided_slice %0 {offsets = [0, 32], sizes = [1, 32], strides = [1, 1]} : vector<1x64xf32> to vector<1x32xf32>
    %15 = vector.broadcast %14 : vector<1x32xf32> to vector<8x32xf32>
    %16 = arith.mulf %13, %15 : vector<8x32xf32>
    %17 = arith.addf %12, %16 : vector<8x32xf32>
    %18 = vector.extract_strided_slice %1 {offsets = [0, 32], sizes = [1, 32], strides = [1, 1]} : vector<1x64xf32> to vector<1x32xf32>
    %19 = vector.broadcast %18 : vector<1x32xf32> to vector<8x32xf32>
    %20 = arith.addf %17, %19 : vector<8x32xf32>
    %c0_12 = arith.constant 0 : index
    %c32_13 = arith.constant 32 : index
    %21 = vector.load %arg6[%c0_12, %c32_13] : memref<8x64xf32, #tpu.memory_space<vmem>>, vector<8x32xf32>
    tpu.vector_store %arg6[%c0_12, %c32_13], %20 {strides = array<i32>} : memref<8x64xf32, #tpu.memory_space<vmem>>, vector<8x32xf32>,
    return
  }
  func.func @transform_0(%arg0: i32) -> (i32, i32) {
    %c0_i32 = arith.constant 0 : i32
    %c0_i32_0 = arith.constant 0 : i32
    return %arg0, %c0_i32 : i32, i32
  }
  func.func @transform_1(%arg0: i32) -> (i32, i32) {
    %c0_i32 = arith.constant 0 : i32
    %c0_i32_0 = arith.constant 0 : i32
    return %arg0, %c0_i32 : i32, i32
  }
  func.func @transform_2(%arg0: i32) -> (i32, i32) {
    %c0_i32 = arith.constant 0 : i32
    %c0_i32_0 = arith.constant 0 : i32
    return %arg0, %c0_i32 : i32, i32
  }
  func.func @transform_3(%arg0: i32) -> (i32, i32) {
    %c0_i32 = arith.constant 0 : i32
    %c0_i32_0 = arith.constant 0 : i32
    %c0_i32_1 = arith.constant 0 : i32
    return %c0_i32, %c0_i32_0 : i32, i32
  }
  func.func @transform_4(%arg0: i32) -> (i32, i32) {
    %c0_i32 = arith.constant 0 : i32
    %c0_i32_0 = arith.constant 0 : i32
    %c0_i32_1 = arith.constant 0 : i32
    return %c0_i32, %c0_i32_0 : i32, i32
  }
  func.func @transform_5(%arg0: i32) -> (i32, i32) {
    %c0_i32 = arith.constant 0 : i32
    %c0_i32_0 = arith.constant 0 : i32
    return %arg0, %c0_i32 : i32, i32
  }
}

module attributes {stable_mosaic.version = 11 : i64} {
  func.func @_matmul_stats_kernel(%arg0: i32, %arg1: memref<8x576xbf16, #tpu.memory_space<vmem>>, %arg2: memref<576x96xbf16, #tpu.memory_space<vmem>>, %arg3: memref<8x96xf32, #tpu.memory_space<vmem>>, %arg4: memref<1x1x96xf32, #tpu.memory_space<vmem>>, %arg5: memref<1x1x96xf32, #tpu.memory_space<vmem>>) attributes {dimension_semantics = [#tpu.dimension_semantics<parallel>], iteration_bounds = array<i64: 1>, scalar_prefetch = 0 : i64, scratch_operands = 0 : i64, tpu.core_type = #tpu.core_type<tc>, window_params = [{transform_indices = @transform_0, window_bounds = array<i64: 8, 576>}, {pipeline_mode = #tpu.pipeline_mode<synchronous>, transform_indices = @transform_1, window_bounds = array<i64: 576, 96>}, {transform_indices = @transform_2, window_bounds = array<i64: 8, 96>}, {transform_indices = @transform_3, window_bounds = array<i64: 1, 1, 96>}, {transform_indices = @transform_4, window_bounds = array<i64: 1, 1, 96>}]} {
    %c0 = arith.constant 0 : index
    %c0_0 = arith.constant 0 : index
    %0 = vector.load %arg1[%c0, %c0_0] : memref<8x576xbf16, #tpu.memory_space<vmem>>, vector<8x576xbf16>
    %c0_1 = arith.constant 0 : index
    %c0_2 = arith.constant 0 : index
    %1 = vector.load %arg2[%c0_1, %c0_2] : memref<576x96xbf16, #tpu.memory_space<vmem>>, vector<576x96xbf16>
    %cst = arith.constant dense<0.000000e+00> : vector<8x96xf32>
    %2 = tpu.matmul %0, %1, %cst {dimension_numbers = #tpu.dot_dimension_numbers<[1], [0], [0], [1], [0, 0, 1, 1], [], []>} : vector<8x576xbf16>, vector<576x96xbf16>, vector<8x96xf32> -> vector<8x96xf32>
    %c0_3 = arith.constant 0 : index
    %c0_4 = arith.constant 0 : index
    %3 = vector.load %arg3[%c0_3, %c0_4] : memref<8x96xf32, #tpu.memory_space<vmem>>, vector<8x96xf32>
    tpu.vector_store %arg3[%c0_3, %c0_4], %2 {strides = array<i32>} : memref<8x96xf32, #tpu.memory_space<vmem>>, vector<8x96xf32>,
    %cst_5 = arith.constant dense<0.000000e+00> : vector<96xf32>
    %4 = vector.multi_reduction <add>, %2, %cst_5 [0] : vector<8x96xf32> to vector<96xf32>
    %5 = vector.shape_cast %4 : vector<96xf32> to vector<1x96xf32>
    %6 = vector.shape_cast %5 : vector<1x96xf32> to vector<1x1x96xf32>
    %c0_6 = arith.constant 0 : index
    %c0_7 = arith.constant 0 : index
    %c0_8 = arith.constant 0 : index
    %7 = vector.load %arg4[%c0_6, %c0_7, %c0_8] : memref<1x1x96xf32, #tpu.memory_space<vmem>>, vector<1x1x96xf32>
    tpu.vector_store %arg4[%c0_6, %c0_7, %c0_8], %6 {strides = array<i32>} : memref<1x1x96xf32, #tpu.memory_space<vmem>>, vector<1x1x96xf32>,
    %8 = arith.mulf %2, %2 : vector<8x96xf32>
    %cst_9 = arith.constant dense<0.000000e+00> : vector<96xf32>
    %9 = vector.multi_reduction <add>, %8, %cst_9 [0] : vector<8x96xf32> to vector<96xf32>
    %10 = vector.shape_cast %9 : vector<96xf32> to vector<1x96xf32>
    %11 = vector.shape_cast %10 : vector<1x96xf32> to vector<1x1x96xf32>
    %c0_10 = arith.constant 0 : index
    %c0_11 = arith.constant 0 : index
    %c0_12 = arith.constant 0 : index
    %12 = vector.load %arg5[%c0_10, %c0_11, %c0_12] : memref<1x1x96xf32, #tpu.memory_space<vmem>>, vector<1x1x96xf32>
    tpu.vector_store %arg5[%c0_10, %c0_11, %c0_12], %11 {strides = array<i32>} : memref<1x1x96xf32, #tpu.memory_space<vmem>>, vector<1x1x96xf32>,
    return
  }
  func.func @transform_0(%arg0: i32) -> (i32, i32) {
    %c0_i32 = arith.constant 0 : i32
    %c0_i32_0 = arith.constant 0 : i32
    return %arg0, %c0_i32 : i32, i32
  }
  func.func @transform_1(%arg0: i32) -> (i32, i32) {
    %c0_i32 = arith.constant 0 : i32
    %c0_i32_0 = arith.constant 0 : i32
    %c0_i32_1 = arith.constant 0 : i32
    return %c0_i32, %c0_i32_0 : i32, i32
  }
  func.func @transform_2(%arg0: i32) -> (i32, i32) {
    %c0_i32 = arith.constant 0 : i32
    %c0_i32_0 = arith.constant 0 : i32
    return %arg0, %c0_i32 : i32, i32
  }
  func.func @transform_3(%arg0: i32) -> (i32, i32, i32) {
    %c0_i32 = arith.constant 0 : i32
    %c0_i32_0 = arith.constant 0 : i32
    %c0_i32_1 = arith.constant 0 : i32
    return %arg0, %c0_i32, %c0_i32_0 : i32, i32, i32
  }
  func.func @transform_4(%arg0: i32) -> (i32, i32, i32) {
    %c0_i32 = arith.constant 0 : i32
    %c0_i32_0 = arith.constant 0 : i32
    %c0_i32_1 = arith.constant 0 : i32
    return %arg0, %c0_i32, %c0_i32_0 : i32, i32, i32
  }
}

module attributes {stable_mosaic.version = 11 : i64} {
  func.func @_affine_relu_kernel(%arg0: i32, %arg1: memref<8x96xf32, #tpu.memory_space<vmem>>, %arg2: memref<1x96xf32, #tpu.memory_space<vmem>>, %arg3: memref<1x96xf32, #tpu.memory_space<vmem>>, %arg4: memref<8x96xf32, #tpu.memory_space<vmem>>) attributes {dimension_semantics = [#tpu.dimension_semantics<parallel>], iteration_bounds = array<i64: 1>, scalar_prefetch = 0 : i64, scratch_operands = 0 : i64, tpu.core_type = #tpu.core_type<tc>, window_params = [{transform_indices = @transform_0, window_bounds = array<i64: 8, 96>}, {pipeline_mode = #tpu.pipeline_mode<synchronous>, transform_indices = @transform_1, window_bounds = array<i64: 1, 96>}, {pipeline_mode = #tpu.pipeline_mode<synchronous>, transform_indices = @transform_2, window_bounds = array<i64: 1, 96>}, {transform_indices = @transform_3, window_bounds = array<i64: 8, 96>}]} {
    %c0 = arith.constant 0 : index
    %c0_0 = arith.constant 0 : index
    %0 = vector.load %arg1[%c0, %c0_0] : memref<8x96xf32, #tpu.memory_space<vmem>>, vector<8x96xf32>
    %c0_1 = arith.constant 0 : index
    %c0_2 = arith.constant 0 : index
    %1 = vector.load %arg2[%c0_1, %c0_2] : memref<1x96xf32, #tpu.memory_space<vmem>>, vector<1x96xf32>
    %2 = vector.broadcast %1 : vector<1x96xf32> to vector<8x96xf32>
    %3 = arith.mulf %0, %2 : vector<8x96xf32>
    %c0_3 = arith.constant 0 : index
    %c0_4 = arith.constant 0 : index
    %4 = vector.load %arg3[%c0_3, %c0_4] : memref<1x96xf32, #tpu.memory_space<vmem>>, vector<1x96xf32>
    %5 = vector.broadcast %4 : vector<1x96xf32> to vector<8x96xf32>
    %6 = arith.addf %3, %5 : vector<8x96xf32>
    %cst = arith.constant 0.000000e+00 : f32
    %7 = vector.broadcast %cst : f32 to vector<8x96xf32>
    %8 = arith.maximumf %6, %7 : vector<8x96xf32>
    %c0_5 = arith.constant 0 : index
    %c0_6 = arith.constant 0 : index
    %9 = vector.load %arg4[%c0_5, %c0_6] : memref<8x96xf32, #tpu.memory_space<vmem>>, vector<8x96xf32>
    tpu.vector_store %arg4[%c0_5, %c0_6], %8 {strides = array<i32>} : memref<8x96xf32, #tpu.memory_space<vmem>>, vector<8x96xf32>,
    return
  }
  func.func @transform_0(%arg0: i32) -> (i32, i32) {
    %c0_i32 = arith.constant 0 : i32
    %c0_i32_0 = arith.constant 0 : i32
    return %arg0, %c0_i32 : i32, i32
  }
  func.func @transform_1(%arg0: i32) -> (i32, i32) {
    %c0_i32 = arith.constant 0 : i32
    %c0_i32_0 = arith.constant 0 : i32
    %c0_i32_1 = arith.constant 0 : i32
    return %c0_i32, %c0_i32_0 : i32, i32
  }
  func.func @transform_2(%arg0: i32) -> (i32, i32) {
    %c0_i32 = arith.constant 0 : i32
    %c0_i32_0 = arith.constant 0 : i32
    %c0_i32_1 = arith.constant 0 : i32
    return %c0_i32, %c0_i32_0 : i32, i32
  }
  func.func @transform_3(%arg0: i32) -> (i32, i32) {
    %c0_i32 = arith.constant 0 : i32
    %c0_i32_0 = arith.constant 0 : i32
    return %arg0, %c0_i32 : i32, i32
  }
}

module attributes {stable_mosaic.version = 11 : i64} {
  func.func @_matmul_bias_kernel(%arg0: i32, %arg1: memref<8x96xbf16, #tpu.memory_space<vmem>>, %arg2: memref<96x96xbf16, #tpu.memory_space<vmem>>, %arg3: memref<1x96xf32, #tpu.memory_space<vmem>>, %arg4: memref<8x96xf32, #tpu.memory_space<vmem>>) attributes {dimension_semantics = [#tpu.dimension_semantics<parallel>], iteration_bounds = array<i64: 1>, scalar_prefetch = 0 : i64, scratch_operands = 0 : i64, tpu.core_type = #tpu.core_type<tc>, window_params = [{transform_indices = @transform_0, window_bounds = array<i64: 8, 96>}, {pipeline_mode = #tpu.pipeline_mode<synchronous>, transform_indices = @transform_1, window_bounds = array<i64: 96, 96>}, {pipeline_mode = #tpu.pipeline_mode<synchronous>, transform_indices = @transform_2, window_bounds = array<i64: 1, 96>}, {transform_indices = @transform_3, window_bounds = array<i64: 8, 96>}]} {
    %c0 = arith.constant 0 : index
    %c0_0 = arith.constant 0 : index
    %0 = vector.load %arg1[%c0, %c0_0] : memref<8x96xbf16, #tpu.memory_space<vmem>>, vector<8x96xbf16>
    %c0_1 = arith.constant 0 : index
    %c0_2 = arith.constant 0 : index
    %1 = vector.load %arg2[%c0_1, %c0_2] : memref<96x96xbf16, #tpu.memory_space<vmem>>, vector<96x96xbf16>
    %cst = arith.constant dense<0.000000e+00> : vector<8x96xf32>
    %2 = tpu.matmul %0, %1, %cst {dimension_numbers = #tpu.dot_dimension_numbers<[1], [0], [0], [1], [0, 0, 1, 1], [], []>} : vector<8x96xbf16>, vector<96x96xbf16>, vector<8x96xf32> -> vector<8x96xf32>
    %c0_3 = arith.constant 0 : index
    %c0_4 = arith.constant 0 : index
    %3 = vector.load %arg3[%c0_3, %c0_4] : memref<1x96xf32, #tpu.memory_space<vmem>>, vector<1x96xf32>
    %4 = vector.broadcast %3 : vector<1x96xf32> to vector<8x96xf32>
    %5 = arith.addf %2, %4 : vector<8x96xf32>
    %c0_5 = arith.constant 0 : index
    %c0_6 = arith.constant 0 : index
    %6 = vector.load %arg4[%c0_5, %c0_6] : memref<8x96xf32, #tpu.memory_space<vmem>>, vector<8x96xf32>
    tpu.vector_store %arg4[%c0_5, %c0_6], %5 {strides = array<i32>} : memref<8x96xf32, #tpu.memory_space<vmem>>, vector<8x96xf32>,
    return
  }
  func.func @transform_0(%arg0: i32) -> (i32, i32) {
    %c0_i32 = arith.constant 0 : i32
    %c0_i32_0 = arith.constant 0 : i32
    return %arg0, %c0_i32 : i32, i32
  }
  func.func @transform_1(%arg0: i32) -> (i32, i32) {
    %c0_i32 = arith.constant 0 : i32
    %c0_i32_0 = arith.constant 0 : i32
    %c0_i32_1 = arith.constant 0 : i32
    return %c0_i32, %c0_i32_0 : i32, i32
  }
  func.func @transform_2(%arg0: i32) -> (i32, i32) {
    %c0_i32 = arith.constant 0 : i32
    %c0_i32_0 = arith.constant 0 : i32
    %c0_i32_1 = arith.constant 0 : i32
    return %c0_i32, %c0_i32_0 : i32, i32
  }
  func.func @transform_3(%arg0: i32) -> (i32, i32) {
    %c0_i32 = arith.constant 0 : i32
    %c0_i32_0 = arith.constant 0 : i32
    return %arg0, %c0_i32 : i32, i32
  }
}

module attributes {stable_mosaic.version = 11 : i64} {
  func.func @_res_mid_kernel(%arg0: i32, %arg1: memref<8x432xbf16, #tpu.memory_space<vmem>>, %arg2: memref<432x48xbf16, #tpu.memory_space<vmem>>, %arg3: memref<8x48xf32, #tpu.memory_space<vmem>>, %arg4: memref<8x48xf32, #tpu.memory_space<vmem>>, %arg5: memref<1x1x96xf32, #tpu.memory_space<vmem>>, %arg6: memref<1x1x96xf32, #tpu.memory_space<vmem>>) attributes {dimension_semantics = [#tpu.dimension_semantics<parallel>], iteration_bounds = array<i64: 1>, scalar_prefetch = 0 : i64, scratch_operands = 0 : i64, tpu.core_type = #tpu.core_type<tc>, window_params = [{transform_indices = @transform_0, window_bounds = array<i64: 8, 432>}, {pipeline_mode = #tpu.pipeline_mode<synchronous>, transform_indices = @transform_1, window_bounds = array<i64: 432, 48>}, {transform_indices = @transform_2, window_bounds = array<i64: 8, 48>}, {transform_indices = @transform_3, window_bounds = array<i64: 8, 48>}, {transform_indices = @transform_4, window_bounds = array<i64: 1, 1, 96>}, {transform_indices = @transform_5, window_bounds = array<i64: 1, 1, 96>}]} {
    %c0 = arith.constant 0 : index
    %c0_0 = arith.constant 0 : index
    %0 = vector.load %arg1[%c0, %c0_0] : memref<8x432xbf16, #tpu.memory_space<vmem>>, vector<8x432xbf16>
    %c0_1 = arith.constant 0 : index
    %c0_2 = arith.constant 0 : index
    %1 = vector.load %arg2[%c0_1, %c0_2] : memref<432x48xbf16, #tpu.memory_space<vmem>>, vector<432x48xbf16>
    %cst = arith.constant dense<0.000000e+00> : vector<8x48xf32>
    %2 = tpu.matmul %0, %1, %cst {dimension_numbers = #tpu.dot_dimension_numbers<[1], [0], [0], [1], [0, 0, 1, 1], [], []>} : vector<8x432xbf16>, vector<432x48xbf16>, vector<8x48xf32> -> vector<8x48xf32>
    %c0_3 = arith.constant 0 : index
    %c0_4 = arith.constant 0 : index
    %3 = vector.load %arg4[%c0_3, %c0_4] : memref<8x48xf32, #tpu.memory_space<vmem>>, vector<8x48xf32>
    tpu.vector_store %arg4[%c0_3, %c0_4], %2 {strides = array<i32>} : memref<8x48xf32, #tpu.memory_space<vmem>>, vector<8x48xf32>,
    %c0_5 = arith.constant 0 : index
    %c0_6 = arith.constant 0 : index
    %4 = vector.load %arg3[%c0_5, %c0_6] : memref<8x48xf32, #tpu.memory_space<vmem>>, vector<8x48xf32>
    %cst_7 = arith.constant dense<0.000000e+00> : vector<48xf32>
    %5 = vector.multi_reduction <add>, %2, %cst_7 [0] : vector<8x48xf32> to vector<48xf32>
    %6 = vector.shape_cast %5 : vector<48xf32> to vector<1x48xf32>
    %7 = vector.shape_cast %6 : vector<1x48xf32> to vector<1x1x48xf32>
    %c0_8 = arith.constant 0 : index
    %c0_9 = arith.constant 0 : index
    %c0_10 = arith.constant 0 : index
    %8 = vector.load %arg5[%c0_8, %c0_9, %c0_10] : memref<1x1x96xf32, #tpu.memory_space<vmem>>, vector<1x1x48xf32>
    tpu.vector_store %arg5[%c0_8, %c0_9, %c0_10], %7 {strides = array<i32>} : memref<1x1x96xf32, #tpu.memory_space<vmem>>, vector<1x1x48xf32>,
    %9 = arith.mulf %2, %2 : vector<8x48xf32>
    %cst_11 = arith.constant dense<0.000000e+00> : vector<48xf32>
    %10 = vector.multi_reduction <add>, %9, %cst_11 [0] : vector<8x48xf32> to vector<48xf32>
    %11 = vector.shape_cast %10 : vector<48xf32> to vector<1x48xf32>
    %12 = vector.shape_cast %11 : vector<1x48xf32> to vector<1x1x48xf32>
    %c0_12 = arith.constant 0 : index
    %c0_13 = arith.constant 0 : index
    %c0_14 = arith.constant 0 : index
    %13 = vector.load %arg6[%c0_12, %c0_13, %c0_14] : memref<1x1x96xf32, #tpu.memory_space<vmem>>, vector<1x1x48xf32>
    tpu.vector_store %arg6[%c0_12, %c0_13, %c0_14], %12 {strides = array<i32>} : memref<1x1x96xf32, #tpu.memory_space<vmem>>, vector<1x1x48xf32>,
    %cst_15 = arith.constant dense<0.000000e+00> : vector<48xf32>
    %14 = vector.multi_reduction <add>, %4, %cst_15 [0] : vector<8x48xf32> to vector<48xf32>
    %15 = vector.shape_cast %14 : vector<48xf32> to vector<1x48xf32>
    %16 = vector.shape_cast %15 : vector<1x48xf32> to vector<1x1x48xf32>
    %c0_16 = arith.constant 0 : index
    %c0_17 = arith.constant 0 : index
    %c48 = arith.constant 48 : index
    %17 = vector.load %arg5[%c0_16, %c0_17, %c48] : memref<1x1x96xf32, #tpu.memory_space<vmem>>, vector<1x1x48xf32>
    tpu.vector_store %arg5[%c0_16, %c0_17, %c48], %16 {strides = array<i32>} : memref<1x1x96xf32, #tpu.memory_space<vmem>>, vector<1x1x48xf32>,
    %18 = arith.mulf %4, %4 : vector<8x48xf32>
    %cst_18 = arith.constant dense<0.000000e+00> : vector<48xf32>
    %19 = vector.multi_reduction <add>, %18, %cst_18 [0] : vector<8x48xf32> to vector<48xf32>
    %20 = vector.shape_cast %19 : vector<48xf32> to vector<1x48xf32>
    %21 = vector.shape_cast %20 : vector<1x48xf32> to vector<1x1x48xf32>
    %c0_19 = arith.constant 0 : index
    %c0_20 = arith.constant 0 : index
    %c48_21 = arith.constant 48 : index
    %22 = vector.load %arg6[%c0_19, %c0_20, %c48_21] : memref<1x1x96xf32, #tpu.memory_space<vmem>>, vector<1x1x48xf32>
    tpu.vector_store %arg6[%c0_19, %c0_20, %c48_21], %21 {strides = array<i32>} : memref<1x1x96xf32, #tpu.memory_space<vmem>>, vector<1x1x48xf32>,
    return
  }
  func.func @transform_0(%arg0: i32) -> (i32, i32) {
    %c0_i32 = arith.constant 0 : i32
    %c0_i32_0 = arith.constant 0 : i32
    return %arg0, %c0_i32 : i32, i32
  }
  func.func @transform_1(%arg0: i32) -> (i32, i32) {
    %c0_i32 = arith.constant 0 : i32
    %c0_i32_0 = arith.constant 0 : i32
    %c0_i32_1 = arith.constant 0 : i32
    return %c0_i32, %c0_i32_0 : i32, i32
  }
  func.func @transform_2(%arg0: i32) -> (i32, i32) {
    %c0_i32 = arith.constant 0 : i32
    %c0_i32_0 = arith.constant 0 : i32
    return %arg0, %c0_i32 : i32, i32
  }
  func.func @transform_3(%arg0: i32) -> (i32, i32) {
    %c0_i32 = arith.constant 0 : i32
    %c0_i32_0 = arith.constant 0 : i32
    return %arg0, %c0_i32 : i32, i32
  }
  func.func @transform_4(%arg0: i32) -> (i32, i32, i32) {
    %c0_i32 = arith.constant 0 : i32
    %c0_i32_0 = arith.constant 0 : i32
    %c0_i32_1 = arith.constant 0 : i32
    return %arg0, %c0_i32, %c0_i32_0 : i32, i32, i32
  }
  func.func @transform_5(%arg0: i32) -> (i32, i32, i32) {
    %c0_i32 = arith.constant 0 : i32
    %c0_i32_0 = arith.constant 0 : i32
    %c0_i32_1 = arith.constant 0 : i32
    return %arg0, %c0_i32, %c0_i32_0 : i32, i32, i32
  }
}

module attributes {stable_mosaic.version = 11 : i64} {
  func.func @_res_epilogue_kernel(%arg0: i32, %arg1: memref<8x96xf32, #tpu.memory_space<vmem>>, %arg2: memref<8x48xf32, #tpu.memory_space<vmem>>, %arg3: memref<8x48xf32, #tpu.memory_space<vmem>>, %arg4: memref<1x96xf32, #tpu.memory_space<vmem>>, %arg5: memref<1x96xf32, #tpu.memory_space<vmem>>, %arg6: memref<8x96xf32, #tpu.memory_space<vmem>>) attributes {dimension_semantics = [#tpu.dimension_semantics<parallel>], iteration_bounds = array<i64: 1>, scalar_prefetch = 0 : i64, scratch_operands = 0 : i64, tpu.core_type = #tpu.core_type<tc>, window_params = [{transform_indices = @transform_0, window_bounds = array<i64: 8, 96>}, {transform_indices = @transform_1, window_bounds = array<i64: 8, 48>}, {transform_indices = @transform_2, window_bounds = array<i64: 8, 48>}, {pipeline_mode = #tpu.pipeline_mode<synchronous>, transform_indices = @transform_3, window_bounds = array<i64: 1, 96>}, {pipeline_mode = #tpu.pipeline_mode<synchronous>, transform_indices = @transform_4, window_bounds = array<i64: 1, 96>}, {transform_indices = @transform_5, window_bounds = array<i64: 8, 96>}]} {
    %c0 = arith.constant 0 : index
    %c0_0 = arith.constant 0 : index
    %0 = vector.load %arg4[%c0, %c0_0] : memref<1x96xf32, #tpu.memory_space<vmem>>, vector<1x96xf32>
    %c0_1 = arith.constant 0 : index
    %c0_2 = arith.constant 0 : index
    %1 = vector.load %arg5[%c0_1, %c0_2] : memref<1x96xf32, #tpu.memory_space<vmem>>, vector<1x96xf32>
    %c0_3 = arith.constant 0 : index
    %c0_4 = arith.constant 0 : index
    %2 = vector.load %arg1[%c0_3, %c0_4] : memref<8x96xf32, #tpu.memory_space<vmem>>, vector<8x48xf32>
    %c0_5 = arith.constant 0 : index
    %c0_6 = arith.constant 0 : index
    %3 = vector.load %arg2[%c0_5, %c0_6] : memref<8x48xf32, #tpu.memory_space<vmem>>, vector<8x48xf32>
    %4 = vector.extract_strided_slice %0 {offsets = [0, 0], sizes = [1, 48], strides = [1, 1]} : vector<1x96xf32> to vector<1x48xf32>
    %5 = vector.broadcast %4 : vector<1x48xf32> to vector<8x48xf32>
    %6 = arith.mulf %3, %5 : vector<8x48xf32>
    %7 = arith.addf %2, %6 : vector<8x48xf32>
    %8 = vector.extract_strided_slice %1 {offsets = [0, 0], sizes = [1, 48], strides = [1, 1]} : vector<1x96xf32> to vector<1x48xf32>
    %9 = vector.broadcast %8 : vector<1x48xf32> to vector<8x48xf32>
    %10 = arith.addf %7, %9 : vector<8x48xf32>
    %c0_7 = arith.constant 0 : index
    %c0_8 = arith.constant 0 : index
    %11 = vector.load %arg6[%c0_7, %c0_8] : memref<8x96xf32, #tpu.memory_space<vmem>>, vector<8x48xf32>
    tpu.vector_store %arg6[%c0_7, %c0_8], %10 {strides = array<i32>} : memref<8x96xf32, #tpu.memory_space<vmem>>, vector<8x48xf32>,
    %c0_9 = arith.constant 0 : index
    %c48 = arith.constant 48 : index
    %12 = vector.load %arg1[%c0_9, %c48] : memref<8x96xf32, #tpu.memory_space<vmem>>, vector<8x48xf32>
    %c0_10 = arith.constant 0 : index
    %c0_11 = arith.constant 0 : index
    %13 = vector.load %arg3[%c0_10, %c0_11] : memref<8x48xf32, #tpu.memory_space<vmem>>, vector<8x48xf32>
    %14 = vector.extract_strided_slice %0 {offsets = [0, 48], sizes = [1, 48], strides = [1, 1]} : vector<1x96xf32> to vector<1x48xf32>
    %15 = vector.broadcast %14 : vector<1x48xf32> to vector<8x48xf32>
    %16 = arith.mulf %13, %15 : vector<8x48xf32>
    %17 = arith.addf %12, %16 : vector<8x48xf32>
    %18 = vector.extract_strided_slice %1 {offsets = [0, 48], sizes = [1, 48], strides = [1, 1]} : vector<1x96xf32> to vector<1x48xf32>
    %19 = vector.broadcast %18 : vector<1x48xf32> to vector<8x48xf32>
    %20 = arith.addf %17, %19 : vector<8x48xf32>
    %c0_12 = arith.constant 0 : index
    %c48_13 = arith.constant 48 : index
    %21 = vector.load %arg6[%c0_12, %c48_13] : memref<8x96xf32, #tpu.memory_space<vmem>>, vector<8x48xf32>
    tpu.vector_store %arg6[%c0_12, %c48_13], %20 {strides = array<i32>} : memref<8x96xf32, #tpu.memory_space<vmem>>, vector<8x48xf32>,
    return
  }
  func.func @transform_0(%arg0: i32) -> (i32, i32) {
    %c0_i32 = arith.constant 0 : i32
    %c0_i32_0 = arith.constant 0 : i32
    return %arg0, %c0_i32 : i32, i32
  }
  func.func @transform_1(%arg0: i32) -> (i32, i32) {
    %c0_i32 = arith.constant 0 : i32
    %c0_i32_0 = arith.constant 0 : i32
    return %arg0, %c0_i32 : i32, i32
  }
  func.func @transform_2(%arg0: i32) -> (i32, i32) {
    %c0_i32 = arith.constant 0 : i32
    %c0_i32_0 = arith.constant 0 : i32
    return %arg0, %c0_i32 : i32, i32
  }
  func.func @transform_3(%arg0: i32) -> (i32, i32) {
    %c0_i32 = arith.constant 0 : i32
    %c0_i32_0 = arith.constant 0 : i32
    %c0_i32_1 = arith.constant 0 : i32
    return %c0_i32, %c0_i32_0 : i32, i32
  }
  func.func @transform_4(%arg0: i32) -> (i32, i32) {
    %c0_i32 = arith.constant 0 : i32
    %c0_i32_0 = arith.constant 0 : i32
    %c0_i32_1 = arith.constant 0 : i32
    return %c0_i32, %c0_i32_0 : i32, i32
  }
  func.func @transform_5(%arg0: i32) -> (i32, i32) {
    %c0_i32 = arith.constant 0 : i32
    %c0_i32_0 = arith.constant 0 : i32
    return %arg0, %c0_i32 : i32, i32
  }
}

module attributes {stable_mosaic.version = 11 : i64} {
  func.func @_matmul_stats_kernel(%arg0: i32, %arg1: memref<8x864xbf16, #tpu.memory_space<vmem>>, %arg2: memref<864x128xbf16, #tpu.memory_space<vmem>>, %arg3: memref<8x128xf32, #tpu.memory_space<vmem>>, %arg4: memref<1x1x128xf32, #tpu.memory_space<vmem>>, %arg5: memref<1x1x128xf32, #tpu.memory_space<vmem>>) attributes {dimension_semantics = [#tpu.dimension_semantics<parallel>], iteration_bounds = array<i64: 1>, scalar_prefetch = 0 : i64, scratch_operands = 0 : i64, tpu.core_type = #tpu.core_type<tc>, window_params = [{transform_indices = @transform_0, window_bounds = array<i64: 8, 864>}, {pipeline_mode = #tpu.pipeline_mode<synchronous>, transform_indices = @transform_1, window_bounds = array<i64: 864, 128>}, {transform_indices = @transform_2, window_bounds = array<i64: 8, 128>}, {transform_indices = @transform_3, window_bounds = array<i64: 1, 1, 128>}, {transform_indices = @transform_4, window_bounds = array<i64: 1, 1, 128>}]} {
    %c0 = arith.constant 0 : index
    %c0_0 = arith.constant 0 : index
    %0 = vector.load %arg1[%c0, %c0_0] : memref<8x864xbf16, #tpu.memory_space<vmem>>, vector<8x864xbf16>
    %c0_1 = arith.constant 0 : index
    %c0_2 = arith.constant 0 : index
    %1 = vector.load %arg2[%c0_1, %c0_2] : memref<864x128xbf16, #tpu.memory_space<vmem>>, vector<864x128xbf16>
    %cst = arith.constant dense<0.000000e+00> : vector<8x128xf32>
    %2 = tpu.matmul %0, %1, %cst {dimension_numbers = #tpu.dot_dimension_numbers<[1], [0], [0], [1], [0, 0, 1, 1], [], []>} : vector<8x864xbf16>, vector<864x128xbf16>, vector<8x128xf32> -> vector<8x128xf32>
    %c0_3 = arith.constant 0 : index
    %c0_4 = arith.constant 0 : index
    %3 = vector.load %arg3[%c0_3, %c0_4] : memref<8x128xf32, #tpu.memory_space<vmem>>, vector<8x128xf32>
    tpu.vector_store %arg3[%c0_3, %c0_4], %2 {strides = array<i32>} : memref<8x128xf32, #tpu.memory_space<vmem>>, vector<8x128xf32>,
    %cst_5 = arith.constant dense<0.000000e+00> : vector<128xf32>
    %4 = vector.multi_reduction <add>, %2, %cst_5 [0] : vector<8x128xf32> to vector<128xf32>
    %5 = vector.shape_cast %4 : vector<128xf32> to vector<1x128xf32>
    %6 = vector.shape_cast %5 : vector<1x128xf32> to vector<1x1x128xf32>
    %c0_6 = arith.constant 0 : index
    %c0_7 = arith.constant 0 : index
    %c0_8 = arith.constant 0 : index
    %7 = vector.load %arg4[%c0_6, %c0_7, %c0_8] : memref<1x1x128xf32, #tpu.memory_space<vmem>>, vector<1x1x128xf32>
    tpu.vector_store %arg4[%c0_6, %c0_7, %c0_8], %6 {strides = array<i32>} : memref<1x1x128xf32, #tpu.memory_space<vmem>>, vector<1x1x128xf32>,
    %8 = arith.mulf %2, %2 : vector<8x128xf32>
    %cst_9 = arith.constant dense<0.000000e+00> : vector<128xf32>
    %9 = vector.multi_reduction <add>, %8, %cst_9 [0] : vector<8x128xf32> to vector<128xf32>
    %10 = vector.shape_cast %9 : vector<128xf32> to vector<1x128xf32>
    %11 = vector.shape_cast %10 : vector<1x128xf32> to vector<1x1x128xf32>
    %c0_10 = arith.constant 0 : index
    %c0_11 = arith.constant 0 : index
    %c0_12 = arith.constant 0 : index
    %12 = vector.load %arg5[%c0_10, %c0_11, %c0_12] : memref<1x1x128xf32, #tpu.memory_space<vmem>>, vector<1x1x128xf32>
    tpu.vector_store %arg5[%c0_10, %c0_11, %c0_12], %11 {strides = array<i32>} : memref<1x1x128xf32, #tpu.memory_space<vmem>>, vector<1x1x128xf32>,
    return
  }
  func.func @transform_0(%arg0: i32) -> (i32, i32) {
    %c0_i32 = arith.constant 0 : i32
    %c0_i32_0 = arith.constant 0 : i32
    return %arg0, %c0_i32 : i32, i32
  }
  func.func @transform_1(%arg0: i32) -> (i32, i32) {
    %c0_i32 = arith.constant 0 : i32
    %c0_i32_0 = arith.constant 0 : i32
    %c0_i32_1 = arith.constant 0 : i32
    return %c0_i32, %c0_i32_0 : i32, i32
  }
  func.func @transform_2(%arg0: i32) -> (i32, i32) {
    %c0_i32 = arith.constant 0 : i32
    %c0_i32_0 = arith.constant 0 : i32
    return %arg0, %c0_i32 : i32, i32
  }
  func.func @transform_3(%arg0: i32) -> (i32, i32, i32) {
    %c0_i32 = arith.constant 0 : i32
    %c0_i32_0 = arith.constant 0 : i32
    %c0_i32_1 = arith.constant 0 : i32
    return %arg0, %c0_i32, %c0_i32_0 : i32, i32, i32
  }
  func.func @transform_4(%arg0: i32) -> (i32, i32, i32) {
    %c0_i32 = arith.constant 0 : i32
    %c0_i32_0 = arith.constant 0 : i32
    %c0_i32_1 = arith.constant 0 : i32
    return %arg0, %c0_i32, %c0_i32_0 : i32, i32, i32
  }
}

module attributes {stable_mosaic.version = 11 : i64} {
  func.func @_affine_relu_kernel(%arg0: i32, %arg1: memref<8x128xf32, #tpu.memory_space<vmem>>, %arg2: memref<1x128xf32, #tpu.memory_space<vmem>>, %arg3: memref<1x128xf32, #tpu.memory_space<vmem>>, %arg4: memref<8x128xf32, #tpu.memory_space<vmem>>) attributes {dimension_semantics = [#tpu.dimension_semantics<parallel>], iteration_bounds = array<i64: 1>, scalar_prefetch = 0 : i64, scratch_operands = 0 : i64, tpu.core_type = #tpu.core_type<tc>, window_params = [{transform_indices = @transform_0, window_bounds = array<i64: 8, 128>}, {pipeline_mode = #tpu.pipeline_mode<synchronous>, transform_indices = @transform_1, window_bounds = array<i64: 1, 128>}, {pipeline_mode = #tpu.pipeline_mode<synchronous>, transform_indices = @transform_2, window_bounds = array<i64: 1, 128>}, {transform_indices = @transform_3, window_bounds = array<i64: 8, 128>}]} {
    %c0 = arith.constant 0 : index
    %c0_0 = arith.constant 0 : index
    %0 = vector.load %arg1[%c0, %c0_0] : memref<8x128xf32, #tpu.memory_space<vmem>>, vector<8x128xf32>
    %c0_1 = arith.constant 0 : index
    %c0_2 = arith.constant 0 : index
    %1 = vector.load %arg2[%c0_1, %c0_2] : memref<1x128xf32, #tpu.memory_space<vmem>>, vector<1x128xf32>
    %2 = vector.broadcast %1 : vector<1x128xf32> to vector<8x128xf32>
    %3 = arith.mulf %0, %2 : vector<8x128xf32>
    %c0_3 = arith.constant 0 : index
    %c0_4 = arith.constant 0 : index
    %4 = vector.load %arg3[%c0_3, %c0_4] : memref<1x128xf32, #tpu.memory_space<vmem>>, vector<1x128xf32>
    %5 = vector.broadcast %4 : vector<1x128xf32> to vector<8x128xf32>
    %6 = arith.addf %3, %5 : vector<8x128xf32>
    %cst = arith.constant 0.000000e+00 : f32
    %7 = vector.broadcast %cst : f32 to vector<8x128xf32>
    %8 = arith.maximumf %6, %7 : vector<8x128xf32>
    %c0_5 = arith.constant 0 : index
    %c0_6 = arith.constant 0 : index
    %9 = vector.load %arg4[%c0_5, %c0_6] : memref<8x128xf32, #tpu.memory_space<vmem>>, vector<8x128xf32>
    tpu.vector_store %arg4[%c0_5, %c0_6], %8 {strides = array<i32>} : memref<8x128xf32, #tpu.memory_space<vmem>>, vector<8x128xf32>,
    return
  }
  func.func @transform_0(%arg0: i32) -> (i32, i32) {
    %c0_i32 = arith.constant 0 : i32
    %c0_i32_0 = arith.constant 0 : i32
    return %arg0, %c0_i32 : i32, i32
  }
  func.func @transform_1(%arg0: i32) -> (i32, i32) {
    %c0_i32 = arith.constant 0 : i32
    %c0_i32_0 = arith.constant 0 : i32
    %c0_i32_1 = arith.constant 0 : i32
    return %c0_i32, %c0_i32_0 : i32, i32
  }
  func.func @transform_2(%arg0: i32) -> (i32, i32) {
    %c0_i32 = arith.constant 0 : i32
    %c0_i32_0 = arith.constant 0 : i32
    %c0_i32_1 = arith.constant 0 : i32
    return %c0_i32, %c0_i32_0 : i32, i32
  }
  func.func @transform_3(%arg0: i32) -> (i32, i32) {
    %c0_i32 = arith.constant 0 : i32
    %c0_i32_0 = arith.constant 0 : i32
    return %arg0, %c0_i32 : i32, i32
  }
}

module attributes {stable_mosaic.version = 11 : i64} {
  func.func @_matmul_bias_kernel(%arg0: i32, %arg1: memref<8x128xbf16, #tpu.memory_space<vmem>>, %arg2: memref<128x128xbf16, #tpu.memory_space<vmem>>, %arg3: memref<1x128xf32, #tpu.memory_space<vmem>>, %arg4: memref<8x128xf32, #tpu.memory_space<vmem>>) attributes {dimension_semantics = [#tpu.dimension_semantics<parallel>], iteration_bounds = array<i64: 1>, scalar_prefetch = 0 : i64, scratch_operands = 0 : i64, tpu.core_type = #tpu.core_type<tc>, window_params = [{transform_indices = @transform_0, window_bounds = array<i64: 8, 128>}, {pipeline_mode = #tpu.pipeline_mode<synchronous>, transform_indices = @transform_1, window_bounds = array<i64: 128, 128>}, {pipeline_mode = #tpu.pipeline_mode<synchronous>, transform_indices = @transform_2, window_bounds = array<i64: 1, 128>}, {transform_indices = @transform_3, window_bounds = array<i64: 8, 128>}]} {
    %c0 = arith.constant 0 : index
    %c0_0 = arith.constant 0 : index
    %0 = vector.load %arg1[%c0, %c0_0] : memref<8x128xbf16, #tpu.memory_space<vmem>>, vector<8x128xbf16>
    %c0_1 = arith.constant 0 : index
    %c0_2 = arith.constant 0 : index
    %1 = vector.load %arg2[%c0_1, %c0_2] : memref<128x128xbf16, #tpu.memory_space<vmem>>, vector<128x128xbf16>
    %cst = arith.constant dense<0.000000e+00> : vector<8x128xf32>
    %2 = tpu.matmul %0, %1, %cst {dimension_numbers = #tpu.dot_dimension_numbers<[1], [0], [0], [1], [0, 0, 1, 1], [], []>} : vector<8x128xbf16>, vector<128x128xbf16>, vector<8x128xf32> -> vector<8x128xf32>
    %c0_3 = arith.constant 0 : index
    %c0_4 = arith.constant 0 : index
    %3 = vector.load %arg3[%c0_3, %c0_4] : memref<1x128xf32, #tpu.memory_space<vmem>>, vector<1x128xf32>
    %4 = vector.broadcast %3 : vector<1x128xf32> to vector<8x128xf32>
    %5 = arith.addf %2, %4 : vector<8x128xf32>
    %c0_5 = arith.constant 0 : index
    %c0_6 = arith.constant 0 : index
    %6 = vector.load %arg4[%c0_5, %c0_6] : memref<8x128xf32, #tpu.memory_space<vmem>>, vector<8x128xf32>
    tpu.vector_store %arg4[%c0_5, %c0_6], %5 {strides = array<i32>} : memref<8x128xf32, #tpu.memory_space<vmem>>, vector<8x128xf32>,
    return
  }
  func.func @transform_0(%arg0: i32) -> (i32, i32) {
    %c0_i32 = arith.constant 0 : i32
    %c0_i32_0 = arith.constant 0 : i32
    return %arg0, %c0_i32 : i32, i32
  }
  func.func @transform_1(%arg0: i32) -> (i32, i32) {
    %c0_i32 = arith.constant 0 : i32
    %c0_i32_0 = arith.constant 0 : i32
    %c0_i32_1 = arith.constant 0 : i32
    return %c0_i32, %c0_i32_0 : i32, i32
  }
  func.func @transform_2(%arg0: i32) -> (i32, i32) {
    %c0_i32 = arith.constant 0 : i32
    %c0_i32_0 = arith.constant 0 : i32
    %c0_i32_1 = arith.constant 0 : i32
    return %c0_i32, %c0_i32_0 : i32, i32
  }
  func.func @transform_3(%arg0: i32) -> (i32, i32) {
    %c0_i32 = arith.constant 0 : i32
    %c0_i32_0 = arith.constant 0 : i32
    return %arg0, %c0_i32 : i32, i32
  }
}

module attributes {stable_mosaic.version = 11 : i64} {
  func.func @_res_mid_kernel(%arg0: i32, %arg1: memref<8x576xbf16, #tpu.memory_space<vmem>>, %arg2: memref<576x64xbf16, #tpu.memory_space<vmem>>, %arg3: memref<8x64xf32, #tpu.memory_space<vmem>>, %arg4: memref<8x64xf32, #tpu.memory_space<vmem>>, %arg5: memref<1x1x128xf32, #tpu.memory_space<vmem>>, %arg6: memref<1x1x128xf32, #tpu.memory_space<vmem>>) attributes {dimension_semantics = [#tpu.dimension_semantics<parallel>], iteration_bounds = array<i64: 1>, scalar_prefetch = 0 : i64, scratch_operands = 0 : i64, tpu.core_type = #tpu.core_type<tc>, window_params = [{transform_indices = @transform_0, window_bounds = array<i64: 8, 576>}, {pipeline_mode = #tpu.pipeline_mode<synchronous>, transform_indices = @transform_1, window_bounds = array<i64: 576, 64>}, {transform_indices = @transform_2, window_bounds = array<i64: 8, 64>}, {transform_indices = @transform_3, window_bounds = array<i64: 8, 64>}, {transform_indices = @transform_4, window_bounds = array<i64: 1, 1, 128>}, {transform_indices = @transform_5, window_bounds = array<i64: 1, 1, 128>}]} {
    %c0 = arith.constant 0 : index
    %c0_0 = arith.constant 0 : index
    %0 = vector.load %arg1[%c0, %c0_0] : memref<8x576xbf16, #tpu.memory_space<vmem>>, vector<8x576xbf16>
    %c0_1 = arith.constant 0 : index
    %c0_2 = arith.constant 0 : index
    %1 = vector.load %arg2[%c0_1, %c0_2] : memref<576x64xbf16, #tpu.memory_space<vmem>>, vector<576x64xbf16>
    %cst = arith.constant dense<0.000000e+00> : vector<8x64xf32>
    %2 = tpu.matmul %0, %1, %cst {dimension_numbers = #tpu.dot_dimension_numbers<[1], [0], [0], [1], [0, 0, 1, 1], [], []>} : vector<8x576xbf16>, vector<576x64xbf16>, vector<8x64xf32> -> vector<8x64xf32>
    %c0_3 = arith.constant 0 : index
    %c0_4 = arith.constant 0 : index
    %3 = vector.load %arg4[%c0_3, %c0_4] : memref<8x64xf32, #tpu.memory_space<vmem>>, vector<8x64xf32>
    tpu.vector_store %arg4[%c0_3, %c0_4], %2 {strides = array<i32>} : memref<8x64xf32, #tpu.memory_space<vmem>>, vector<8x64xf32>,
    %c0_5 = arith.constant 0 : index
    %c0_6 = arith.constant 0 : index
    %4 = vector.load %arg3[%c0_5, %c0_6] : memref<8x64xf32, #tpu.memory_space<vmem>>, vector<8x64xf32>
    %cst_7 = arith.constant dense<0.000000e+00> : vector<64xf32>
    %5 = vector.multi_reduction <add>, %2, %cst_7 [0] : vector<8x64xf32> to vector<64xf32>
    %6 = vector.shape_cast %5 : vector<64xf32> to vector<1x64xf32>
    %7 = vector.shape_cast %6 : vector<1x64xf32> to vector<1x1x64xf32>
    %c0_8 = arith.constant 0 : index
    %c0_9 = arith.constant 0 : index
    %c0_10 = arith.constant 0 : index
    %8 = vector.load %arg5[%c0_8, %c0_9, %c0_10] : memref<1x1x128xf32, #tpu.memory_space<vmem>>, vector<1x1x64xf32>
    tpu.vector_store %arg5[%c0_8, %c0_9, %c0_10], %7 {strides = array<i32>} : memref<1x1x128xf32, #tpu.memory_space<vmem>>, vector<1x1x64xf32>,
    %9 = arith.mulf %2, %2 : vector<8x64xf32>
    %cst_11 = arith.constant dense<0.000000e+00> : vector<64xf32>
    %10 = vector.multi_reduction <add>, %9, %cst_11 [0] : vector<8x64xf32> to vector<64xf32>
    %11 = vector.shape_cast %10 : vector<64xf32> to vector<1x64xf32>
    %12 = vector.shape_cast %11 : vector<1x64xf32> to vector<1x1x64xf32>
    %c0_12 = arith.constant 0 : index
    %c0_13 = arith.constant 0 : index
    %c0_14 = arith.constant 0 : index
    %13 = vector.load %arg6[%c0_12, %c0_13, %c0_14] : memref<1x1x128xf32, #tpu.memory_space<vmem>>, vector<1x1x64xf32>
    tpu.vector_store %arg6[%c0_12, %c0_13, %c0_14], %12 {strides = array<i32>} : memref<1x1x128xf32, #tpu.memory_space<vmem>>, vector<1x1x64xf32>,
    %cst_15 = arith.constant dense<0.000000e+00> : vector<64xf32>
    %14 = vector.multi_reduction <add>, %4, %cst_15 [0] : vector<8x64xf32> to vector<64xf32>
    %15 = vector.shape_cast %14 : vector<64xf32> to vector<1x64xf32>
    %16 = vector.shape_cast %15 : vector<1x64xf32> to vector<1x1x64xf32>
    %c0_16 = arith.constant 0 : index
    %c0_17 = arith.constant 0 : index
    %c64 = arith.constant 64 : index
    %17 = vector.load %arg5[%c0_16, %c0_17, %c64] : memref<1x1x128xf32, #tpu.memory_space<vmem>>, vector<1x1x64xf32>
    tpu.vector_store %arg5[%c0_16, %c0_17, %c64], %16 {strides = array<i32>} : memref<1x1x128xf32, #tpu.memory_space<vmem>>, vector<1x1x64xf32>,
    %18 = arith.mulf %4, %4 : vector<8x64xf32>
    %cst_18 = arith.constant dense<0.000000e+00> : vector<64xf32>
    %19 = vector.multi_reduction <add>, %18, %cst_18 [0] : vector<8x64xf32> to vector<64xf32>
    %20 = vector.shape_cast %19 : vector<64xf32> to vector<1x64xf32>
    %21 = vector.shape_cast %20 : vector<1x64xf32> to vector<1x1x64xf32>
    %c0_19 = arith.constant 0 : index
    %c0_20 = arith.constant 0 : index
    %c64_21 = arith.constant 64 : index
    %22 = vector.load %arg6[%c0_19, %c0_20, %c64_21] : memref<1x1x128xf32, #tpu.memory_space<vmem>>, vector<1x1x64xf32>
    tpu.vector_store %arg6[%c0_19, %c0_20, %c64_21], %21 {strides = array<i32>} : memref<1x1x128xf32, #tpu.memory_space<vmem>>, vector<1x1x64xf32>,
    return
  }
  func.func @transform_0(%arg0: i32) -> (i32, i32) {
    %c0_i32 = arith.constant 0 : i32
    %c0_i32_0 = arith.constant 0 : i32
    return %arg0, %c0_i32 : i32, i32
  }
  func.func @transform_1(%arg0: i32) -> (i32, i32) {
    %c0_i32 = arith.constant 0 : i32
    %c0_i32_0 = arith.constant 0 : i32
    %c0_i32_1 = arith.constant 0 : i32
    return %c0_i32, %c0_i32_0 : i32, i32
  }
  func.func @transform_2(%arg0: i32) -> (i32, i32) {
    %c0_i32 = arith.constant 0 : i32
    %c0_i32_0 = arith.constant 0 : i32
    return %arg0, %c0_i32 : i32, i32
  }
  func.func @transform_3(%arg0: i32) -> (i32, i32) {
    %c0_i32 = arith.constant 0 : i32
    %c0_i32_0 = arith.constant 0 : i32
    return %arg0, %c0_i32 : i32, i32
  }
  func.func @transform_4(%arg0: i32) -> (i32, i32, i32) {
    %c0_i32 = arith.constant 0 : i32
    %c0_i32_0 = arith.constant 0 : i32
    %c0_i32_1 = arith.constant 0 : i32
    return %arg0, %c0_i32, %c0_i32_0 : i32, i32, i32
  }
  func.func @transform_5(%arg0: i32) -> (i32, i32, i32) {
    %c0_i32 = arith.constant 0 : i32
    %c0_i32_0 = arith.constant 0 : i32
    %c0_i32_1 = arith.constant 0 : i32
    return %arg0, %c0_i32, %c0_i32_0 : i32, i32, i32
  }
}

module attributes {stable_mosaic.version = 11 : i64} {
  func.func @_res_epilogue_kernel(%arg0: i32, %arg1: memref<8x128xf32, #tpu.memory_space<vmem>>, %arg2: memref<8x64xf32, #tpu.memory_space<vmem>>, %arg3: memref<8x64xf32, #tpu.memory_space<vmem>>, %arg4: memref<1x128xf32, #tpu.memory_space<vmem>>, %arg5: memref<1x128xf32, #tpu.memory_space<vmem>>, %arg6: memref<8x128xf32, #tpu.memory_space<vmem>>) attributes {dimension_semantics = [#tpu.dimension_semantics<parallel>], iteration_bounds = array<i64: 1>, scalar_prefetch = 0 : i64, scratch_operands = 0 : i64, tpu.core_type = #tpu.core_type<tc>, window_params = [{transform_indices = @transform_0, window_bounds = array<i64: 8, 128>}, {transform_indices = @transform_1, window_bounds = array<i64: 8, 64>}, {transform_indices = @transform_2, window_bounds = array<i64: 8, 64>}, {pipeline_mode = #tpu.pipeline_mode<synchronous>, transform_indices = @transform_3, window_bounds = array<i64: 1, 128>}, {pipeline_mode = #tpu.pipeline_mode<synchronous>, transform_indices = @transform_4, window_bounds = array<i64: 1, 128>}, {transform_indices = @transform_5, window_bounds = array<i64: 8, 128>}]} {
    %c0 = arith.constant 0 : index
    %c0_0 = arith.constant 0 : index
    %0 = vector.load %arg4[%c0, %c0_0] : memref<1x128xf32, #tpu.memory_space<vmem>>, vector<1x128xf32>
    %c0_1 = arith.constant 0 : index
    %c0_2 = arith.constant 0 : index
    %1 = vector.load %arg5[%c0_1, %c0_2] : memref<1x128xf32, #tpu.memory_space<vmem>>, vector<1x128xf32>
    %c0_3 = arith.constant 0 : index
    %c0_4 = arith.constant 0 : index
    %2 = vector.load %arg1[%c0_3, %c0_4] : memref<8x128xf32, #tpu.memory_space<vmem>>, vector<8x64xf32>
    %c0_5 = arith.constant 0 : index
    %c0_6 = arith.constant 0 : index
    %3 = vector.load %arg2[%c0_5, %c0_6] : memref<8x64xf32, #tpu.memory_space<vmem>>, vector<8x64xf32>
    %4 = vector.extract_strided_slice %0 {offsets = [0, 0], sizes = [1, 64], strides = [1, 1]} : vector<1x128xf32> to vector<1x64xf32>
    %5 = vector.broadcast %4 : vector<1x64xf32> to vector<8x64xf32>
    %6 = arith.mulf %3, %5 : vector<8x64xf32>
    %7 = arith.addf %2, %6 : vector<8x64xf32>
    %8 = vector.extract_strided_slice %1 {offsets = [0, 0], sizes = [1, 64], strides = [1, 1]} : vector<1x128xf32> to vector<1x64xf32>
    %9 = vector.broadcast %8 : vector<1x64xf32> to vector<8x64xf32>
    %10 = arith.addf %7, %9 : vector<8x64xf32>
    %c0_7 = arith.constant 0 : index
    %c0_8 = arith.constant 0 : index
    %11 = vector.load %arg6[%c0_7, %c0_8] : memref<8x128xf32, #tpu.memory_space<vmem>>, vector<8x64xf32>
    tpu.vector_store %arg6[%c0_7, %c0_8], %10 {strides = array<i32>} : memref<8x128xf32, #tpu.memory_space<vmem>>, vector<8x64xf32>,
    %c0_9 = arith.constant 0 : index
    %c64 = arith.constant 64 : index
    %12 = vector.load %arg1[%c0_9, %c64] : memref<8x128xf32, #tpu.memory_space<vmem>>, vector<8x64xf32>
    %c0_10 = arith.constant 0 : index
    %c0_11 = arith.constant 0 : index
    %13 = vector.load %arg3[%c0_10, %c0_11] : memref<8x64xf32, #tpu.memory_space<vmem>>, vector<8x64xf32>
    %14 = vector.extract_strided_slice %0 {offsets = [0, 64], sizes = [1, 64], strides = [1, 1]} : vector<1x128xf32> to vector<1x64xf32>
    %15 = vector.broadcast %14 : vector<1x64xf32> to vector<8x64xf32>
    %16 = arith.mulf %13, %15 : vector<8x64xf32>
    %17 = arith.addf %12, %16 : vector<8x64xf32>
    %18 = vector.extract_strided_slice %1 {offsets = [0, 64], sizes = [1, 64], strides = [1, 1]} : vector<1x128xf32> to vector<1x64xf32>
    %19 = vector.broadcast %18 : vector<1x64xf32> to vector<8x64xf32>
    %20 = arith.addf %17, %19 : vector<8x64xf32>
    %c0_12 = arith.constant 0 : index
    %c64_13 = arith.constant 64 : index
    %21 = vector.load %arg6[%c0_12, %c64_13] : memref<8x128xf32, #tpu.memory_space<vmem>>, vector<8x64xf32>
    tpu.vector_store %arg6[%c0_12, %c64_13], %20 {strides = array<i32>} : memref<8x128xf32, #tpu.memory_space<vmem>>, vector<8x64xf32>,
    return
  }
  func.func @transform_0(%arg0: i32) -> (i32, i32) {
    %c0_i32 = arith.constant 0 : i32
    %c0_i32_0 = arith.constant 0 : i32
    return %arg0, %c0_i32 : i32, i32
  }
  func.func @transform_1(%arg0: i32) -> (i32, i32) {
    %c0_i32 = arith.constant 0 : i32
    %c0_i32_0 = arith.constant 0 : i32
    return %arg0, %c0_i32 : i32, i32
  }
  func.func @transform_2(%arg0: i32) -> (i32, i32) {
    %c0_i32 = arith.constant 0 : i32
    %c0_i32_0 = arith.constant 0 : i32
    return %arg0, %c0_i32 : i32, i32
  }
  func.func @transform_3(%arg0: i32) -> (i32, i32) {
    %c0_i32 = arith.constant 0 : i32
    %c0_i32_0 = arith.constant 0 : i32
    %c0_i32_1 = arith.constant 0 : i32
    return %c0_i32, %c0_i32_0 : i32, i32
  }
  func.func @transform_4(%arg0: i32) -> (i32, i32) {
    %c0_i32 = arith.constant 0 : i32
    %c0_i32_0 = arith.constant 0 : i32
    %c0_i32_1 = arith.constant 0 : i32
    return %c0_i32, %c0_i32_0 : i32, i32
  }
  func.func @transform_5(%arg0: i32) -> (i32, i32) {
    %c0_i32 = arith.constant 0 : i32
    %c0_i32_0 = arith.constant 0 : i32
    return %arg0, %c0_i32 : i32, i32
  }
}

</mosaic_0001>

<bundles_post_ra>
// kernel: resnet_forward.44
= control target key start
LH: loop header
LB: loop body
LE: loop exit
PB: predicated region body
PF: predicated region fallthrough
CT: control target
= control target key end

     0   :  { %vm92_vm0 = vcmask 130048   ;;  %s271_s0 = inlined_call_operand.vmem [shape: f32[128,16], index: 0, kind: input, shape index: {}]   ;;  %s272_s1 = inlined_call_operand.vmem [shape: f32[1,16], index: 1, kind: input, shape index: {}]   ;;  %s273_s2 = inlined_call_operand.vmem [shape: f32[1,16], index: 2, kind: input, shape index: {}]   ;;  %s274_s3 = inlined_call_operand.vmem [shape: f32[128,16], index: 3, kind: output, shape index: {}]  }
   0x1   :  { %v14_v0 = vld [vmem:[%s271_s0] sm:$0xff]  ;;  %v15_v4 = vld [vmem:[%s271_s0 + $0x8] sm:$0xff]  ;;  %v16_v5 = vld [vmem:[%s271_s0 + $0x10] sm:$0xff] }
   0x2   :  { %v113_v1 = vld [vmem:[%s272_s1] ss:$0 sm:$0xff]  ;;  %v17_v6 = vld [vmem:[%s271_s0 + $0x18] sm:$0xff]  ;;  %v19_v11 = vld [vmem:[%s271_s0 + $0x28] sm:$0xff] }
   0x3   :  { %v144_v2 = vld [vmem:[%s273_s2] ss:$0 sm:$0xff]  ;;  %v37_v3 = vmul.f32 %v113_v1, %v14_v0  ;;  %v38_v7 = vmul.f32 %v113_v1, %v15_v4  ;;  %v39_v8 = vmul.f32 %v113_v1, %v16_v5  ;;  %v40_v9 = vmul.f32 %v113_v1, %v17_v6  ;;  %v20_v12 = vld [vmem:[%s271_s0 + $0x30] sm:$0xff]  ;;  %v21_v17 = vld [vmem:[%s271_s0 + $0x38] sm:$0xff] }
   0x4   :  { %v18_v10 = vld [vmem:[%s271_s0 + $0x20] sm:$0xff]  ;;  %v42_v15 = vmul.f32 %v113_v1, %v19_v11  ;;  %v43_v16 = vmul.f32 %v113_v1, %v20_v12  ;;  %v44_v21 = vmul.f32 %v113_v1, %v21_v17  ;;  %v23_v27 = vld [vmem:[%s271_s0 + $0x48] sm:$0xff]  ;;  %v24_v28 = vld [vmem:[%s271_s0 + $0x50] sm:$0xff] }
   0x5   :  { %v60_v13 = vadd.f32 %v144_v2, %v37_v3  ;;  %v41_v14 = vmul.f32 %v113_v1, %v18_v10  ;;  %v61_v18 = vadd.f32 %v144_v2, %v38_v7  ;;  %v62_v19 = vadd.f32 %v144_v2, %v39_v8  ;;  %v22_v22 = vld [vmem:[%s271_s0 + $0x40] sm:$0xff]  ;;  %v25_v29 = vld [vmem:[%s271_s0 + $0x58] sm:$0xff]  ;;  %v27_v35 = vld [vmem:[%s271_s0 + $0x68] sm:$0xff] }
   0x6   :  { %v63_v20 = vadd.f32 %v144_v2, %v40_v9  ;;  %v65_v25 = vadd.f32 %v144_v2, %v42_v15  ;;  %v66_v26 = vadd.f32 %v144_v2, %v43_v16  ;;  %v67_v33 = vadd.f32 %v144_v2, %v44_v21  ;;  %v26_v34 = vld [vmem:[%s271_s0 + $0x60] sm:$0xff]  ;;  %v28_v36 = vld [vmem:[%s271_s0 + $0x70] sm:$0xff]  ;;  %v29_v41 = vld [vmem:[%s271_s0 + $0x78] sm:$0xff] }
   0x7   :  { %v76_v23 = vmax.f32 %v60_v13, 0.0  ;;  %v64_v24 = vadd.f32 %v144_v2, %v41_v14  ;;  %v77_v30 = vmax.f32 %v61_v18, 0.0  ;;  %v78_v31 = vmax.f32 %v62_v19, 0.0 }
   0x8   :  { %v79_v32 = vmax.f32 %v63_v20, 0.0  ;;  %v81_v38 = vmax.f32 %v65_v25, 0.0  ;;  %v82_v39 = vmax.f32 %v66_v26, 0.0  ;;  %v45_v40 = vmul.f32 %v113_v1, %v22_v22 }
   0x9   :  { %93 = vst.msk [vmem:[%s274_s3] sm:$0xff] %vm92_vm0, %v76_v23  ;;  %v80_v37 = vmax.f32 %v64_v24, 0.0  ;;  %94 = vst.msk [vmem:[%s274_s3 + $0x8] sm:$0xff] %vm92_vm0, %v77_v30  ;;  %v83_v42 = vmax.f32 %v67_v33, 0.0  ;;  %v46_v43 = vmul.f32 %v113_v1, %v23_v27  ;;  %v47_v44 = vmul.f32 %v113_v1, %v24_v28 }
   0xa   :  { %95 = vst.msk [vmem:[%s274_s3 + $0x10] sm:$0xff] %vm92_vm0, %v78_v31  ;;  %96 = vst.msk [vmem:[%s274_s3 + $0x18] sm:$0xff] %vm92_vm0, %v79_v32  ;;  %v48_v45 = vmul.f32 %v113_v1, %v25_v29  ;;  %v68_v46 = vadd.f32 %v144_v2, %v45_v40  ;;  %v49_v47 = vmul.f32 %v113_v1, %v26_v34 }
   0xb   :  { %97 = vst.msk [vmem:[%s274_s3 + $0x20] sm:$0xff] %vm92_vm0, %v80_v37  ;;  %98 = vst.msk [vmem:[%s274_s3 + $0x28] sm:$0xff] %vm92_vm0, %v81_v38  ;;  %v50_v48 = vmul.f32 %v113_v1, %v27_v35  ;;  %v51_v49 = vmul.f32 %v113_v1, %v28_v36  ;;  %v69_v50 = vadd.f32 %v144_v2, %v46_v43 }
   0xc   :  { %99 = vst.msk [vmem:[%s274_s3 + $0x30] sm:$0xff] %vm92_vm0, %v82_v39  ;;  %100 = vst.msk [vmem:[%s274_s3 + $0x38] sm:$0xff] %vm92_vm0, %v83_v42  ;;  %v70_v51 = vadd.f32 %v144_v2, %v47_v44  ;;  %v71_v52 = vadd.f32 %v144_v2, %v48_v45  ;;  %v52_v53 = vmul.f32 %v113_v1, %v29_v41  ;;  %v84_v54 = vmax.f32 %v68_v46, 0.0 }
   0xd   :  { %v72_v55 = vadd.f32 %v144_v2, %v49_v47  ;;  %v73_v56 = vadd.f32 %v144_v2, %v50_v48  ;;  %v74_v57 = vadd.f32 %v144_v2, %v51_v49  ;;  %v85_v58 = vmax.f32 %v69_v50, 0.0 }
   0xe   :  { %v86_v59 = vmax.f32 %v70_v51, 0.0  ;;  %v87_v60 = vmax.f32 %v71_v52, 0.0  ;;  %v75_v61 = vadd.f32 %v144_v2, %v52_v53  ;;  %101 = vst.msk [vmem:[%s274_s3 + $0x40] sm:$0xff] %vm92_vm0, %v84_v54 }
   0xf   :  { %v88_v62 = vmax.f32 %v72_v55, 0.0  ;;  %v89_v63 = vmax.f32 %v73_v56, 0.0  ;;  %v90_v0 = vmax.f32 %v74_v57, 0.0  ;;  %102 = vst.msk [vmem:[%s274_s3 + $0x48] sm:$0xff] %vm92_vm0, %v85_v58 }
  0x10   :  { %103 = vst.msk [vmem:[%s274_s3 + $0x50] sm:$0xff] %vm92_vm0, %v86_v59  ;;  %104 = vst.msk [vmem:[%s274_s3 + $0x58] sm:$0xff] %vm92_vm0, %v87_v60  ;;  %v91_v1 = vmax.f32 %v75_v61, 0.0 }
  0x11   :  { %105 = vst.msk [vmem:[%s274_s3 + $0x60] sm:$0xff] %vm92_vm0, %v88_v62  ;;  %106 = vst.msk [vmem:[%s274_s3 + $0x68] sm:$0xff] %vm92_vm0, %v89_v63 }
  0x12   :  { %107 = vst.msk [vmem:[%s274_s3 + $0x70] sm:$0xff] %vm92_vm0, %v90_v0  ;;  %108 = vst.msk [vmem:[%s274_s3 + $0x78] sm:$0xff] %vm92_vm0, %v91_v1 }

// kernel: resnet_forward.43
= control target key start
LH: loop header
LB: loop body
LE: loop exit
PB: predicated region body
PF: predicated region fallthrough
CT: control target
= control target key end

     0   :  { %vm111_vm0 = vcmask 1044480   ;;  %vm112_vm1 = vcmask 1045504   ;;  %v400_v1 = vmov 65535   ;;  %vm86_vm2 = vcmask 220160   ;;  %s596_s1 = inlined_call_operand.vmem [shape: bf16[27,16], index: 1, kind: input, shape index: {}]   ;;  %s597_s0 = inlined_call_operand.vmem [shape: bf16[128,27], index: 0, kind: input, shape index: {}]   ;;  %s598_s2 = inlined_call_operand.vmem [shape: f32[128,16], index: 2, kind: output, shape index: {0}]   ;;  %s599_s3 = inlined_call_operand.vmem [shape: f32[1,1,16], index: 3, kind: output, shape index: {1}]   ;;  %s600_s4 = inlined_call_operand.vmem [shape: f32[1,1,16], index: 4, kind: output, shape index: {2}]  }
   0x1   :  { %v390_v0 = vld [vmem:[%s596_s1 + $0x8] sm:$0x3f]   ;;  %v113_v2 = vsel %vm111_vm0, 4294967295, %v400_v1  ;;  %v392_v4 = vld [vmem:[%s597_s0] sm:$0xff]   ;;  %v394_v10 = vld [vmem:[%s597_s0 + $0x10] sm:$0xff]   ;;  %vm215_vm3 = vcmask 130048  }
   0x2   :  { %v114_v3 = vsel %vm112_vm1, %v113_v2, 0  ;;  %v391_v6 = vld [vmem:[%s596_s1] sm:$0xff]   ;;  %369 = vmatprep.mubr.msk.bf16.mxu0 %vm86_vm2, %v392_v4  ;;  %v393_v8 = vld [vmem:[%s597_s0 + $0x8] sm:$0xff]   ;;  %v398_v11 = vld [vmem:[%s597_s0 + $0x30] sm:$0xff]   ;;  %vm269_vm4 = vcmask 122880  }
   0x3   :  { %v116_v5 = vand.u32 %v390_v0, %v114_v3  ;;  %v396_v7 = vld [vmem:[%s597_s0 + $0x20] sm:$0xff]   ;;  %v397_v9 = vld [vmem:[%s597_s0 + $0x28] sm:$0xff]   ;;  %v395_v12 = vld [vmem:[%s597_s0 + $0x18] sm:$0xff]  }
   0x4   :  { %377 = vmatprep.mubr.msk.bf16.mxu1 %vm86_vm2, %v396_v7  ;;  %v399_v13 = vld [vmem:[%s597_s0 + $0x38] sm:$0xff]  }
   0x5   :  { %365 = vmatprep.subr.bf16.mxu0 %v116_v5  ;;  %385 = vmatprep.subr.bf16.mxu1 %v116_v5 }
   0x6   :  { %366 = vmatpush3.bf16.msra.mxu0 %v116_v5  ;;  %387 = vmatpush3.bf16.msra.mxu1 %v116_v5 }
   0x7   :  { %367 = vmatprep.subr.bf16.mxu0 %v391_v6  ;;  %386 = vmatprep.subr.bf16.mxu1 %v391_v6 }
   0xa   :  { %368 = vmatpush3.bf16.msra.mxu0 %v391_v6  ;;  %388 = vmatpush3.bf16.msra.mxu1 %v391_v6 }
   0xd   :  { %370 = vmatmul.mubr.msk.bf16.vlgmr.msra.gmra.mxu0 %vm86_vm2, %v393_v8  ;;  %378 = vmatmul.mubr.msk.bf16.vlgmr.msra.gmra.mxu1 %vm86_vm2, %v397_v9 }
   0xe   :  { %373 = vmatprep.mubr.msk.bf16.mxu0 %vm86_vm2, %v394_v10  ;;  %381 = vmatprep.mubr.msk.bf16.mxu1 %vm86_vm2, %v398_v11 }
  0x15   :  { %374 = vmatmul.mubr.msk.bf16.gmra.mxu0 %vm86_vm2, %v395_v12  ;;  %382 = vmatmul.mubr.msk.bf16.gmra.mxu1 %vm86_vm2, %v399_v13 }
  0xcd   :  { %v371_v14 = vpop.f32.mrf.mxu0  ;;  %v464_v15 = vpop.f32.mrf.mxu1 }
  0xce   :  { %218 = vst.msk [vmem:[%s598_s2 + $0x10] sm:$0xff] %vm215_vm3, %v371_v14  ;;  %226 = vst.msk [vmem:[%s598_s2 + $0x50] sm:$0xff] %vm215_vm3, %v464_v15  ;;  %v273_v23 = vmul.f32 %v371_v14, %v371_v14  ;;  %v235_v30 = vsel %vm215_vm3, %v371_v14, 0.0  ;;  %v281_v8 = vmul.f32 %v464_v15, %v464_v15  ;;  %v251_v13 = vsel %vm215_vm3, %v464_v15, 0.0 }
  0xcf   :  { %v152_v16 = vpop.f32.mrf.mxu0  ;;  %v475_v17 = vpop.f32.mrf.mxu1 }
  0xd0   :  { %216 = vst.msk [vmem:[%s598_s2] sm:$0xff] %vm215_vm3, %v152_v16  ;;  %224 = vst.msk [vmem:[%s598_s2 + $0x40] sm:$0xff] %vm215_vm3, %v475_v17  ;;  %v271_v20 = vmul.f32 %v152_v16, %v152_v16  ;;  %v232_v24 = vsel %vm215_vm3, %v152_v16, 0.0  ;;  %v290_v38 = vsel %vm215_vm3, %v273_v23, 0.0  ;;  %v279_v0 = vmul.f32 %v475_v17, %v475_v17 }
  0xd1   :  { %v372_v18 = vpop.f32.mrf.mxu0  ;;  %v486_v19 = vpop.f32.mrf.mxu1  ;;  %v247_v4 = vsel %vm215_vm3, %v475_v17, 0.0 }
  0xd2   :  { %219 = vst.msk [vmem:[%s598_s2 + $0x18] sm:$0xff] %vm215_vm3, %v372_v18  ;;  %227 = vst.msk [vmem:[%s598_s2 + $0x58] sm:$0xff] %vm215_vm3, %v486_v19  ;;  %v287_v31 = vsel %vm215_vm3, %v271_v20, 0.0  ;;  %v274_v32 = vmul.f32 %v372_v18, %v372_v18  ;;  %v237_v39 = vsel %vm215_vm3, %v372_v18, 0.0  ;;  %v302_v9 = vsel %vm215_vm3, %v279_v0, 0.0 }
  0xd3   :  { %v155_v21 = vpop.f32.mrf.mxu0  ;;  %v187_v22 = vpop.f32.mrf.mxu1  ;;  %v282_v14 = vmul.f32 %v486_v19, %v486_v19  ;;  %v306_v20 = vsel %vm215_vm3, %v281_v8, 0.0 }
  0xd4   :  { %217 = vst.msk [vmem:[%s598_s2 + $0x8] sm:$0xff] %vm215_vm3, %v155_v21  ;;  %v233_v25 = vsel %vm215_vm3, %v155_v21, 0.0  ;;  %v272_v26 = vmul.f32 %v155_v21, %v155_v21  ;;  %225 = vst.msk [vmem:[%s598_s2 + $0x48] sm:$0xff] %vm215_vm3, %v187_v22  ;;  %v292_v45 = vsel %vm215_vm3, %v274_v32, 0.0  ;;  %v280_v5 = vmul.f32 %v187_v22, %v187_v22 }
  0xd5   :  { %v234_v27 = vadd.f32 %v233_v25, %v232_v24  ;;  %v375_v28 = vpop.f32.mrf.mxu0  ;;  %v507_v29 = vpop.f32.mrf.mxu1  ;;  %v249_v10 = vsel %vm215_vm3, %v187_v22, 0.0  ;;  %v253_v21 = vsel %vm215_vm3, %v486_v19, 0.0  ;;  %v308_v25 = vsel %vm215_vm3, %v282_v14, 0.0 }
  0xd6   :  { %v288_v33 = vsel %vm215_vm3, %v272_v26, 0.0  ;;  %222 = vst.msk [vmem:[%s598_s2 + $0x30] sm:$0xff] %vm215_vm3, %v375_v28  ;;  %230 = vst.msk [vmem:[%s598_s2 + $0x70] sm:$0xff] %vm215_vm3, %v507_v29  ;;  %v277_v51 = vmul.f32 %v375_v28, %v375_v28  ;;  %v243_v57 = vsel %vm215_vm3, %v375_v28, 0.0  ;;  %v304_v16 = vsel %vm215_vm3, %v280_v5, 0.0 }
  0xd7   :  { %v236_v34 = vadd.f32 %v235_v30, %v234_v27  ;;  %v289_v35 = vadd.f32 %v288_v33, %v287_v31  ;;  %v168_v36 = vpop.f32.mrf.mxu0  ;;  %v200_v37 = vpop.f32.mrf.mxu1  ;;  %v285_v30 = vmul.f32 %v507_v29, %v507_v29  ;;  %v259_v19 = vsel %vm215_vm3, %v507_v29, 0.0 }
  0xd8   :  { %220 = vst.msk [vmem:[%s598_s2 + $0x20] sm:$0xff] %vm215_vm3, %v168_v36  ;;  %v275_v40 = vmul.f32 %v168_v36, %v168_v36  ;;  %228 = vst.msk [vmem:[%s598_s2 + $0x60] sm:$0xff] %vm215_vm3, %v200_v37  ;;  %v239_v46 = vsel %vm215_vm3, %v168_v36, 0.0  ;;  %v298_v62 = vsel %vm215_vm3, %v277_v51, 0.0  ;;  %v283_v23 = vmul.f32 %v200_v37, %v200_v37 }
  0xd9   :  { %v291_v41 = vadd.f32 %v290_v38, %v289_v35  ;;  %v238_v42 = vadd.f32 %v237_v39, %v236_v34  ;;  %v376_v43 = vpop.f32.mrf.mxu0  ;;  %v531_v44 = vpop.f32.mrf.mxu1  ;;  %v255_v26 = vsel %vm215_vm3, %v200_v37, 0.0  ;;  %v314_v39 = vsel %vm215_vm3, %v285_v30, 0.0 }
  0xda   :  { %223 = vst.msk [vmem:[%s598_s2 + $0x38] sm:$0xff] %vm215_vm3, %v376_v43  ;;  %231 = vst.msk [vmem:[%s598_s2 + $0x78] sm:$0xff] %vm215_vm3, %v531_v44  ;;  %v294_v52 = vsel %vm215_vm3, %v275_v40, 0.0  ;;  %v278_v58 = vmul.f32 %v376_v43, %v376_v43  ;;  %v245_v63 = vsel %vm215_vm3, %v376_v43, 0.0  ;;  %v310_v31 = vsel %vm215_vm3, %v283_v23, 0.0 }
  0xdb   :  { %v240_v47 = vadd.f32 %v239_v46, %v238_v42  ;;  %v293_v48 = vadd.f32 %v292_v45, %v291_v41  ;;  %v171_v49 = vpop.f32.mrf.mxu0  ;;  %v203_v50 = vpop.f32.mrf.mxu1  ;;  %v286_v35 = vmul.f32 %v531_v44, %v531_v44  ;;  %v261_v40 = vsel %vm215_vm3, %v531_v44, 0.0 }
  0xdc   :  { %221 = vst.msk [vmem:[%s598_s2 + $0x28] sm:$0xff] %vm215_vm3, %v171_v49  ;;  %v241_v53 = vsel %vm215_vm3, %v171_v49, 0.0  ;;  %v276_v54 = vmul.f32 %v171_v49, %v171_v49  ;;  %229 = vst.msk [vmem:[%s598_s2 + $0x68] sm:$0xff] %vm215_vm3, %v203_v50  ;;  %v300_v3 = vsel %vm215_vm3, %v278_v58, 0.0  ;;  %v284_v15 = vmul.f32 %v203_v50, %v203_v50 }
  0xdd   :  { %v295_v55 = vadd.f32 %v294_v52, %v293_v48  ;;  %v242_v56 = vadd.f32 %v241_v53, %v240_v47  ;;  %v257_v32 = vsel %vm215_vm3, %v203_v50, 0.0  ;;  %v316_v43 = vsel %vm215_vm3, %v286_v35, 0.0 }
  0xde   :  { %v296_v59 = vsel %vm215_vm3, %v276_v54, 0.0  ;;  %v312_v36 = vsel %vm215_vm3, %v284_v15, 0.0 }
  0xdf   :  { %v244_v60 = vadd.f32 %v243_v57, %v242_v56  ;;  %v297_v61 = vadd.f32 %v296_v59, %v295_v55 }
  0xe1   :  { %v246_v1 = vadd.f32 %v245_v63, %v244_v60  ;;  %v299_v2 = vadd.f32 %v298_v62, %v297_v61 }
  0xe3   :  { %v301_v6 = vadd.f32 %v300_v3, %v299_v2  ;;  %v248_v7 = vadd.f32 %v247_v4, %v246_v1 }
  0xe5   :  { %v250_v11 = vadd.f32 %v249_v10, %v248_v7  ;;  %v303_v12 = vadd.f32 %v302_v9, %v301_v6 }
  0xe7   :  { %v252_v17 = vadd.f32 %v251_v13, %v250_v11  ;;  %v305_v18 = vadd.f32 %v304_v16, %v303_v12 }
  0xe9   :  { %v307_v24 = vadd.f32 %v306_v20, %v305_v18  ;;  %v254_v22 = vadd.f32 %v253_v21, %v252_v17 }
  0xeb   :  { %v256_v27 = vadd.f32 %v255_v26, %v254_v22  ;;  %v309_v28 = vadd.f32 %v308_v25, %v307_v24 }
  0xed   :  { %v311_v33 = vadd.f32 %v310_v31, %v309_v28  ;;  %v258_v34 = vadd.f32 %v257_v32, %v256_v27 }
  0xef   :  { %v260_v37 = vadd.f32 %v259_v19, %v258_v34  ;;  %v313_v38 = vadd.f32 %v312_v36, %v311_v33 }
  0xf1   :  { %v262_v41 = vadd.f32 %v261_v40, %v260_v37  ;;  %v315_v42 = vadd.f32 %v314_v39, %v313_v38 }
  0xf3   :  { %v263_v45 = vrot.slane %v262_v41, 4  ;;  %v317_v46 = vadd.f32 %v316_v43, %v315_v42 }
  0xf5   :  { %v264_v47 = vadd.f32 %v263_v45, %v262_v41  ;;  %v318_v29 = vrot.slane %v317_v46, 4 }
  0xf7   :  { %v265_v48 = vrot.slane %v264_v47, 2  ;;  %v319_v49 = vadd.f32 %v318_v29, %v317_v46 }
  0xf9   :  { %v266_v50 = vadd.f32 %v265_v48, %v264_v47  ;;  %v320_v51 = vrot.slane %v319_v49, 2 }
  0xfb   :  { %v267_v52 = vrot.slane %v266_v50, 1  ;;  %v321_v53 = vadd.f32 %v320_v51, %v319_v49 }
  0xfd   :  { %v268_v54 = vadd.f32 %v267_v52, %v266_v50  ;;  %v322_v55 = vrot.slane %v321_v53, 1 }
  0xff   :  { %270 = vst.msk [vmem:[%s599_s3] sm:$0x1] %vm269_vm4, %v268_v54  ;;  %v323_v44 = vadd.f32 %v322_v55, %v321_v53 }
 0x101   :  { %324 = vst.msk [vmem:[%s600_s4] sm:$0x1] %vm269_vm4, %v323_v44 }

// kernel: resnet_forward.46
= control target key start
LH: loop header
LB: loop body
LE: loop exit
PB: predicated region body
PF: predicated region fallthrough
CT: control target
= control target key end

     0   :  { %vm44_vm0 = vcmask 261120   ;;  %s105_s0 = inlined_call_operand.vmem [shape: f32[32,32], index: 0, kind: input, shape index: {}]   ;;  %s106_s1 = inlined_call_operand.vmem [shape: f32[1,32], index: 1, kind: input, shape index: {}]   ;;  %s107_s2 = inlined_call_operand.vmem [shape: f32[1,32], index: 2, kind: input, shape index: {}]   ;;  %s108_s3 = inlined_call_operand.vmem [shape: f32[32,32], index: 3, kind: output, shape index: {}]  }
   0x1   :  { %v14_v0 = vld [vmem:[%s105_s0] sm:$0xff]  ;;  %v15_v4 = vld [vmem:[%s105_s0 + $0x8] sm:$0xff]  ;;  %v16_v5 = vld [vmem:[%s105_s0 + $0x10] sm:$0xff] }
   0x2   :  { %v53_v1 = vld [vmem:[%s106_s1] ss:$0 sm:$0xff]  ;;  %v17_v6 = vld [vmem:[%s105_s0 + $0x18] sm:$0xff] }
   0x3   :  { %v54_v2 = vld [vmem:[%s107_s2] ss:$0 sm:$0xff]  ;;  %v25_v3 = vmul.f32 %v53_v1, %v14_v0  ;;  %v26_v7 = vmul.f32 %v53_v1, %v15_v4  ;;  %v27_v8 = vmul.f32 %v53_v1, %v16_v5  ;;  %v28_v9 = vmul.f32 %v53_v1, %v17_v6 }
   0x5   :  { %v36_v10 = vadd.f32 %v54_v2, %v25_v3  ;;  %v37_v11 = vadd.f32 %v54_v2, %v26_v7  ;;  %v38_v12 = vadd.f32 %v54_v2, %v27_v8  ;;  %v39_v13 = vadd.f32 %v54_v2, %v28_v9 }
   0x7   :  { %v40_v14 = vmax.f32 %v36_v10, 0.0  ;;  %v41_v15 = vmax.f32 %v37_v11, 0.0  ;;  %v42_v16 = vmax.f32 %v38_v12, 0.0  ;;  %v43_v17 = vmax.f32 %v39_v13, 0.0 }
   0x9   :  { %45 = vst.msk [vmem:[%s108_s3] sm:$0xff] %vm44_vm0, %v40_v14  ;;  %46 = vst.msk [vmem:[%s108_s3 + $0x8] sm:$0xff] %vm44_vm0, %v41_v15 }
   0xa   :  { %47 = vst.msk [vmem:[%s108_s3 + $0x10] sm:$0xff] %vm44_vm0, %v42_v16  ;;  %48 = vst.msk [vmem:[%s108_s3 + $0x18] sm:$0xff] %vm44_vm0, %v43_v17 }

// kernel: resnet_forward.45
= control target key start
LH: loop header
LB: loop body
LE: loop exit
PB: predicated region body
PF: predicated region fallthrough
CT: control target
= control target key end

     0   :  { %v264_v0 = vmov 0   ;;  %vm109_vm0 = vcmask 130048   ;;  %vm165_vm1 = vcmask 261120   ;;  %vm183_vm2 = vcmask 253952   ;;  %s359_s1 = inlined_call_operand.vmem [shape: bf16[144,32], index: 1, kind: input, shape index: {}]   ;;  %s360_s0 = inlined_call_operand.vmem [shape: bf16[32,144], index: 0, kind: input, shape index: {}]   ;;  %s361_s2 = inlined_call_operand.vmem [shape: f32[32,32], index: 2, kind: output, shape index: {0}]   ;;  %s362_s3 = inlined_call_operand.vmem [shape: f32[1,1,32], index: 3, kind: output, shape index: {1}]   ;;  %s363_s4 = inlined_call_operand.vmem [shape: f32[1,1,32], index: 4, kind: output, shape index: {2}]  }
   0x1   :  { %116 = vmatprep.subr.bf16.mxu0 %v264_v0  ;;  %230 = vmatprep.subr.bf16.mxu1 %v264_v0  ;;  %v249_v1 = vld [vmem:[%s359_s1 + $0x38] sm:$0xff]   ;;  %v250_v2 = vld [vmem:[%s359_s1 + $0x30] sm:$0xff]   ;;  %v251_v3 = vld [vmem:[%s359_s1 + $0x28] sm:$0xff]  }
   0x2   :  { %117 = vmatpush1.bf16.msra.mxu0 %v249_v1  ;;  %239 = vmatpush1.bf16.msra.mxu1 %v249_v1  ;;  %v252_v4 = vld [vmem:[%s359_s1 + $0x20] sm:$0xff]   ;;  %v263_v6 = vld [vmem:[%s360_s0 + $0x14] ss:$8 sps:$4 sm:$0xff]   ;;  %v255_v9 = vld [vmem:[%s359_s1 + $0x8] sm:$0xff]  }
   0x3   :  { %118 = vmatprep.subr.bf16.mxu0 %v264_v0  ;;  %231 = vmatprep.subr.bf16.mxu1 %v264_v0  ;;  %v260_v5 = vld [vmem:[%s360_s0 + $0x4] ss:$8 sps:$4 sm:$0xff]   ;;  %v253_v7 = vld [vmem:[%s359_s1 + $0x18] sm:$0xff]   ;;  %v254_v8 = vld [vmem:[%s359_s1 + $0x10] sm:$0xff]  }
   0x4   :  { %228 = vmatprep.mubr.msk.bf16.mxu0 %vm109_vm0, %v260_v5  ;;  %229 = vmatprep.mubr.msk.bf16.mxu1 %vm109_vm0, %v263_v6  ;;  %v256_v10 = vld [vmem:[%s359_s1] sm:$0xff]   ;;  %v261_v13 = vld [vmem:[%s360_s0 + $0x10] ss:$8 sps:$4 sm:$0xff]  }
   0x5   :  { %v257_v11 = vld [vmem:[%s359_s1 + $0x40] sm:$0xff]  }
   0x6   :  { %119 = vmatpush1.bf16.msra.mxu0 %v250_v2  ;;  %240 = vmatpush1.bf16.msra.mxu1 %v250_v2  ;;  %v258_v12 = vld [vmem:[%s360_s0] ss:$8 sps:$4 sm:$0xff]  }
   0x7   :  { %120 = vmatprep.subr.bf16.mxu0 %v264_v0  ;;  %232 = vmatprep.subr.bf16.mxu1 %v264_v0 }
   0xa   :  { %121 = vmatpush1.bf16.msra.mxu0 %v251_v3  ;;  %241 = vmatpush1.bf16.msra.mxu1 %v251_v3 }
   0xb   :  { %122 = vmatprep.subr.bf16.mxu0 %v264_v0  ;;  %233 = vmatprep.subr.bf16.mxu1 %v264_v0 }
   0xe   :  { %123 = vmatpush1.bf16.msra.mxu0 %v252_v4  ;;  %242 = vmatpush1.bf16.msra.mxu1 %v252_v4 }
   0xf   :  { %124 = vmatprep.subr.bf16.mxu0 %v264_v0  ;;  %234 = vmatprep.subr.bf16.mxu1 %v264_v0 }
  0x12   :  { %125 = vmatpush1.bf16.msra.mxu0 %v253_v7  ;;  %243 = vmatpush1.bf16.msra.mxu1 %v253_v7 }
  0x13   :  { %126 = vmatprep.subr.bf16.mxu0 %v264_v0  ;;  %235 = vmatprep.subr.bf16.mxu1 %v264_v0 }
  0x16   :  { %127 = vmatpush1.bf16.msra.mxu0 %v254_v8  ;;  %244 = vmatpush1.bf16.msra.mxu1 %v254_v8 }
  0x17   :  { %128 = vmatprep.subr.bf16.mxu0 %v264_v0  ;;  %236 = vmatprep.subr.bf16.mxu1 %v264_v0 }
  0x1a   :  { %129 = vmatpush1.bf16.msra.mxu0 %v255_v9  ;;  %245 = vmatpush1.bf16.msra.mxu1 %v255_v9 }
  0x1b   :  { %130 = vmatprep.subr.bf16.mxu0 %v264_v0  ;;  %237 = vmatprep.subr.bf16.mxu1 %v264_v0 }
  0x1e   :  { %131 = vmatpush1.bf16.msra.mxu0 %v256_v10  ;;  %246 = vmatpush1.bf16.msra.mxu1 %v256_v10 }
  0x1f   :  { %146 = vmatprep.subr.bf16.mxu0 %v264_v0  ;;  %238 = vmatprep.subr.bf16.mxu1 %v264_v0 }
  0x22   :  { %147 = vmatpush2.bf16.msra.mxu0 %v257_v11  ;;  %247 = vmatpush2.bf16.msra.mxu1 %v257_v11 }
  0x25   :  { %149 = vmatmul.mubr.bf16.vlgmr.msra.gmra.mxu0 %v258_v12  ;;  %157 = vmatmul.mubr.bf16.vlgmr.msra.gmra.mxu1 %v261_v13 }
  0xe5   :  { %v150_v14 = vpop.f32.mrf.mxu0  ;;  %v158_v15 = vpop.f32.mrf.mxu1 }
  0xe6   :  { %166 = vst.msk [vmem:[%s361_s2] sm:$0xff] %vm165_vm1, %v150_v14  ;;  %168 = vst.msk [vmem:[%s361_s2 + $0x10] sm:$0xff] %vm165_vm1, %v158_v15  ;;  %v185_v18 = vmul.f32 %v150_v14, %v150_v14  ;;  %v170_v21 = vsel %vm165_vm1, %v150_v14, 0.0  ;;  %v187_v22 = vmul.f32 %v158_v15, %v158_v15  ;;  %v173_v29 = vsel %vm165_vm1, %v158_v15, 0.0 }
  0xe7   :  { %v152_v16 = vpop.f32.mrf.mxu0  ;;  %v160_v17 = vpop.f32.mrf.mxu1 }
  0xe8   :  { %v189_v28 = vsel %vm165_vm1, %v185_v18, 0.0  ;;  %v192_v34 = vsel %vm165_vm1, %v187_v22, 0.0 }
  0xe9   :  { %v153_v19 = vpop.f32.mrf.mxu0  ;;  %v161_v20 = vpop.f32.mrf.mxu1 }
  0xea   :  { %167 = vst.msk [vmem:[%s361_s2 + $0x8] sm:$0xff] %vm165_vm1, %v153_v19  ;;  %v171_v23 = vsel %vm165_vm1, %v153_v19, 0.0  ;;  %v186_v24 = vmul.f32 %v153_v19, %v153_v19  ;;  %169 = vst.msk [vmem:[%s361_s2 + $0x18] sm:$0xff] %vm165_vm1, %v161_v20  ;;  %v188_v31 = vmul.f32 %v161_v20, %v161_v20  ;;  %v175_v35 = vsel %vm165_vm1, %v161_v20, 0.0 }
  0xeb   :  { %v172_v25 = vadd.f32 %v171_v23, %v170_v21  ;;  %v155_v26 = vpop.f32.mrf.mxu0  ;;  %v163_v27 = vpop.f32.mrf.mxu1 }
  0xec   :  { %v190_v30 = vsel %vm165_vm1, %v186_v24, 0.0  ;;  %v194_v38 = vsel %vm165_vm1, %v188_v31, 0.0 }
  0xed   :  { %v191_v32 = vadd.f32 %v190_v30, %v189_v28  ;;  %v174_v33 = vadd.f32 %v173_v29, %v172_v25 }
  0xef   :  { %v176_v36 = vadd.f32 %v175_v35, %v174_v33  ;;  %v193_v37 = vadd.f32 %v192_v34, %v191_v32 }
  0xf1   :  { %v177_v39 = vrot.slane %v176_v36, 4  ;;  %v195_v40 = vadd.f32 %v194_v38, %v193_v37 }
  0xf3   :  { %v178_v41 = vadd.f32 %v177_v39, %v176_v36  ;;  %v196_v42 = vrot.slane %v195_v40, 4 }
  0xf5   :  { %v179_v43 = vrot.slane %v178_v41, 2  ;;  %v197_v44 = vadd.f32 %v196_v42, %v195_v40 }
  0xf7   :  { %v180_v45 = vadd.f32 %v179_v43, %v178_v41  ;;  %v198_v46 = vrot.slane %v197_v44, 2 }
  0xf9   :  { %v181_v47 = vrot.slane %v180_v45, 1  ;;  %v199_v48 = vadd.f32 %v198_v46, %v197_v44 }
  0xfb   :  { %v182_v49 = vadd.f32 %v181_v47, %v180_v45  ;;  %v200_v50 = vrot.slane %v199_v48, 1 }
  0xfd   :  { %184 = vst.msk [vmem:[%s362_s3] sm:$0x1] %vm183_vm2, %v182_v49  ;;  %v201_v51 = vadd.f32 %v200_v50, %v199_v48 }
  0xff   :  { %202 = vst.msk [vmem:[%s363_s4] sm:$0x1] %vm183_vm2, %v201_v51 }

// kernel: resnet_forward.47
= control target key start
LH: loop header
LB: loop body
LE: loop exit
PB: predicated region body
PF: predicated region fallthrough
CT: control target
= control target key end

     0   :  { %vm52_vm0 = vcmask 261120   ;;  %s192_s1 = inlined_call_operand.vmem [shape: bf16[32,32], index: 1, kind: input, shape index: {}]   ;;  %s193_s0 = inlined_call_operand.vmem [shape: bf16[32,32], index: 0, kind: input, shape index: {}]   ;;  %s194_s2 = inlined_call_operand.vmem [shape: f32[1,32], index: 2, kind: input, shape index: {}]   ;;  %s195_s3 = inlined_call_operand.vmem [shape: f32[32,32], index: 3, kind: output, shape index: {}]  }
   0x1   :  { %v135_v0 = vld [vmem:[%s192_s1 + $0x8] sm:$0xff]   ;;  %v136_v1 = vld [vmem:[%s192_s1] sm:$0xff]  }
   0x2   :  { %127 = vmatprep.subr.bf16.mxu0 %v135_v0  ;;  %v137_v2 = vld [vmem:[%s193_s0] sm:$0xff]   ;;  %v138_v3 = vld [vmem:[%s193_s0 + $0x8] sm:$0xff]  }
   0x3   :  { %128 = vmatpush3.bf16.msra.mxu0 %v135_v0  ;;  %131 = vmatprep.mubr.msk.bf16.mxu0 %vm52_vm0, %v137_v2  ;;  %v116_v4 = vld [vmem:[%s194_s2] ss:$0 sm:$0xff] }
   0x4   :  { %129 = vmatprep.subr.bf16.mxu0 %v136_v1 }
   0x7   :  { %130 = vmatpush3.bf16.msra.mxu0 %v136_v1 }
   0xa   :  { %132 = vmatmul.mubr.msk.bf16.vlgmr.msra.gmra.mxu0 %vm52_vm0, %v138_v3 }
  0xca   :  { %v133_v5 = vpop.f32.mrf.mxu0 }
  0xcb   :  { %v102_v6 = vadd.f32 %v133_v5, %v116_v4 }
  0xcc   :  { %v93_v7 = vpop.f32.mrf.mxu0 }
  0xcd   :  { %110 = vst.msk [vmem:[%s195_s3 + $0x10] sm:$0xff] %vm52_vm0, %v102_v6  ;;  %v94_v8 = vadd.f32 %v116_v4, %v93_v7 }
  0xce   :  { %v134_v9 = vpop.f32.mrf.mxu0 }
  0xcf   :  { %108 = vst.msk [vmem:[%s195_s3] sm:$0xff] %vm52_vm0, %v94_v8  ;;  %v105_v10 = vadd.f32 %v134_v9, %v116_v4 }
  0xd0   :  { %v96_v11 = vpop.f32.mrf.mxu0 }
  0xd1   :  { %111 = vst.msk [vmem:[%s195_s3 + $0x18] sm:$0xff] %vm52_vm0, %v105_v10  ;;  %v97_v12 = vadd.f32 %v116_v4, %v96_v11 }
  0xd3   :  { %109 = vst.msk [vmem:[%s195_s3 + $0x8] sm:$0xff] %vm52_vm0, %v97_v12 }

// kernel: resnet_forward.49
= control target key start
LH: loop header
LB: loop body
LE: loop exit
PB: predicated region body
PF: predicated region fallthrough
CT: control target
= control target key end

     0   :  { %s111_s20 = smov 112   ;;  %vm54_vm0 = vcmask 130048   ;;  %s112_s26 = smov 16   ;;  %vm98_vm1 = vcmask 261248   ;;  %s209_s3 = inlined_call_operand.vmem [shape: f32[1,32], index: 3, kind: input, shape index: {}]   ;;  %s210_s0 = inlined_call_operand.vmem [shape: f32[32,32], index: 0, kind: input, shape index: {}]   ;;  %s211_s1 = inlined_call_operand.vmem [shape: f32[32,16], index: 1, kind: input, shape index: {}]   ;;  %s212_s4 = inlined_call_operand.vmem [shape: f32[1,32], index: 4, kind: input, shape index: {}]   ;;  %s213_s5 = inlined_call_operand.vmem [shape: f32[32,32], index: 5, kind: output, shape index: {}]   ;;  %s214_s2 = inlined_call_operand.vmem [shape: f32[32,16], index: 2, kind: input, shape index: {}]  }
   0x1   :  { %v107_v0 = vld [vmem:[%s209_s3] ss:$0 sm:$0xff]  ;;  %v23_v2 = vld [vmem:[%s210_s0 + $0x8] sm:$0xff]  ;;  %v24_v3 = vld [vmem:[%s210_s0 + $0x10] sm:$0xff] }
   0x2   :  { %67 = vrot.lane.b32.xlu0 %v107_v0, %s111_s20  ;;  %v22_v1 = vld [vmem:[%s210_s0] sm:$0xff]  ;;  %v27_v5 = vld [vmem:[%s211_s1 + $0x8] sm:$0xff]  ;;  %v28_v6 = vld [vmem:[%s211_s1 + $0x10] sm:$0xff] }
   0x3   :  { %v26_v4 = vld [vmem:[%s211_s1] sm:$0xff]  ;;  %v25_v7 = vld [vmem:[%s210_s0 + $0x18] sm:$0xff]  ;;  %v37_v10 = vmul.f32 %v107_v0, %v27_v5  ;;  %v38_v11 = vmul.f32 %v107_v0, %v28_v6  ;;  %v64_v22 = vld [vmem:[%s214_s2 + $0x8] sm:$0xff] }
   0x4   :  { %v29_v8 = vld [vmem:[%s211_s1 + $0x18] sm:$0xff]  ;;  %v36_v9 = vmul.f32 %v107_v0, %v26_v4  ;;  %v108_v12 = vld [vmem:[%s212_s4] ss:$0 sm:$0xff]  ;;  %v65_v27 = vld [vmem:[%s214_s2 + $0x10] sm:$0xff] }
   0x5   :  { %v39_v13 = vmul.f32 %v107_v0, %v29_v8  ;;  %v41_v15 = vadd.f32 %v37_v10, %v23_v2  ;;  %v42_v16 = vadd.f32 %v38_v11, %v24_v3  ;;  %v63_v23 = vld [vmem:[%s214_s2] sm:$0xff]  ;;  %v66_v28 = vld [vmem:[%s214_s2 + $0x18] sm:$0xff] }
   0x6   :  { %v40_v14 = vadd.f32 %v36_v9, %v22_v1 }
   0x7   :  { %v43_v17 = vadd.f32 %v39_v13, %v25_v7  ;;  %v51_v19 = vadd.f32 %v108_v12, %v41_v15  ;;  %v52_v20 = vadd.f32 %v108_v12, %v42_v16 }
   0x8   :  { %v50_v18 = vadd.f32 %v108_v12, %v40_v14 }
   0x9   :  { %v53_v21 = vadd.f32 %v108_v12, %v43_v17  ;;  %56 = vst.msk [vmem:[%s213_s5 + $0x8] sm:$0xff] %vm54_vm0, %v51_v19  ;;  %57 = vst.msk [vmem:[%s213_s5 + $0x10] sm:$0xff] %vm54_vm0, %v52_v20 }
   0xa   :  { %55 = vst.msk [vmem:[%s213_s5] sm:$0xff] %vm54_vm0, %v50_v18 }
   0xb   :  { %58 = vst.msk [vmem:[%s213_s5 + $0x18] sm:$0xff] %vm54_vm0, %v53_v21 }
  0x74   :  { %v68_v24 = vpop.permute.xlu0 %67 }
  0x75   :  { %v71_v25 = vmul.f32 %v68_v24, %v64_v22  ;;  %v70_v26 = vmul.f32 %v68_v24, %v63_v23  ;;  %v72_v29 = vmul.f32 %v68_v24, %v65_v27  ;;  %v73_v30 = vmul.f32 %v68_v24, %v66_v28 }
  0x77   :  { %80 = vrot.lane.b32.xlu1 %v71_v25, %s112_s26  ;;  %78 = vrot.lane.b32.xlu0 %v70_v26, %s112_s26 }
  0x7b   :  { %82 = vrot.lane.b32.xlu1 %v72_v29, %s112_s26  ;;  %84 = vrot.lane.b32.xlu0 %v73_v30, %s112_s26 }
  0xe9   :  { %v81_v31 = vpop.permute.xlu1 %80  ;;  %v79_v32 = vpop.permute.xlu0 %78 }
  0xea   :  { %v91_v33 = vadd.f32 %v81_v31, %v23_v2  ;;  %v90_v34 = vadd.f32 %v79_v32, %v22_v1 }
  0xec   :  { %v95_v35 = vadd.f32 %v108_v12, %v91_v33  ;;  %v94_v36 = vadd.f32 %v108_v12, %v90_v34 }
  0xed   :  { %v83_v37 = vpop.permute.xlu1 %82  ;;  %v85_v38 = vpop.permute.xlu0 %84 }
  0xee   :  { %100 = vst.msk [vmem:[%s213_s5 + $0x8] sm:$0xff] %vm98_vm1, %v95_v35  ;;  %99 = vst.msk [vmem:[%s213_s5] sm:$0xff] %vm98_vm1, %v94_v36  ;;  %v92_v39 = vadd.f32 %v83_v37, %v24_v3  ;;  %v93_v40 = vadd.f32 %v85_v38, %v25_v7 }
  0xf0   :  { %v96_v41 = vadd.f32 %v108_v12, %v92_v39  ;;  %v97_v42 = vadd.f32 %v108_v12, %v93_v40 }
  0xf2   :  { %101 = vst.msk [vmem:[%s213_s5 + $0x10] sm:$0xff] %vm98_vm1, %v96_v41  ;;  %102 = vst.msk [vmem:[%s213_s5 + $0x18] sm:$0xff] %vm98_vm1, %v97_v42 }

// kernel: resnet_forward.48
= control target key start
LH: loop header
LB: loop body
LE: loop exit
PB: predicated region body
PF: predicated region fallthrough
CT: control target
= control target key end

     0   :  { %v312_v0 = vmov 0   ;;  %vm112_vm0 = vcmask 130048   ;;  %s313_s22 = smov 16   ;;  %vm189_vm1 = vcmask 122880   ;;  %vm226_vm2 = vcmask 254080   ;;  %s459_s1 = inlined_call_operand.vmem [shape: bf16[144,16], index: 1, kind: input, shape index: {}]   ;;  %s460_s0 = inlined_call_operand.vmem [shape: bf16[32,144], index: 0, kind: input, shape index: {}]   ;;  %s461_s2 = inlined_call_operand.vmem [shape: f32[32,16], index: 2, kind: input, shape index: {}]   ;;  %s462_s3 = inlined_call_operand.vmem [shape: f32[32,16], index: 3, kind: output, shape index: {0}]   ;;  %s463_s4 = inlined_call_operand.vmem [shape: f32[1,1,32], index: 4, kind: output, shape index: {1}]   ;;  %s464_s5 = inlined_call_operand.vmem [shape: f32[1,1,32], index: 5, kind: output, shape index: {2}]  }
   0x1   :  { %119 = vmatprep.subr.bf16.mxu0 %v312_v0  ;;  %277 = vmatprep.subr.bf16.mxu1 %v312_v0  ;;  %v297_v1 = vld [vmem:[%s459_s1 + $0x38] sm:$0xff]   ;;  %v298_v2 = vld [vmem:[%s459_s1 + $0x30] sm:$0xff]   ;;  %v299_v3 = vld [vmem:[%s459_s1 + $0x28] sm:$0xff]  }
   0x2   :  { %120 = vmatpush1.bf16.msra.mxu0 %v297_v1  ;;  %286 = vmatpush1.bf16.msra.mxu1 %v297_v1  ;;  %v300_v4 = vld [vmem:[%s459_s1 + $0x20] sm:$0xff]   ;;  %v311_v6 = vld [vmem:[%s460_s0 + $0x14] ss:$8 sps:$4 sm:$0xff]   ;;  %v173_v8 = vld [vmem:[%s461_s2 + $0x8] sm:$0xff] }
   0x3   :  { %121 = vmatprep.subr.bf16.mxu0 %v312_v0  ;;  %278 = vmatprep.subr.bf16.mxu1 %v312_v0  ;;  %v308_v5 = vld [vmem:[%s460_s0 + $0x4] ss:$8 sps:$4 sm:$0xff]   ;;  %v174_v9 = vld [vmem:[%s461_s2 + $0x10] sm:$0xff]  ;;  %v175_v10 = vld [vmem:[%s461_s2 + $0x18] sm:$0xff]  ;;  %v210_v13 = vsel %vm112_vm0, %v173_v8, 0.0  ;;  %v229_v15 = vmul.f32 %v173_v8, %v173_v8 }
   0x4   :  { %v172_v7 = vld [vmem:[%s461_s2] sm:$0xff]  ;;  %275 = vmatprep.mubr.msk.bf16.mxu0 %vm112_vm0, %v308_v5  ;;  %276 = vmatprep.mubr.msk.bf16.mxu1 %vm112_vm0, %v311_v6  ;;  %v212_v14 = vsel %vm112_vm0, %v174_v9, 0.0  ;;  %v301_v16 = vld [vmem:[%s459_s1 + $0x18] sm:$0xff]   ;;  %v230_v18 = vmul.f32 %v174_v9, %v174_v9  ;;  %v231_v19 = vmul.f32 %v175_v10, %v175_v10  ;;  %v214_v21 = vsel %vm112_vm0, %v175_v10, 0.0  ;;  %v302_v27 = vld [vmem:[%s459_s1 + $0x10] sm:$0xff]  }
   0x5   :  { %v209_v11 = vsel %vm112_vm0, %v172_v7, 0.0  ;;  %v228_v12 = vmul.f32 %v172_v7, %v172_v7  ;;  %v233_v22 = vsel %vm112_vm0, %v229_v15, 0.0  ;;  %v303_v32 = vld [vmem:[%s459_s1 + $0x8] sm:$0xff]   ;;  %v304_v37 = vld [vmem:[%s459_s1] sm:$0xff]   ;;  %v309_v47 = vld [vmem:[%s460_s0 + $0x10] ss:$8 sps:$4 sm:$0xff]  }
   0x6   :  { %122 = vmatpush1.bf16.msra.mxu0 %v298_v2  ;;  %287 = vmatpush1.bf16.msra.mxu1 %v298_v2  ;;  %v211_v17 = vadd.f32 %v210_v13, %v209_v11  ;;  %v235_v25 = vsel %vm112_vm0, %v230_v18, 0.0  ;;  %v237_v26 = vsel %vm112_vm0, %v231_v19, 0.0  ;;  %v305_v42 = vld [vmem:[%s459_s1 + $0x40] sm:$0xff]  }
   0x7   :  { %123 = vmatprep.subr.bf16.mxu0 %v312_v0  ;;  %279 = vmatprep.subr.bf16.mxu1 %v312_v0  ;;  %v232_v20 = vsel %vm112_vm0, %v228_v12, 0.0  ;;  %v306_v46 = vld [vmem:[%s460_s0] ss:$8 sps:$4 sm:$0xff]  }
   0x8   :  { %v213_v23 = vadd.f32 %v212_v14, %v211_v17  ;;  %v234_v24 = vadd.f32 %v233_v22, %v232_v20 }
   0xa   :  { %124 = vmatpush1.bf16.msra.mxu0 %v299_v3  ;;  %288 = vmatpush1.bf16.msra.mxu1 %v299_v3  ;;  %v215_v28 = vadd.f32 %v214_v21, %v213_v23  ;;  %v236_v29 = vadd.f32 %v235_v25, %v234_v24 }
   0xb   :  { %125 = vmatprep.subr.bf16.mxu0 %v312_v0  ;;  %280 = vmatprep.subr.bf16.mxu1 %v312_v0 }
   0xc   :  { %v216_v30 = vrot.slane %v215_v28, 4  ;;  %v238_v31 = vadd.f32 %v237_v26, %v236_v29 }
   0xe   :  { %126 = vmatpush1.bf16.msra.mxu0 %v300_v4  ;;  %289 = vmatpush1.bf16.msra.mxu1 %v300_v4  ;;  %v217_v33 = vadd.f32 %v216_v30, %v215_v28  ;;  %v239_v34 = vrot.slane %v238_v31, 4 }
   0xf   :  { %127 = vmatprep.subr.bf16.mxu0 %v312_v0  ;;  %281 = vmatprep.subr.bf16.mxu1 %v312_v0 }
  0x10   :  { %v218_v35 = vrot.slane %v217_v33, 2  ;;  %v240_v36 = vadd.f32 %v239_v34, %v238_v31 }
  0x12   :  { %128 = vmatpush1.bf16.msra.mxu0 %v301_v16  ;;  %290 = vmatpush1.bf16.msra.mxu1 %v301_v16  ;;  %v219_v38 = vadd.f32 %v218_v35, %v217_v33  ;;  %v241_v39 = vrot.slane %v240_v36, 2 }
  0x13   :  { %129 = vmatprep.subr.bf16.mxu0 %v312_v0  ;;  %282 = vmatprep.subr.bf16.mxu1 %v312_v0 }
  0x14   :  { %v220_v40 = vrot.slane %v219_v38, 1  ;;  %v242_v41 = vadd.f32 %v241_v39, %v240_v36 }
  0x16   :  { %130 = vmatpush1.bf16.msra.mxu0 %v302_v27  ;;  %291 = vmatpush1.bf16.msra.mxu1 %v302_v27  ;;  %v221_v43 = vadd.f32 %v220_v40, %v219_v38  ;;  %v243_v44 = vrot.slane %v242_v41, 1 }
  0x17   :  { %131 = vmatprep.subr.bf16.mxu0 %v312_v0  ;;  %283 = vmatprep.subr.bf16.mxu1 %v312_v0 }
  0x18   :  { %223 = vrot.lane.b32.xlu0 %v221_v43, %s313_s22  ;;  %v244_v45 = vadd.f32 %v243_v44, %v242_v41 }
  0x1a   :  { %132 = vmatpush1.bf16.msra.mxu0 %v303_v32  ;;  %292 = vmatpush1.bf16.msra.mxu1 %v303_v32 }
  0x1b   :  { %133 = vmatprep.subr.bf16.mxu0 %v312_v0  ;;  %284 = vmatprep.subr.bf16.mxu1 %v312_v0 }
  0x1c   :  { %246 = vrot.lane.b32.xlu0 %v244_v45, %s313_s22 }
  0x1e   :  { %134 = vmatpush1.bf16.msra.mxu0 %v304_v37  ;;  %293 = vmatpush1.bf16.msra.mxu1 %v304_v37 }
  0x1f   :  { %149 = vmatprep.subr.bf16.mxu0 %v312_v0  ;;  %285 = vmatprep.subr.bf16.mxu1 %v312_v0 }
  0x22   :  { %150 = vmatpush2.bf16.msra.mxu0 %v305_v42  ;;  %294 = vmatpush2.bf16.msra.mxu1 %v305_v42 }
  0x25   :  { %152 = vmatmul.mubr.bf16.vlgmr.msra.gmra.mxu0 %v306_v46  ;;  %160 = vmatmul.mubr.bf16.vlgmr.msra.gmra.mxu1 %v309_v47 }
  0x8a   :  { %v224_v17 = vpop.permute.xlu0 %223 }
  0x8e   :  { %v247_v22 = vpop.permute.xlu0 %246 }
  0xe5   :  { %v153_v48 = vpop.f32.mrf.mxu0  ;;  %v161_v49 = vpop.f32.mrf.mxu1 }
  0xe6   :  { %168 = vst.msk [vmem:[%s462_s3] sm:$0xff] %vm112_vm0, %v153_v48  ;;  %170 = vst.msk [vmem:[%s462_s3 + $0x10] sm:$0xff] %vm112_vm0, %v161_v49  ;;  %v191_v52 = vmul.f32 %v153_v48, %v153_v48  ;;  %v176_v55 = vsel %vm112_vm0, %v153_v48, 0.0  ;;  %v193_v56 = vmul.f32 %v161_v49, %v161_v49  ;;  %v179_v63 = vsel %vm112_vm0, %v161_v49, 0.0 }
  0xe7   :  { %v155_v50 = vpop.f32.mrf.mxu0  ;;  %v163_v51 = vpop.f32.mrf.mxu1 }
  0xe8   :  { %v195_v62 = vsel %vm112_vm0, %v191_v52, 0.0  ;;  %v198_v4 = vsel %vm112_vm0, %v193_v56, 0.0 }
  0xe9   :  { %v156_v53 = vpop.f32.mrf.mxu0  ;;  %v164_v54 = vpop.f32.mrf.mxu1 }
  0xea   :  { %169 = vst.msk [vmem:[%s462_s3 + $0x8] sm:$0xff] %vm112_vm0, %v156_v53  ;;  %v177_v57 = vsel %vm112_vm0, %v156_v53, 0.0  ;;  %v192_v58 = vmul.f32 %v156_v53, %v156_v53  ;;  %171 = vst.msk [vmem:[%s462_s3 + $0x18] sm:$0xff] %vm112_vm0, %v164_v54  ;;  %v194_v1 = vmul.f32 %v164_v54, %v164_v54  ;;  %v181_v5 = vsel %vm112_vm0, %v164_v54, 0.0 }
  0xeb   :  { %v178_v59 = vadd.f32 %v177_v57, %v176_v55  ;;  %v158_v60 = vpop.f32.mrf.mxu0  ;;  %v166_v61 = vpop.f32.mrf.mxu1 }
  0xec   :  { %v196_v0 = vsel %vm112_vm0, %v192_v58, 0.0  ;;  %v200_v8 = vsel %vm112_vm0, %v194_v1, 0.0 }
  0xed   :  { %v197_v2 = vadd.f32 %v196_v0, %v195_v62  ;;  %v180_v3 = vadd.f32 %v179_v63, %v178_v59 }
  0xef   :  { %v182_v6 = vadd.f32 %v181_v5, %v180_v3  ;;  %v199_v7 = vadd.f32 %v198_v4, %v197_v2 }
  0xf1   :  { %v183_v9 = vrot.slane %v182_v6, 4  ;;  %v201_v10 = vadd.f32 %v200_v8, %v199_v7 }
  0xf3   :  { %v184_v11 = vadd.f32 %v183_v9, %v182_v6  ;;  %v202_v12 = vrot.slane %v201_v10, 4 }
  0xf5   :  { %v185_v13 = vrot.slane %v184_v11, 2  ;;  %v203_v14 = vadd.f32 %v202_v12, %v201_v10 }
  0xf7   :  { %v186_v15 = vadd.f32 %v185_v13, %v184_v11  ;;  %v204_v16 = vrot.slane %v203_v14, 2 }
  0xf9   :  { %v187_v18 = vrot.slane %v186_v15, 1  ;;  %v205_v19 = vadd.f32 %v204_v16, %v203_v14 }
  0xfb   :  { %v188_v20 = vadd.f32 %v187_v18, %v186_v15  ;;  %v206_v21 = vrot.slane %v205_v19, 1 }
  0xfd   :  { %190 = vst.msk [vmem:[%s463_s4] sm:$0x1] %vm189_vm1, %v188_v20  ;;  %v207_v23 = vadd.f32 %v206_v21, %v205_v19 }
  0xfe   :  { %227 = vst.msk [vmem:[%s463_s4] sm:$0x1] %vm226_vm2, %v224_v17 }
  0xff   :  { %208 = vst.msk [vmem:[%s464_s5] sm:$0x1] %vm189_vm1, %v207_v23 }
 0x100   :  { %249 = vst.msk [vmem:[%s464_s5] sm:$0x1] %vm226_vm2, %v247_v22 }

// kernel: resnet_forward.54
= control target key start
LH: loop header
LB: loop body
LE: loop exit
PB: predicated region body
PF: predicated region fallthrough
CT: control target
= control target key end

     0   :  { %vm32_vm0 = vcmask 523264   ;;  %s72_s0 = inlined_call_operand.vmem [shape: f32[8,64], index: 0, kind: input, shape index: {}]   ;;  %s73_s1 = inlined_call_operand.vmem [shape: f32[1,64], index: 1, kind: input, shape index: {}]   ;;  %s74_s2 = inlined_call_operand.vmem [shape: f32[1,64], index: 2, kind: input, shape index: {}]   ;;  %s75_s3 = inlined_call_operand.vmem [shape: f32[8,64], index: 3, kind: output, shape index: {}]  }
   0x1   :  { %v14_v0 = vld [vmem:[%s72_s0] sm:$0xff] }
   0x2   :  { %v38_v1 = vld [vmem:[%s73_s1] ss:$0 sm:$0xff] }
   0x3   :  { %v39_v2 = vld [vmem:[%s74_s2] ss:$0 sm:$0xff]  ;;  %v22_v3 = vmul.f32 %v38_v1, %v14_v0 }
   0x5   :  { %v30_v4 = vadd.f32 %v39_v2, %v22_v3 }
   0x7   :  { %v31_v5 = vmax.f32 %v30_v4, 0.0 }
   0x9   :  { %33 = vst.msk [vmem:[%s75_s3] sm:$0xff] %vm32_vm0, %v31_v5 }

// kernel: resnet_forward.53
= control target key start
LH: loop header
LB: loop body
LE: loop exit
PB: predicated region body
PF: predicated region fallthrough
CT: control target
= control target key end

     0   :  { %v365_v1 = vmov 0.0   ;;  %vm366_vm0 = vmmov 0   ;;  %vm171_vm1 = vcmask 261120   ;;  %vm255_vm2 = vcmask 523264   ;;  %s461_s1 = inlined_call_operand.vmem [shape: bf16[288,64], index: 1, kind: input, shape index: {}]   ;;  %s462_s0 = inlined_call_operand.vmem [shape: bf16[8,288], index: 0, kind: input, shape index: {}]   ;;  %s463_s2 = inlined_call_operand.vmem [shape: f32[8,64], index: 2, kind: output, shape index: {0}]   ;;  %s464_s3 = inlined_call_operand.vmem [shape: f32[1,1,64], index: 3, kind: output, shape index: {1}]   ;;  %s465_s4 = inlined_call_operand.vmem [shape: f32[1,1,64], index: 4, kind: output, shape index: {2}]  }
   0x1   :  { %v344_v0 = vld [vmem:[%s461_s1 + $0x78] sm:$0xff]   ;;  %334 = vmatprep.subr.bf16.mxu1 %v365_v1  ;;  %338 = vmatprep.mubr.msk.bf16.mxu1 %vm366_vm0, %v365_v1  ;;  %v346_v3 = vld [vmem:[%s461_s1 + $0x70] sm:$0xff]   ;;  %v348_v5 = vld [vmem:[%s461_s1 + $0x68] sm:$0xff]   ;;  %vm264_vm3 = vcmask 516096  }
   0x2   :  { %v345_v2 = vld [vmem:[%s461_s1 + $0x38] sm:$0xff]   ;;  %309 = vmatprep.subr.bf16.mxu0 %v344_v0  ;;  %v347_v4 = vld [vmem:[%s461_s1 + $0x30] sm:$0xff]   ;;  %v349_v6 = vld [vmem:[%s461_s1 + $0x28] sm:$0xff]  }
   0x3   :  { %310 = vmatpush3.bf16.msra.mxu0 %v345_v2  ;;  %v350_v7 = vld [vmem:[%s461_s1 + $0x60] sm:$0xff]   ;;  %v352_v9 = vld [vmem:[%s461_s1 + $0x58] sm:$0xff]   ;;  %v356_v10 = vld [vmem:[%s461_s1 + $0x88] sm:$0xff]  }
   0x4   :  { %311 = vmatprep.subr.bf16.mxu0 %v346_v3  ;;  %v351_v8 = vld [vmem:[%s461_s1 + $0x20] sm:$0xff]   ;;  %v353_v11 = vld [vmem:[%s461_s1 + $0x18] sm:$0xff]   ;;  %335 = vmatpush3.bf16.msra.mxu1 %v356_v10  ;;  %v354_v13 = vld [vmem:[%s461_s1 + $0x50] sm:$0xff]  }
   0x5   :  { %336 = vmatprep.subr.bf16.mxu1 %v365_v1  ;;  %v359_v12 = vld [vmem:[%s461_s1 + $0x80] sm:$0xff]   ;;  %v362_v14 = vld [vmem:[%s462_s0 + $0x8] ss:$0 sps:$4 sm:$0xff]   ;;  %v355_v16 = vld [vmem:[%s461_s1 + $0x10] sm:$0xff]  }
   0x6   :  { %v15_v15 = vld [vmem:[%s462_s0] sm:$0xff]  ;;  %v357_v18 = vld [vmem:[%s461_s1 + $0x48] sm:$0xff]  }
   0x7   :  { %312 = vmatpush3.bf16.msra.mxu0 %v347_v4  ;;  %v288_v17 = vcombine.high %v15_v15, %v15_v15  ;;  %v358_v19 = vld [vmem:[%s461_s1 + $0x8] sm:$0xff]   ;;  %v360_v20 = vld [vmem:[%s461_s1 + $0x40] sm:$0xff]   ;;  %v287_v22 = vcombine.low %v15_v15, %v15_v15 }
   0x8   :  { %313 = vmatprep.subr.bf16.mxu0 %v348_v5  ;;  %337 = vmatpush3.bf16.msra.mxu1 %v359_v12  ;;  %v361_v21 = vld [vmem:[%s461_s1] sm:$0xff]  }
   0x9   :  { %207 = vmatprep.mubr.bf16.mxu0 %v288_v17 }
   0xb   :  { %314 = vmatpush3.bf16.msra.mxu0 %v349_v6  ;;  %339 = vmatmul.mubr.msk.bf16.vlgmr.msra.gmra.mxu1 %vm171_vm1, %v362_v14 }
   0xc   :  { %315 = vmatprep.subr.bf16.mxu0 %v350_v7 }
   0xf   :  { %316 = vmatpush3.bf16.msra.mxu0 %v351_v8 }
  0x10   :  { %317 = vmatprep.subr.bf16.mxu0 %v352_v9 }
  0x13   :  { %318 = vmatpush3.bf16.msra.mxu0 %v353_v11 }
  0x14   :  { %319 = vmatprep.subr.bf16.mxu0 %v354_v13 }
  0x17   :  { %320 = vmatpush3.bf16.msra.mxu0 %v355_v16 }
  0x18   :  { %321 = vmatprep.subr.bf16.mxu0 %v357_v18 }
  0x1b   :  { %322 = vmatpush3.bf16.msra.mxu0 %v358_v19 }
  0x1c   :  { %323 = vmatprep.subr.bf16.mxu0 %v360_v20 }
  0x1f   :  { %324 = vmatpush3.bf16.msra.mxu0 %v361_v21 }
  0x22   :  { %208 = vmatmul.mubr.bf16.vlgmr.msra.gmra.mxu0 %v287_v22 }
  0xcb   :  { %v249_v23 = vpop.f32.mrf.mxu1 }
  0xcd   :  { %v340_v24 = vpop.f32.mrf.mxu1 }
  0xcf   :  { %v252_v25 = vpop.f32.mrf.mxu1 }
  0xd1   :  { %v341_v26 = vpop.f32.mrf.mxu1 }
  0xe2   :  { %v325_v27 = vpop.f32.mrf.mxu0 }
  0xe4   :  { %v326_v28 = vpop.f32.mrf.mxu0 }
  0xe5   :  { %v327_v29 = vadd.f32 %v326_v28, %v325_v27 }
  0xe6   :  { %v328_v30 = vpop.f32.mrf.mxu0 }
  0xe7   :  { %v250_v31 = vadd.f32 %v327_v29, %v249_v23 }
  0xe8   :  { %v329_v32 = vpop.f32.mrf.mxu0 }
  0xe9   :  { %256 = vst.msk [vmem:[%s463_s2] sm:$0xff] %vm255_vm2, %v250_v31  ;;  %v257_v33 = vsel %vm255_vm2, %v250_v31, 0.0  ;;  %v266_v34 = vmul.f32 %v250_v31, %v250_v31 }
  0xea   :  { %v258_v35 = vrot.slane %v257_v33, 4 }
  0xeb   :  { %v267_v36 = vsel %vm255_vm2, %v266_v34, 0.0 }
  0xec   :  { %v259_v37 = vadd.f32 %v258_v35, %v257_v33  ;;  %v268_v38 = vrot.slane %v267_v36, 4 }
  0xee   :  { %v260_v39 = vrot.slane %v259_v37, 2  ;;  %v269_v40 = vadd.f32 %v268_v38, %v267_v36 }
  0xf0   :  { %v261_v41 = vadd.f32 %v260_v39, %v259_v37  ;;  %v270_v42 = vrot.slane %v269_v40, 2 }
  0xf2   :  { %v262_v43 = vrot.slane %v261_v41, 1  ;;  %v271_v44 = vadd.f32 %v270_v42, %v269_v40 }
  0xf4   :  { %v263_v45 = vadd.f32 %v262_v43, %v261_v41  ;;  %v272_v46 = vrot.slane %v271_v44, 1 }
  0xf6   :  { %265 = vst.msk [vmem:[%s464_s3] sm:$0x1] %vm264_vm3, %v263_v45  ;;  %v273_v47 = vadd.f32 %v272_v46, %v271_v44 }
  0xf8   :  { %274 = vst.msk [vmem:[%s465_s4] sm:$0x1] %vm264_vm3, %v273_v47 }

// kernel: resnet_forward.55
= control target key start
LH: loop header
LB: loop body
LE: loop exit
PB: predicated region body
PF: predicated region fallthrough
CT: control target
= control target key end

     0   :  { %v133_v0 = vmov 0.0   ;;  %vm134_vm0 = vmmov 0   ;;  %vm55_vm1 = vcmask 523264   ;;  %s176_s1 = inlined_call_operand.vmem [shape: bf16[64,64], index: 1, kind: input, shape index: {}]   ;;  %s177_s0 = inlined_call_operand.vmem [shape: bf16[8,64], index: 0, kind: input, shape index: {}]   ;;  %s178_s2 = inlined_call_operand.vmem [shape: f32[1,64], index: 2, kind: input, shape index: {}]   ;;  %s179_s3 = inlined_call_operand.vmem [shape: f32[8,64], index: 3, kind: output, shape index: {}]  }
   0x1   :  { %115 = vmatprep.subr.bf16.mxu0 %v133_v0  ;;  %v129_v1 = vld [vmem:[%s176_s1 + $0x18] sm:$0xff]   ;;  %123 = vmatprep.mubr.msk.bf16.mxu0 %vm134_vm0, %v133_v0  ;;  %v130_v2 = vld [vmem:[%s176_s1 + $0x10] sm:$0xff]   ;;  %v131_v3 = vld [vmem:[%s176_s1 + $0x8] sm:$0xff]  }
   0x2   :  { %116 = vmatpush3.bf16.msra.mxu0 %v129_v1  ;;  %v132_v4 = vld [vmem:[%s176_s1] sm:$0xff]  }
   0x3   :  { %117 = vmatprep.subr.bf16.mxu0 %v133_v0  ;;  %v15_v5 = vld [vmem:[%s177_s0] sm:$0xf] }
   0x4   :  { %v104_v6 = vld [vmem:[%s178_s2] ss:$0 sm:$0xff] }
   0x6   :  { %118 = vmatpush3.bf16.msra.mxu0 %v130_v2 }
   0x7   :  { %119 = vmatprep.subr.bf16.mxu0 %v133_v0 }
   0xa   :  { %120 = vmatpush3.bf16.msra.mxu0 %v131_v3 }
   0xb   :  { %121 = vmatprep.subr.bf16.mxu0 %v133_v0 }
   0xe   :  { %122 = vmatpush3.bf16.msra.mxu0 %v132_v4 }
  0x11   :  { %124 = vmatmul.mubr.msk.bf16.vlgmr.msra.gmra.mxu0 %vm55_vm1, %v15_v5 }
  0xd1   :  { %v93_v7 = vpop.f32.mrf.mxu0 }
  0xd2   :  { %v94_v8 = vadd.f32 %v104_v6, %v93_v7 }
  0xd3   :  { %v125_v9 = vpop.f32.mrf.mxu0 }
  0xd4   :  { %99 = vst.msk [vmem:[%s179_s3] sm:$0xff] %vm55_vm1, %v94_v8 }
  0xd5   :  { %v96_v10 = vpop.f32.mrf.mxu0 }
  0xd7   :  { %v126_v11 = vpop.f32.mrf.mxu0 }

// kernel: resnet_forward.57
= control target key start
LH: loop header
LB: loop body
LE: loop exit
PB: predicated region body
PF: predicated region fallthrough
CT: control target
= control target key end

     0   :  { %s63_s20 = smov 96   ;;  %vm39_vm0 = vcmask 261120   ;;  %vm53_vm1 = vcmask 523520   ;;  %s116_s3 = inlined_call_operand.vmem [shape: f32[1,64], index: 3, kind: input, shape index: {}]   ;;  %s117_s1 = inlined_call_operand.vmem [shape: f32[8,32], index: 1, kind: input, shape index: {}]   ;;  %s118_s4 = inlined_call_operand.vmem [shape: f32[1,64], index: 4, kind: input, shape index: {}]   ;;  %s119_s0 = inlined_call_operand.vmem [shape: f32[8,64], index: 0, kind: input, shape index: {}]   ;;  %s120_s5 = inlined_call_operand.vmem [shape: f32[8,64], index: 5, kind: output, shape index: {}]   ;;  %s121_s2 = inlined_call_operand.vmem [shape: f32[8,32], index: 2, kind: input, shape index: {}]  }
   0x1   :  { %v59_v0 = vld [vmem:[%s116_s3] ss:$0 sm:$0xff] }
   0x2   :  { %43 = vrot.lane.b32.xlu0 %v59_v0, %s63_s20  ;;  %v23_v1 = vld [vmem:[%s117_s1] sm:$0xff]  ;;  %s64_s1 = smov 32  }
   0x3   :  { %v30_v2 = vmul.f32 %v59_v0, %v23_v1  ;;  %v60_v3 = vld [vmem:[%s118_s4] ss:$0 sm:$0xff] }
   0x4   :  { %v22_v4 = vld [vmem:[%s119_s0] sm:$0xff] }
   0x5   :  { %v31_v5 = vadd.f32 %v30_v2, %v22_v4  ;;  %v42_v7 = vld [vmem:[%s121_s2] sm:$0xff] }
   0x7   :  { %v38_v6 = vadd.f32 %v60_v3, %v31_v5 }
   0x9   :  { %40 = vst.msk [vmem:[%s120_s5] sm:$0xff] %vm39_vm0, %v38_v6 }
  0x74   :  { %v44_v8 = vpop.permute.xlu0 %43 }
  0x75   :  { %v46_v9 = vmul.f32 %v44_v8, %v42_v7 }
  0x77   :  { %48 = vrot.lane.b32.xlu0 %v46_v9, %s64_s1 }
  0xe9   :  { %v49_v10 = vpop.permute.xlu0 %48 }
  0xea   :  { %v51_v11 = vadd.f32 %v49_v10, %v22_v4 }
  0xec   :  { %v52_v12 = vadd.f32 %v60_v3, %v51_v11 }
  0xee   :  { %54 = vst.msk [vmem:[%s120_s5] sm:$0xff] %vm53_vm1, %v52_v12 }

// kernel: resnet_forward.56
= control target key start
LH: loop header
LB: loop body
LE: loop exit
PB: predicated region body
PF: predicated region fallthrough
CT: control target
= control target key end

     0   :  { %v395_v1 = vmov 0.0   ;;  %vm396_vm0 = vmmov 0   ;;  %vm174_vm1 = vcmask 261120   ;;  %s397_s8 = smov 32   ;;  %vm267_vm2 = vcmask 253952   ;;  %s512_s1 = inlined_call_operand.vmem [shape: bf16[288,32], index: 1, kind: input, shape index: {}]   ;;  %s513_s0 = inlined_call_operand.vmem [shape: bf16[8,288], index: 0, kind: input, shape index: {}]   ;;  %s514_s2 = inlined_call_operand.vmem [shape: f32[8,32], index: 2, kind: input, shape index: {}]   ;;  %s515_s3 = inlined_call_operand.vmem [shape: f32[8,32], index: 3, kind: output, shape index: {0}]   ;;  %s516_s4 = inlined_call_operand.vmem [shape: f32[1,1,64], index: 4, kind: output, shape index: {1}]   ;;  %s517_s5 = inlined_call_operand.vmem [shape: f32[1,1,64], index: 5, kind: output, shape index: {2}]  }
   0x1   :  { %v374_v0 = vld [vmem:[%s512_s1 + $0x78] sm:$0xff]   ;;  %363 = vmatprep.subr.bf16.mxu1 %v395_v1  ;;  %367 = vmatprep.mubr.msk.bf16.mxu1 %vm396_vm0, %v395_v1  ;;  %v376_v3 = vld [vmem:[%s512_s1 + $0x70] sm:$0xff]   ;;  %v378_v5 = vld [vmem:[%s512_s1 + $0x68] sm:$0xff]   ;;  %vm289_vm3 = vcmask 516352  }
   0x2   :  { %v375_v2 = vld [vmem:[%s512_s1 + $0x38] sm:$0xff]   ;;  %338 = vmatprep.subr.bf16.mxu0 %v374_v0  ;;  %v377_v4 = vld [vmem:[%s512_s1 + $0x30] sm:$0xff]   ;;  %v379_v6 = vld [vmem:[%s512_s1 + $0x28] sm:$0xff]  }
   0x3   :  { %339 = vmatpush3.bf16.msra.mxu0 %v375_v2  ;;  %v380_v7 = vld [vmem:[%s512_s1 + $0x60] sm:$0xff]   ;;  %v382_v9 = vld [vmem:[%s512_s1 + $0x58] sm:$0xff]   ;;  %v386_v10 = vld [vmem:[%s512_s1 + $0x88] sm:$0xff]  }
   0x4   :  { %340 = vmatprep.subr.bf16.mxu0 %v376_v3  ;;  %v381_v8 = vld [vmem:[%s512_s1 + $0x20] sm:$0xff]   ;;  %v383_v11 = vld [vmem:[%s512_s1 + $0x18] sm:$0xff]   ;;  %364 = vmatpush3.bf16.msra.mxu1 %v386_v10  ;;  %v384_v13 = vld [vmem:[%s512_s1 + $0x50] sm:$0xff]  }
   0x5   :  { %365 = vmatprep.subr.bf16.mxu1 %v395_v1  ;;  %v389_v12 = vld [vmem:[%s512_s1 + $0x80] sm:$0xff]   ;;  %v392_v14 = vld [vmem:[%s513_s0 + $0x8] ss:$0 sps:$4 sm:$0xff]   ;;  %v385_v16 = vld [vmem:[%s512_s1 + $0x10] sm:$0xff]  }
   0x6   :  { %v18_v15 = vld [vmem:[%s513_s0] sm:$0xff]  ;;  %v387_v19 = vld [vmem:[%s512_s1 + $0x48] sm:$0xff]  }
   0x7   :  { %341 = vmatpush3.bf16.msra.mxu0 %v377_v4  ;;  %v317_v17 = vcombine.high %v18_v15, %v18_v15  ;;  %v259_v18 = vld [vmem:[%s514_s2] sm:$0xff]  ;;  %v388_v24 = vld [vmem:[%s512_s1 + $0x8] sm:$0xff]   ;;  %v316_v35 = vcombine.low %v18_v15, %v18_v15 }
   0x8   :  { %342 = vmatprep.subr.bf16.mxu0 %v378_v5  ;;  %366 = vmatpush3.bf16.msra.mxu1 %v389_v12  ;;  %v278_v20 = vsel %vm174_vm1, %v259_v18, 0.0  ;;  %v291_v21 = vmul.f32 %v259_v18, %v259_v18  ;;  %v390_v27 = vld [vmem:[%s512_s1 + $0x40] sm:$0xff]  }
   0x9   :  { %210 = vmatprep.mubr.bf16.mxu0 %v317_v17  ;;  %v279_v22 = vrot.slane %v278_v20, 4  ;;  %v391_v30 = vld [vmem:[%s512_s1] sm:$0xff]  }
   0xa   :  { %v292_v23 = vsel %vm174_vm1, %v291_v21, 0.0 }
   0xb   :  { %343 = vmatpush3.bf16.msra.mxu0 %v379_v6  ;;  %368 = vmatmul.mubr.msk.bf16.vlgmr.msra.gmra.mxu1 %vm174_vm1, %v392_v14  ;;  %v280_v25 = vadd.f32 %v279_v22, %v278_v20  ;;  %v293_v26 = vrot.slane %v292_v23, 4 }
   0xc   :  { %344 = vmatprep.subr.bf16.mxu0 %v380_v7 }
   0xd   :  { %v281_v28 = vrot.slane %v280_v25, 2  ;;  %v294_v29 = vadd.f32 %v293_v26, %v292_v23 }
   0xf   :  { %345 = vmatpush3.bf16.msra.mxu0 %v381_v8  ;;  %v282_v31 = vadd.f32 %v281_v28, %v280_v25  ;;  %v295_v32 = vrot.slane %v294_v29, 2 }
  0x10   :  { %346 = vmatprep.subr.bf16.mxu0 %v382_v9 }
  0x11   :  { %v283_v33 = vrot.slane %v282_v31, 1  ;;  %v296_v34 = vadd.f32 %v295_v32, %v294_v29 }
  0x13   :  { %347 = vmatpush3.bf16.msra.mxu0 %v383_v11  ;;  %v284_v36 = vadd.f32 %v283_v33, %v282_v31  ;;  %v297_v37 = vrot.slane %v296_v34, 1 }
  0x14   :  { %348 = vmatprep.subr.bf16.mxu0 %v384_v13 }
  0x15   :  { %286 = vrot.lane.b32.xlu0 %v284_v36, %s397_s8  ;;  %v298_v38 = vadd.f32 %v297_v37, %v296_v34 }
  0x17   :  { %349 = vmatpush3.bf16.msra.mxu0 %v385_v16 }
  0x18   :  { %350 = vmatprep.subr.bf16.mxu0 %v387_v19 }
  0x19   :  { %300 = vrot.lane.b32.xlu0 %v298_v38, %s397_s8 }
  0x1b   :  { %351 = vmatpush3.bf16.msra.mxu0 %v388_v24 }
  0x1c   :  { %352 = vmatprep.subr.bf16.mxu0 %v390_v27 }
  0x1f   :  { %353 = vmatpush3.bf16.msra.mxu0 %v391_v30 }
  0x22   :  { %211 = vmatmul.mubr.bf16.vlgmr.msra.gmra.mxu0 %v316_v35 }
  0x87   :  { %v287_v59 = vpop.permute.xlu0 %286 }
  0x8b   :  { %v301_v0 = vpop.permute.xlu0 %300 }
  0xcb   :  { %v252_v39 = vpop.f32.mrf.mxu1 }
  0xcd   :  { %v369_v40 = vpop.f32.mrf.mxu1 }
  0xcf   :  { %v255_v41 = vpop.f32.mrf.mxu1 }
  0xd1   :  { %v370_v42 = vpop.f32.mrf.mxu1 }
  0xe2   :  { %v354_v43 = vpop.f32.mrf.mxu0 }
  0xe4   :  { %v355_v44 = vpop.f32.mrf.mxu0 }
  0xe5   :  { %v356_v45 = vadd.f32 %v355_v44, %v354_v43 }
  0xe6   :  { %v357_v46 = vpop.f32.mrf.mxu0 }
  0xe7   :  { %v253_v47 = vadd.f32 %v356_v45, %v252_v39 }
  0xe8   :  { %v358_v48 = vpop.f32.mrf.mxu0 }
  0xe9   :  { %258 = vst.msk [vmem:[%s515_s3] sm:$0xff] %vm174_vm1, %v253_v47  ;;  %v260_v49 = vsel %vm174_vm1, %v253_v47, 0.0  ;;  %v269_v50 = vmul.f32 %v253_v47, %v253_v47 }
  0xea   :  { %v261_v51 = vrot.slane %v260_v49, 4 }
  0xeb   :  { %v270_v52 = vsel %vm174_vm1, %v269_v50, 0.0 }
  0xec   :  { %v262_v53 = vadd.f32 %v261_v51, %v260_v49  ;;  %v271_v54 = vrot.slane %v270_v52, 4 }
  0xee   :  { %v263_v55 = vrot.slane %v262_v53, 2  ;;  %v272_v56 = vadd.f32 %v271_v54, %v270_v52 }
  0xf0   :  { %v264_v57 = vadd.f32 %v263_v55, %v262_v53  ;;  %v273_v58 = vrot.slane %v272_v56, 2 }
  0xf2   :  { %v265_v60 = vrot.slane %v264_v57, 1  ;;  %v274_v61 = vadd.f32 %v273_v58, %v272_v56 }
  0xf4   :  { %v266_v62 = vadd.f32 %v265_v60, %v264_v57  ;;  %v275_v63 = vrot.slane %v274_v61, 1 }
  0xf6   :  { %268 = vst.msk [vmem:[%s516_s4] sm:$0x1] %vm267_vm2, %v266_v62  ;;  %v276_v1 = vadd.f32 %v275_v63, %v274_v61 }
  0xf7   :  { %290 = vst.msk [vmem:[%s516_s4] sm:$0x1] %vm289_vm3, %v287_v59 }
  0xf8   :  { %277 = vst.msk [vmem:[%s517_s5] sm:$0x1] %vm267_vm2, %v276_v1 }
  0xf9   :  { %303 = vst.msk [vmem:[%s517_s5] sm:$0x1] %vm289_vm3, %v301_v0 }

// kernel: resnet_forward.65
= control target key start
LH: loop header
LB: loop body
LE: loop exit
PB: predicated region body
PF: predicated region fallthrough
CT: control target
= control target key end

     0   :  { %vm32_vm0 = vcmask 785408   ;;  %s72_s0 = inlined_call_operand.vmem [shape: f32[8,96], index: 0, kind: input, shape index: {}]   ;;  %s73_s1 = inlined_call_operand.vmem [shape: f32[1,96], index: 1, kind: input, shape index: {}]   ;;  %s74_s2 = inlined_call_operand.vmem [shape: f32[1,96], index: 2, kind: input, shape index: {}]   ;;  %s75_s3 = inlined_call_operand.vmem [shape: f32[8,96], index: 3, kind: output, shape index: {}]  }
   0x1   :  { %v14_v0 = vld [vmem:[%s72_s0] sm:$0xff] }
   0x2   :  { %v38_v1 = vld [vmem:[%s73_s1] ss:$0 sm:$0xff] }
   0x3   :  { %v39_v2 = vld [vmem:[%s74_s2] ss:$0 sm:$0xff]  ;;  %v22_v3 = vmul.f32 %v38_v1, %v14_v0 }
   0x5   :  { %v30_v4 = vadd.f32 %v39_v2, %v22_v3 }
   0x7   :  { %v31_v5 = vmax.f32 %v30_v4, 0.0 }
   0x9   :  { %33 = vst.msk [vmem:[%s75_s3] sm:$0xff] %vm32_vm0, %v31_v5 }

// kernel: resnet_forward.64
= control target key start
LH: loop header
LB: loop body
LE: loop exit
PB: predicated region body
PF: predicated region fallthrough
CT: control target
= control target key end

     0   :  { %v625_v36 = vmov 0.0   ;;  %vm626_vm0 = vmmov 0   ;;  %vm323_vm1 = vcmask 523264   ;;  %vm447_vm2 = vcmask 785408   ;;  %s778_s1 = inlined_call_operand.vmem [shape: bf16[576,96], index: 1, kind: input, shape index: {}]   ;;  %s779_s0 = inlined_call_operand.vmem [shape: bf16[8,576], index: 0, kind: input, shape index: {}]   ;;  %s780_s2 = inlined_call_operand.vmem [shape: f32[8,96], index: 2, kind: output, shape index: {0}]   ;;  %s781_s3 = inlined_call_operand.vmem [shape: f32[1,1,96], index: 3, kind: output, shape index: {1}]   ;;  %s782_s4 = inlined_call_operand.vmem [shape: f32[1,1,96], index: 4, kind: output, shape index: {2}]  }
   0x1   :  { %v584_v0 = vld [vmem:[%s778_s1 + $0x78] sm:$0xff]   ;;  %v588_v4 = vld [vmem:[%s778_s1 + $0x70] sm:$0xff]   ;;  %v592_v8 = vld [vmem:[%s778_s1 + $0x68] sm:$0xff]   ;;  %vm456_vm3 = vcmask 778240  }
   0x2   :  { %v585_v1 = vld [vmem:[%s778_s1 + $0xf8] sm:$0xff]   ;;  %521 = vmatprep.subr.bf16.mxu0 %v584_v0  ;;  %v589_v5 = vld [vmem:[%s778_s1 + $0xf0] sm:$0xff]   ;;  %v593_v9 = vld [vmem:[%s778_s1 + $0xe8] sm:$0xff]  }
   0x3   :  { %v586_v2 = vld [vmem:[%s778_s1 + $0x38] sm:$0xff]   ;;  %543 = vmatprep.subr.bf16.mxu1 %v585_v1  ;;  %v590_v6 = vld [vmem:[%s778_s1 + $0x30] sm:$0xff]   ;;  %v594_v10 = vld [vmem:[%s778_s1 + $0x28] sm:$0xff]  }
   0x4   :  { %v587_v3 = vld [vmem:[%s778_s1 + $0xb8] sm:$0xff]   ;;  %522 = vmatpush3.bf16.msra.mxu0 %v586_v2  ;;  %v591_v7 = vld [vmem:[%s778_s1 + $0xb0] sm:$0xff]   ;;  %v595_v11 = vld [vmem:[%s778_s1 + $0xa8] sm:$0xff]  }
   0x5   :  { %544 = vmatpush3.bf16.msra.mxu1 %v587_v3  ;;  %523 = vmatprep.subr.bf16.mxu0 %v588_v4  ;;  %v596_v12 = vld [vmem:[%s778_s1 + $0x60] sm:$0xff]   ;;  %v600_v16 = vld [vmem:[%s778_s1 + $0x58] sm:$0xff]   ;;  %v604_v20 = vld [vmem:[%s778_s1 + $0x50] sm:$0xff]  }
   0x6   :  { %545 = vmatprep.subr.bf16.mxu1 %v589_v5  ;;  %v597_v13 = vld [vmem:[%s778_s1 + $0xe0] sm:$0xff]   ;;  %v601_v17 = vld [vmem:[%s778_s1 + $0xd8] sm:$0xff]   ;;  %v605_v21 = vld [vmem:[%s778_s1 + $0xd0] sm:$0xff]  }
   0x7   :  { %v598_v14 = vld [vmem:[%s778_s1 + $0x20] sm:$0xff]   ;;  %v602_v18 = vld [vmem:[%s778_s1 + $0x18] sm:$0xff]   ;;  %v606_v22 = vld [vmem:[%s778_s1 + $0x10] sm:$0xff]  }
   0x8   :  { %524 = vmatpush3.bf16.msra.mxu0 %v590_v6  ;;  %v599_v15 = vld [vmem:[%s778_s1 + $0xa0] sm:$0xff]   ;;  %v603_v19 = vld [vmem:[%s778_s1 + $0x98] sm:$0xff]   ;;  %v607_v23 = vld [vmem:[%s778_s1 + $0x90] sm:$0xff]  }
   0x9   :  { %546 = vmatpush3.bf16.msra.mxu1 %v591_v7  ;;  %525 = vmatprep.subr.bf16.mxu0 %v592_v8  ;;  %v608_v24 = vld [vmem:[%s778_s1 + $0x48] sm:$0xff]   ;;  %v612_v28 = vld [vmem:[%s778_s1 + $0x40] sm:$0xff]   ;;  %v621_v39 = vld [vmem:[%s778_s1 + $0x118] sm:$0xff]  }
   0xa   :  { %547 = vmatprep.subr.bf16.mxu1 %v593_v9  ;;  %v609_v25 = vld [vmem:[%s778_s1 + $0xc8] sm:$0xff]   ;;  %v613_v29 = vld [vmem:[%s778_s1 + $0xc0] sm:$0xff]   ;;  %v622_v40 = vld [vmem:[%s778_s1 + $0x110] sm:$0xff]  }
   0xb   :  { %v610_v26 = vld [vmem:[%s778_s1 + $0x8] sm:$0xff]   ;;  %v614_v30 = vld [vmem:[%s778_s1] sm:$0xff]   ;;  %v618_v43 = vld [vmem:[%s779_s0 + $0x10] ss:$0 sps:$4 sm:$0xff]  }
   0xc   :  { %526 = vmatpush3.bf16.msra.mxu0 %v594_v10  ;;  %v611_v27 = vld [vmem:[%s778_s1 + $0x88] sm:$0xff]   ;;  %v615_v31 = vld [vmem:[%s778_s1 + $0x80] sm:$0xff]  }
   0xd   :  { %548 = vmatpush3.bf16.msra.mxu1 %v595_v11  ;;  %527 = vmatprep.subr.bf16.mxu0 %v596_v12  ;;  %v15_v32 = vld [vmem:[%s779_s0] sm:$0xff]  ;;  %v16_v35 = vld [vmem:[%s779_s0 + $0x8] sm:$0xff] }
   0xe   :  { %549 = vmatprep.subr.bf16.mxu1 %v597_v13  ;;  %v479_v33 = vcombine.low %v15_v32, %v15_v32  ;;  %v480_v34 = vcombine.high %v15_v32, %v15_v32  ;;  %v481_v37 = vcombine.low %v16_v35, %v16_v35  ;;  %v482_v38 = vcombine.high %v16_v35, %v16_v35  ;;  %v623_v41 = vld [vmem:[%s778_s1 + $0x108] sm:$0xff]   ;;  %v624_v42 = vld [vmem:[%s778_s1 + $0x100] sm:$0xff]  }
  0x10   :  { %528 = vmatpush3.bf16.msra.mxu0 %v598_v14  ;;  %359 = vmatprep.mubr.bf16.mxu0 %v480_v34 }
  0x11   :  { %550 = vmatpush3.bf16.msra.mxu1 %v599_v15  ;;  %529 = vmatprep.subr.bf16.mxu0 %v600_v16 }
  0x12   :  { %551 = vmatprep.subr.bf16.mxu1 %v601_v17  ;;  %399 = vmatprep.mubr.bf16.mxu1 %v482_v38 }
  0x14   :  { %530 = vmatpush3.bf16.msra.mxu0 %v602_v18 }
  0x15   :  { %552 = vmatpush3.bf16.msra.mxu1 %v603_v19  ;;  %531 = vmatprep.subr.bf16.mxu0 %v604_v20 }
  0x16   :  { %553 = vmatprep.subr.bf16.mxu1 %v605_v21 }
  0x18   :  { %532 = vmatpush3.bf16.msra.mxu0 %v606_v22 }
  0x19   :  { %554 = vmatpush3.bf16.msra.mxu1 %v607_v23  ;;  %533 = vmatprep.subr.bf16.mxu0 %v608_v24 }
  0x1a   :  { %555 = vmatprep.subr.bf16.mxu1 %v609_v25 }
  0x1c   :  { %534 = vmatpush3.bf16.msra.mxu0 %v610_v26 }
  0x1d   :  { %556 = vmatpush3.bf16.msra.mxu1 %v611_v27  ;;  %535 = vmatprep.subr.bf16.mxu0 %v612_v28 }
  0x1e   :  { %557 = vmatprep.subr.bf16.mxu1 %v613_v29 }
  0x20   :  { %536 = vmatpush3.bf16.msra.mxu0 %v614_v30 }
  0x21   :  { %558 = vmatpush3.bf16.msra.mxu1 %v615_v31  ;;  %570 = vmatprep.subr.bf16.mxu0 %v625_v36 }
  0x23   :  { %360 = vmatmul.mubr.bf16.vlgmr.msra.gmra.mxu0 %v479_v33 }
  0x24   :  { %400 = vmatmul.mubr.bf16.vlgmr.msra.gmra.mxu1 %v481_v37  ;;  %571 = vmatpush3.bf16.msra.mxu0 %v621_v39 }
  0x25   :  { %572 = vmatprep.subr.bf16.mxu0 %v625_v36  ;;  %578 = vmatprep.mubr.msk.bf16.mxu0 %vm626_vm0, %v625_v36 }
  0x28   :  { %573 = vmatpush3.bf16.msra.mxu0 %v622_v40 }
  0x29   :  { %574 = vmatprep.subr.bf16.mxu0 %v625_v36 }
  0x2c   :  { %575 = vmatpush3.bf16.msra.mxu0 %v623_v41 }
  0x2d   :  { %576 = vmatprep.subr.bf16.mxu0 %v625_v36 }
  0x30   :  { %577 = vmatpush3.bf16.msra.mxu0 %v624_v42 }
  0x33   :  { %579 = vmatmul.mubr.msk.bf16.vlgmr.msra.gmra.mxu0 %vm323_vm1, %v618_v43 }
  0xe3   :  { %v537_v44 = vpop.f32.mrf.mxu0 }
  0xe4   :  { %v559_v45 = vpop.f32.mrf.mxu1 }
  0xe5   :  { %v538_v46 = vpop.f32.mrf.mxu0 }
  0xe6   :  { %v560_v47 = vpop.f32.mrf.mxu1  ;;  %v539_v52 = vadd.f32 %v538_v46, %v537_v44 }
  0xe7   :  { %v540_v48 = vpop.f32.mrf.mxu0  ;;  %v561_v53 = vadd.f32 %v560_v47, %v559_v45 }
  0xe8   :  { %v562_v49 = vpop.f32.mrf.mxu1 }
  0xe9   :  { %v541_v50 = vpop.f32.mrf.mxu0  ;;  %v402_v54 = vadd.f32 %v561_v53, %v539_v52 }
  0xea   :  { %v563_v51 = vpop.f32.mrf.mxu1 }
  0xf3   :  { %v441_v55 = vpop.f32.mrf.mxu0 }
  0xf4   :  { %v442_v56 = vadd.f32 %v441_v55, %v402_v54 }
  0xf5   :  { %v580_v57 = vpop.f32.mrf.mxu0 }
  0xf6   :  { %448 = vst.msk [vmem:[%s780_s2] sm:$0xff] %vm447_vm2, %v442_v56  ;;  %v449_v58 = vsel %vm447_vm2, %v442_v56, 0.0  ;;  %v458_v59 = vmul.f32 %v442_v56, %v442_v56 }
  0xf7   :  { %v450_v60 = vrot.slane %v449_v58, 4  ;;  %v444_v61 = vpop.f32.mrf.mxu0 }
  0xf8   :  { %v459_v62 = vsel %vm447_vm2, %v458_v59, 0.0 }
  0xf9   :  { %v451_v63 = vadd.f32 %v450_v60, %v449_v58  ;;  %v460_v0 = vrot.slane %v459_v62, 4  ;;  %v581_v1 = vpop.f32.mrf.mxu0 }
  0xfb   :  { %v452_v2 = vrot.slane %v451_v63, 2  ;;  %v461_v3 = vadd.f32 %v460_v0, %v459_v62 }
  0xfd   :  { %v453_v4 = vadd.f32 %v452_v2, %v451_v63  ;;  %v462_v5 = vrot.slane %v461_v3, 2 }
  0xff   :  { %v454_v6 = vrot.slane %v453_v4, 1  ;;  %v463_v7 = vadd.f32 %v462_v5, %v461_v3 }
 0x101   :  { %v455_v8 = vadd.f32 %v454_v6, %v453_v4  ;;  %v464_v9 = vrot.slane %v463_v7, 1 }
 0x103   :  { %457 = vst.msk [vmem:[%s781_s3] sm:$0x1] %vm456_vm3, %v455_v8  ;;  %v465_v10 = vadd.f32 %v464_v9, %v463_v7 }
 0x105   :  { %466 = vst.msk [vmem:[%s782_s4] sm:$0x1] %vm456_vm3, %v465_v10 }

// kernel: resnet_forward.66
= control target key start
LH: loop header
LB: loop body
LE: loop exit
PB: predicated region body
PF: predicated region fallthrough
CT: control target
= control target key end

     0   :  { %v159_v0 = vmov 0.0   ;;  %vm160_vm0 = vmmov 0   ;;  %vm71_vm1 = vcmask 785408   ;;  %s208_s1 = inlined_call_operand.vmem [shape: bf16[96,96], index: 1, kind: input, shape index: {}]   ;;  %s209_s0 = inlined_call_operand.vmem [shape: bf16[8,96], index: 0, kind: input, shape index: {}]   ;;  %s210_s2 = inlined_call_operand.vmem [shape: f32[1,96], index: 2, kind: input, shape index: {}]   ;;  %s211_s3 = inlined_call_operand.vmem [shape: f32[8,96], index: 3, kind: output, shape index: {}]  }
   0x1   :  { %135 = vmatprep.subr.bf16.mxu0 %v159_v0  ;;  %v153_v1 = vld [vmem:[%s208_s1 + $0x28] sm:$0xff]   ;;  %147 = vmatprep.mubr.msk.bf16.mxu0 %vm160_vm0, %v159_v0  ;;  %v154_v2 = vld [vmem:[%s208_s1 + $0x20] sm:$0xff]   ;;  %v155_v3 = vld [vmem:[%s208_s1 + $0x18] sm:$0xff]  }
   0x2   :  { %136 = vmatpush3.bf16.msra.mxu0 %v153_v1  ;;  %v156_v4 = vld [vmem:[%s208_s1 + $0x10] sm:$0xff]   ;;  %v157_v5 = vld [vmem:[%s208_s1 + $0x8] sm:$0xff]   ;;  %v158_v6 = vld [vmem:[%s208_s1] sm:$0xff]  }
   0x3   :  { %137 = vmatprep.subr.bf16.mxu0 %v159_v0  ;;  %v15_v7 = vld [vmem:[%s209_s0] sm:$0xf] }
   0x4   :  { %v120_v8 = vld [vmem:[%s210_s2] ss:$0 sm:$0xff] }
   0x6   :  { %138 = vmatpush3.bf16.msra.mxu0 %v154_v2 }
   0x7   :  { %139 = vmatprep.subr.bf16.mxu0 %v159_v0 }
   0xa   :  { %140 = vmatpush3.bf16.msra.mxu0 %v155_v3 }
   0xb   :  { %141 = vmatprep.subr.bf16.mxu0 %v159_v0 }
   0xe   :  { %142 = vmatpush3.bf16.msra.mxu0 %v156_v4 }
   0xf   :  { %143 = vmatprep.subr.bf16.mxu0 %v159_v0 }
  0x12   :  { %144 = vmatpush3.bf16.msra.mxu0 %v157_v5 }
  0x13   :  { %145 = vmatprep.subr.bf16.mxu0 %v159_v0 }
  0x16   :  { %146 = vmatpush3.bf16.msra.mxu0 %v158_v6 }
  0x19   :  { %148 = vmatmul.mubr.msk.bf16.vlgmr.msra.gmra.mxu0 %vm71_vm1, %v15_v7 }
  0xd9   :  { %v109_v9 = vpop.f32.mrf.mxu0 }
  0xda   :  { %v110_v10 = vadd.f32 %v120_v8, %v109_v9 }
  0xdb   :  { %v149_v11 = vpop.f32.mrf.mxu0 }
  0xdc   :  { %115 = vst.msk [vmem:[%s211_s3] sm:$0xff] %vm71_vm1, %v110_v10 }
  0xdd   :  { %v112_v12 = vpop.f32.mrf.mxu0 }
  0xdf   :  { %v150_v13 = vpop.f32.mrf.mxu0 }

// kernel: resnet_forward.68
= control target key start
LH: loop header
LB: loop body
LE: loop exit
PB: predicated region body
PF: predicated region fallthrough
CT: control target
= control target key end

     0   :  { %s63_s20 = smov 80   ;;  %vm39_vm0 = vcmask 392192   ;;  %vm53_vm1 = vcmask 785792   ;;  %s116_s3 = inlined_call_operand.vmem [shape: f32[1,96], index: 3, kind: input, shape index: {}]   ;;  %s117_s1 = inlined_call_operand.vmem [shape: f32[8,48], index: 1, kind: input, shape index: {}]   ;;  %s118_s4 = inlined_call_operand.vmem [shape: f32[1,96], index: 4, kind: input, shape index: {}]   ;;  %s119_s0 = inlined_call_operand.vmem [shape: f32[8,96], index: 0, kind: input, shape index: {}]   ;;  %s120_s5 = inlined_call_operand.vmem [shape: f32[8,96], index: 5, kind: output, shape index: {}]   ;;  %s121_s2 = inlined_call_operand.vmem [shape: f32[8,48], index: 2, kind: input, shape index: {}]  }
   0x1   :  { %v59_v0 = vld [vmem:[%s116_s3] ss:$0 sm:$0xff] }
   0x2   :  { %43 = vrot.lane.b32.xlu0 %v59_v0, %s63_s20  ;;  %v23_v1 = vld [vmem:[%s117_s1] sm:$0xff]  ;;  %s64_s1 = smov 48  }
   0x3   :  { %v30_v2 = vmul.f32 %v59_v0, %v23_v1  ;;  %v60_v3 = vld [vmem:[%s118_s4] ss:$0 sm:$0xff] }
   0x4   :  { %v22_v4 = vld [vmem:[%s119_s0] sm:$0xff] }
   0x5   :  { %v31_v5 = vadd.f32 %v30_v2, %v22_v4  ;;  %v42_v7 = vld [vmem:[%s121_s2] sm:$0xff] }
   0x7   :  { %v38_v6 = vadd.f32 %v60_v3, %v31_v5 }
   0x9   :  { %40 = vst.msk [vmem:[%s120_s5] sm:$0xff] %vm39_vm0, %v38_v6 }
  0x74   :  { %v44_v8 = vpop.permute.xlu0 %43 }
  0x75   :  { %v46_v9 = vmul.f32 %v44_v8, %v42_v7 }
  0x77   :  { %48 = vrot.lane.b32.xlu0 %v46_v9, %s64_s1 }
  0xe9   :  { %v49_v10 = vpop.permute.xlu0 %48 }
  0xea   :  { %v51_v11 = vadd.f32 %v49_v10, %v22_v4 }
  0xec   :  { %v52_v12 = vadd.f32 %v60_v3, %v51_v11 }
  0xee   :  { %54 = vst.msk [vmem:[%s120_s5] sm:$0xff] %vm53_vm1, %v52_v12 }

// kernel: resnet_forward.67
= control target key start
LH: loop header
LB: loop body
LE: loop exit
PB: predicated region body
PF: predicated region fallthrough
CT: control target
= control target key end

     0   :  { %v478_v0 = vmov 0   ;;  %vm249_vm0 = vcmask 392192   ;;  %s479_s26 = smov 48   ;;  %vm342_vm1 = vcmask 385024   ;;  %vm364_vm2 = vcmask 778624   ;;  %s632_s1 = inlined_call_operand.vmem [shape: bf16[432,48], index: 1, kind: input, shape index: {}]   ;;  %s633_s0 = inlined_call_operand.vmem [shape: bf16[8,432], index: 0, kind: input, shape index: {}]   ;;  %s634_s2 = inlined_call_operand.vmem [shape: f32[8,48], index: 2, kind: input, shape index: {}]   ;;  %s635_s3 = inlined_call_operand.vmem [shape: f32[8,48], index: 3, kind: output, shape index: {0}]   ;;  %s636_s4 = inlined_call_operand.vmem [shape: f32[1,1,96], index: 4, kind: output, shape index: {1}]   ;;  %s637_s5 = inlined_call_operand.vmem [shape: f32[1,1,96], index: 5, kind: output, shape index: {2}]  }
   0x1   :  { %293 = vmatprep.subr.bf16.mxu1 %v478_v0  ;;  %v447_v1 = vld [vmem:[%s632_s1 + $0xb8] sm:$0xff]   ;;  %v450_v4 = vld [vmem:[%s632_s1 + $0xb0] sm:$0xff]   ;;  %v453_v7 = vld [vmem:[%s632_s1 + $0xa8] sm:$0xff]  }
   0x2   :  { %v448_v2 = vld [vmem:[%s632_s1 + $0x78] sm:$0xff]   ;;  %294 = vmatpush1.bf16.msra.mxu1 %v447_v1  ;;  %v451_v5 = vld [vmem:[%s632_s1 + $0x70] sm:$0xff]   ;;  %v454_v8 = vld [vmem:[%s632_s1 + $0x68] sm:$0xff]  }
   0x3   :  { %v449_v3 = vld [vmem:[%s632_s1 + $0x38] sm:$0xff]   ;;  %423 = vmatprep.subr.bf16.mxu0 %v448_v2  ;;  %295 = vmatprep.subr.bf16.mxu1 %v478_v0  ;;  %v452_v6 = vld [vmem:[%s632_s1 + $0x30] sm:$0xff]   ;;  %v455_v9 = vld [vmem:[%s632_s1 + $0x28] sm:$0xff]  }
   0x4   :  { %424 = vmatpush3.bf16.msra.mxu0 %v449_v3  ;;  %v456_v10 = vld [vmem:[%s632_s1 + $0xa0] sm:$0xff]   ;;  %v460_v13 = vld [vmem:[%s632_s1 + $0x58] sm:$0xff]   ;;  %v463_v16 = vld [vmem:[%s632_s1 + $0x50] sm:$0xff]  }
   0x5   :  { %425 = vmatprep.subr.bf16.mxu0 %v451_v5  ;;  %v457_v11 = vld [vmem:[%s632_s1 + $0x60] sm:$0xff]   ;;  %v459_v14 = vld [vmem:[%s632_s1 + $0x98] sm:$0xff]   ;;  %v462_v17 = vld [vmem:[%s632_s1 + $0x90] sm:$0xff]  }
   0x6   :  { %296 = vmatpush1.bf16.msra.mxu1 %v450_v4  ;;  %v458_v12 = vld [vmem:[%s632_s1 + $0x20] sm:$0xff]   ;;  %v461_v15 = vld [vmem:[%s632_s1 + $0x18] sm:$0xff]   ;;  %v464_v18 = vld [vmem:[%s632_s1 + $0x10] sm:$0xff]  }
   0x7   :  { %297 = vmatprep.subr.bf16.mxu1 %v478_v0  ;;  %v466_v19 = vld [vmem:[%s632_s1 + $0x48] sm:$0xff]   ;;  %v18_v22 = vld [vmem:[%s633_s0] sm:$0xff]  ;;  %v473_v33 = vld [vmem:[%s632_s1 + $0xd0] sm:$0xff]  }
   0x8   :  { %426 = vmatpush3.bf16.msra.mxu0 %v452_v6  ;;  %v465_v20 = vld [vmem:[%s632_s1 + $0x88] sm:$0xff]   ;;  %v469_v23 = vld [vmem:[%s632_s1 + $0x40] sm:$0xff]   ;;  %v392_v24 = vcombine.high %v18_v22, %v18_v22  ;;  %v391_v35 = vcombine.low %v18_v22, %v18_v22 }
   0x9   :  { %427 = vmatprep.subr.bf16.mxu0 %v454_v8  ;;  %v467_v21 = vld [vmem:[%s632_s1 + $0x8] sm:$0xff]   ;;  %v468_v25 = vld [vmem:[%s632_s1 + $0x80] sm:$0xff]  }
   0xa   :  { %298 = vmatpush1.bf16.msra.mxu1 %v453_v7  ;;  %285 = vmatprep.mubr.bf16.mxu0 %v392_v24  ;;  %v19_v26 = vld [vmem:[%s633_s0 + $0x8] sm:$0xff]  ;;  %v334_v27 = vld [vmem:[%s634_s2] sm:$0xff] }
   0xb   :  { %299 = vmatprep.subr.bf16.mxu1 %v478_v0  ;;  %v470_v28 = vld [vmem:[%s632_s1] sm:$0xff]   ;;  %v394_v29 = vcombine.high %v19_v26, %v19_v26  ;;  %v353_v30 = vsel %vm249_vm0, %v334_v27, 0.0  ;;  %v366_v31 = vmul.f32 %v334_v27, %v334_v27  ;;  %v474_v40 = vld [vmem:[%s632_s1 + $0xc8] sm:$0xff]   ;;  %v393_v48 = vcombine.low %v19_v26, %v19_v26 }
   0xc   :  { %428 = vmatpush3.bf16.msra.mxu0 %v455_v9  ;;  %v354_v32 = vrot.slane %v353_v30, 4  ;;  %v475_v45 = vld [vmem:[%s632_s1 + $0xc0] sm:$0xff]  }
   0xd   :  { %429 = vmatprep.subr.bf16.mxu0 %v457_v11  ;;  %422 = vmatprep.mubr.msk.bf16.mxu1 %vm249_vm0, %v394_v29  ;;  %v367_v34 = vsel %vm249_vm0, %v366_v31, 0.0 }
   0xe   :  { %300 = vmatpush1.bf16.msra.mxu1 %v456_v10  ;;  %v355_v36 = vadd.f32 %v354_v32, %v353_v30  ;;  %v368_v37 = vrot.slane %v367_v34, 4 }
   0xf   :  { %301 = vmatprep.subr.bf16.mxu1 %v478_v0 }
  0x10   :  { %430 = vmatpush3.bf16.msra.mxu0 %v458_v12  ;;  %v356_v38 = vrot.slane %v355_v36, 2  ;;  %v369_v39 = vadd.f32 %v368_v37, %v367_v34 }
  0x11   :  { %431 = vmatprep.subr.bf16.mxu0 %v460_v13 }
  0x12   :  { %302 = vmatpush1.bf16.msra.mxu1 %v459_v14  ;;  %v357_v41 = vadd.f32 %v356_v38, %v355_v36  ;;  %v370_v42 = vrot.slane %v369_v39, 2 }
  0x13   :  { %303 = vmatprep.subr.bf16.mxu1 %v478_v0 }
  0x14   :  { %432 = vmatpush3.bf16.msra.mxu0 %v461_v15  ;;  %v358_v43 = vrot.slane %v357_v41, 1  ;;  %v371_v44 = vadd.f32 %v370_v42, %v369_v39 }
  0x15   :  { %433 = vmatprep.subr.bf16.mxu0 %v463_v16 }
  0x16   :  { %304 = vmatpush1.bf16.msra.mxu1 %v462_v17  ;;  %v359_v46 = vadd.f32 %v358_v43, %v357_v41  ;;  %v372_v47 = vrot.slane %v371_v44, 1 }
  0x17   :  { %305 = vmatprep.subr.bf16.mxu1 %v478_v0 }
  0x18   :  { %434 = vmatpush3.bf16.msra.mxu0 %v464_v18  ;;  %361 = vrot.lane.b32.xlu0 %v359_v46, %s479_s26  ;;  %v373_v49 = vadd.f32 %v372_v47, %v371_v44 }
  0x19   :  { %435 = vmatprep.subr.bf16.mxu0 %v466_v19 }
  0x1a   :  { %306 = vmatpush1.bf16.msra.mxu1 %v465_v20 }
  0x1b   :  { %307 = vmatprep.subr.bf16.mxu1 %v478_v0 }
  0x1c   :  { %436 = vmatpush3.bf16.msra.mxu0 %v467_v21  ;;  %375 = vrot.lane.b32.xlu0 %v373_v49, %s479_s26 }
  0x1d   :  { %437 = vmatprep.subr.bf16.mxu0 %v469_v23 }
  0x1e   :  { %308 = vmatpush1.bf16.msra.mxu1 %v468_v25 }
  0x1f   :  { %319 = vmatprep.subr.bf16.mxu1 %v478_v0 }
  0x20   :  { %438 = vmatpush3.bf16.msra.mxu0 %v470_v28 }
  0x22   :  { %320 = vmatpush2.bf16.msra.mxu1 %v473_v33 }
  0x23   :  { %286 = vmatmul.mubr.bf16.vlgmr.msra.gmra.mxu0 %v391_v35  ;;  %321 = vmatprep.subr.bf16.mxu1 %v478_v0 }
  0x26   :  { %322 = vmatpush2.bf16.msra.mxu1 %v474_v40 }
  0x27   :  { %323 = vmatprep.subr.bf16.mxu1 %v478_v0 }
  0x2a   :  { %324 = vmatpush2.bf16.msra.mxu1 %v475_v45 }
  0x2d   :  { %326 = vmatmul.mubr.bf16.vlgmr.msra.gmra.mxu1 %v393_v48 }
  0x8a   :  { %v362_v6 = vpop.permute.xlu0 %361 }
  0x8e   :  { %v376_v11 = vpop.permute.xlu0 %375 }
  0xe3   :  { %v439_v50 = vpop.f32.mrf.mxu0 }
  0xe5   :  { %v440_v51 = vpop.f32.mrf.mxu0 }
  0xe6   :  { %v441_v54 = vadd.f32 %v440_v51, %v439_v50 }
  0xe7   :  { %v442_v52 = vpop.f32.mrf.mxu0 }
  0xe9   :  { %v443_v53 = vpop.f32.mrf.mxu0 }
  0xed   :  { %v327_v55 = vpop.f32.mrf.mxu1 }
  0xee   :  { %v328_v56 = vadd.f32 %v441_v54, %v327_v55 }
  0xef   :  { %v329_v57 = vpop.f32.mrf.mxu1 }
  0xf0   :  { %333 = vst.msk [vmem:[%s635_s3] sm:$0xff] %vm249_vm0, %v328_v56  ;;  %v335_v58 = vsel %vm249_vm0, %v328_v56, 0.0  ;;  %v344_v59 = vmul.f32 %v328_v56, %v328_v56 }
  0xf1   :  { %v336_v60 = vrot.slane %v335_v58, 4  ;;  %v330_v61 = vpop.f32.mrf.mxu1 }
  0xf2   :  { %v345_v62 = vsel %vm249_vm0, %v344_v59, 0.0 }
  0xf3   :  { %v337_v63 = vadd.f32 %v336_v60, %v335_v58  ;;  %v346_v0 = vrot.slane %v345_v62, 4  ;;  %v331_v1 = vpop.f32.mrf.mxu1 }
  0xf5   :  { %v338_v2 = vrot.slane %v337_v63, 2  ;;  %v347_v3 = vadd.f32 %v346_v0, %v345_v62 }
  0xf7   :  { %v339_v4 = vadd.f32 %v338_v2, %v337_v63  ;;  %v348_v5 = vrot.slane %v347_v3, 2 }
  0xf9   :  { %v340_v7 = vrot.slane %v339_v4, 1  ;;  %v349_v8 = vadd.f32 %v348_v5, %v347_v3 }
  0xfb   :  { %v341_v9 = vadd.f32 %v340_v7, %v339_v4  ;;  %v350_v10 = vrot.slane %v349_v8, 1 }
  0xfd   :  { %343 = vst.msk [vmem:[%s636_s4] sm:$0x1] %vm342_vm1, %v341_v9  ;;  %v351_v12 = vadd.f32 %v350_v10, %v349_v8 }
  0xfe   :  { %365 = vst.msk [vmem:[%s636_s4] sm:$0x1] %vm364_vm2, %v362_v6 }
  0xff   :  { %352 = vst.msk [vmem:[%s637_s5] sm:$0x1] %vm342_vm1, %v351_v12 }
 0x100   :  { %378 = vst.msk [vmem:[%s637_s5] sm:$0x1] %vm364_vm2, %v376_v11 }

// kernel: resnet_forward.79
= control target key start
LH: loop header
LB: loop body
LE: loop exit
PB: predicated region body
PF: predicated region fallthrough
CT: control target
= control target key end

     0   :  { %s71_s0 = inlined_call_operand.vmem [shape: f32[8,128], index: 0, kind: input, shape index: {}]   ;;  %s72_s1 = inlined_call_operand.vmem [shape: f32[1,128], index: 1, kind: input, shape index: {}]   ;;  %s73_s2 = inlined_call_operand.vmem [shape: f32[1,128], index: 2, kind: input, shape index: {}]   ;;  %s74_s3 = inlined_call_operand.vmem [shape: f32[8,128], index: 3, kind: output, shape index: {}]  }
   0x1   :  { %v14_v0 = vld [vmem:[%s71_s0] sm:$0xff] }
   0x2   :  { %v37_v1 = vld [vmem:[%s72_s1] ss:$0 sm:$0xff] }
   0x3   :  { %v38_v2 = vld [vmem:[%s73_s2] ss:$0 sm:$0xff]  ;;  %v22_v3 = vmul.f32 %v37_v1, %v14_v0 }
   0x5   :  { %v30_v4 = vadd.f32 %v38_v2, %v22_v3 }
   0x7   :  { %v31_v5 = vmax.f32 %v30_v4, 0.0 }
   0x9   :  { %32 = vst [vmem:[%s74_s3] sm:$0xff] %v31_v5 }

// kernel: resnet_forward.80
= control target key start
LH: loop header
LB: loop body
LE: loop exit
PB: predicated region body
PF: predicated region fallthrough
CT: control target
= control target key end

     0   :  { %v180_v0 = vmov 0.0   ;;  %vm181_vm0 = vmmov 0   ;;  %s235_s1 = inlined_call_operand.vmem [shape: bf16[128,128], index: 1, kind: input, shape index: {}]   ;;  %s236_s0 = inlined_call_operand.vmem [shape: bf16[8,128], index: 0, kind: input, shape index: {}]   ;;  %s237_s2 = inlined_call_operand.vmem [shape: f32[1,128], index: 2, kind: input, shape index: {}]   ;;  %s238_s3 = inlined_call_operand.vmem [shape: f32[8,128], index: 3, kind: output, shape index: {}]  }
   0x1   :  { %150 = vmatprep.subr.bf16.mxu0 %v180_v0  ;;  %v172_v1 = vld [vmem:[%s235_s1 + $0x38] sm:$0xff]   ;;  %166 = vmatprep.mubr.msk.bf16.mxu0 %vm181_vm0, %v180_v0  ;;  %v173_v2 = vld [vmem:[%s235_s1 + $0x30] sm:$0xff]   ;;  %v174_v3 = vld [vmem:[%s235_s1 + $0x28] sm:$0xff]  }
   0x2   :  { %151 = vmatpush3.bf16.msra.mxu0 %v172_v1  ;;  %v175_v4 = vld [vmem:[%s235_s1 + $0x20] sm:$0xff]   ;;  %v176_v5 = vld [vmem:[%s235_s1 + $0x18] sm:$0xff]   ;;  %v177_v6 = vld [vmem:[%s235_s1 + $0x10] sm:$0xff]  }
   0x3   :  { %152 = vmatprep.subr.bf16.mxu0 %v180_v0  ;;  %v178_v7 = vld [vmem:[%s235_s1 + $0x8] sm:$0xff]   ;;  %v179_v8 = vld [vmem:[%s235_s1] sm:$0xff]  }
   0x4   :  { %v15_v9 = vld [vmem:[%s236_s0] sm:$0xf] }
   0x5   :  { %v132_v10 = vld [vmem:[%s237_s2] ss:$0 sm:$0xff] }
   0x6   :  { %153 = vmatpush3.bf16.msra.mxu0 %v173_v2 }
   0x7   :  { %154 = vmatprep.subr.bf16.mxu0 %v180_v0 }
   0xa   :  { %155 = vmatpush3.bf16.msra.mxu0 %v174_v3 }
   0xb   :  { %156 = vmatprep.subr.bf16.mxu0 %v180_v0 }
   0xe   :  { %157 = vmatpush3.bf16.msra.mxu0 %v175_v4 }
   0xf   :  { %158 = vmatprep.subr.bf16.mxu0 %v180_v0 }
  0x12   :  { %159 = vmatpush3.bf16.msra.mxu0 %v176_v5 }
  0x13   :  { %160 = vmatprep.subr.bf16.mxu0 %v180_v0 }
  0x16   :  { %161 = vmatpush3.bf16.msra.mxu0 %v177_v6 }
  0x17   :  { %162 = vmatprep.subr.bf16.mxu0 %v180_v0 }
  0x1a   :  { %163 = vmatpush3.bf16.msra.mxu0 %v178_v7 }
  0x1b   :  { %164 = vmatprep.subr.bf16.mxu0 %v180_v0 }
  0x1e   :  { %165 = vmatpush3.bf16.msra.mxu0 %v179_v8 }
  0x21   :  { %167 = vmatmul.mubr.bf16.vlgmr.msra.gmra.mxu0 %v15_v9 }
  0xe1   :  { %v121_v11 = vpop.f32.mrf.mxu0 }
  0xe2   :  { %v122_v12 = vadd.f32 %v132_v10, %v121_v11 }
  0xe3   :  { %v168_v13 = vpop.f32.mrf.mxu0 }
  0xe4   :  { %127 = vst [vmem:[%s238_s3] sm:$0xff] %v122_v12 }
  0xe5   :  { %v124_v14 = vpop.f32.mrf.mxu0 }
  0xe7   :  { %v169_v15 = vpop.f32.mrf.mxu0 }

// kernel: resnet_forward.78
= control target key start
LH: loop header
LB: loop body
LE: loop exit
PB: predicated region body
PF: predicated region fallthrough
CT: control target
= control target key end

     0   :  { %v881_v39 = vmov 0.0   ;;  %vm882_vm0 = vmmov 0   ;;  %vm475_vm1 = vcmask 785408   ;;  %s1091_s1 = inlined_call_operand.vmem [shape: bf16[864,128], index: 1, kind: input, shape index: {}]   ;;  %s1092_s0 = inlined_call_operand.vmem [shape: bf16[8,864], index: 0, kind: input, shape index: {}]   ;;  %s1093_s2 = inlined_call_operand.vmem [shape: f32[8,128], index: 2, kind: output, shape index: {0}]   ;;  %s1094_s3 = inlined_call_operand.vmem [shape: f32[1,1,128], index: 3, kind: output, shape index: {1}]   ;;  %s1095_s4 = inlined_call_operand.vmem [shape: f32[1,1,128], index: 4, kind: output, shape index: {2}]  }
   0x1   :  { %v820_v0 = vld [vmem:[%s1091_s1 + $0x78] sm:$0xff]   ;;  %v824_v4 = vld [vmem:[%s1091_s1 + $0x70] sm:$0xff]   ;;  %v828_v8 = vld [vmem:[%s1091_s1 + $0x68] sm:$0xff]  }
   0x2   :  { %v821_v1 = vld [vmem:[%s1091_s1 + $0xf8] sm:$0xff]   ;;  %729 = vmatprep.subr.bf16.mxu0 %v820_v0  ;;  %v825_v5 = vld [vmem:[%s1091_s1 + $0xf0] sm:$0xff]   ;;  %v829_v9 = vld [vmem:[%s1091_s1 + $0xe8] sm:$0xff]  }
   0x3   :  { %v822_v2 = vld [vmem:[%s1091_s1 + $0x38] sm:$0xff]   ;;  %751 = vmatprep.subr.bf16.mxu1 %v821_v1  ;;  %v826_v6 = vld [vmem:[%s1091_s1 + $0x30] sm:$0xff]   ;;  %v830_v10 = vld [vmem:[%s1091_s1 + $0x28] sm:$0xff]  }
   0x4   :  { %v823_v3 = vld [vmem:[%s1091_s1 + $0xb8] sm:$0xff]   ;;  %730 = vmatpush3.bf16.msra.mxu0 %v822_v2  ;;  %v827_v7 = vld [vmem:[%s1091_s1 + $0xb0] sm:$0xff]   ;;  %v831_v11 = vld [vmem:[%s1091_s1 + $0xa8] sm:$0xff]  }
   0x5   :  { %752 = vmatpush3.bf16.msra.mxu1 %v823_v3  ;;  %731 = vmatprep.subr.bf16.mxu0 %v824_v4  ;;  %v832_v12 = vld [vmem:[%s1091_s1 + $0x60] sm:$0xff]   ;;  %v836_v16 = vld [vmem:[%s1091_s1 + $0x58] sm:$0xff]   ;;  %v840_v20 = vld [vmem:[%s1091_s1 + $0x50] sm:$0xff]  }
   0x6   :  { %753 = vmatprep.subr.bf16.mxu1 %v825_v5  ;;  %v833_v13 = vld [vmem:[%s1091_s1 + $0xe0] sm:$0xff]   ;;  %v837_v17 = vld [vmem:[%s1091_s1 + $0xd8] sm:$0xff]   ;;  %v841_v21 = vld [vmem:[%s1091_s1 + $0xd0] sm:$0xff]  }
   0x7   :  { %v834_v14 = vld [vmem:[%s1091_s1 + $0x20] sm:$0xff]   ;;  %v838_v18 = vld [vmem:[%s1091_s1 + $0x18] sm:$0xff]   ;;  %v842_v22 = vld [vmem:[%s1091_s1 + $0x10] sm:$0xff]  }
   0x8   :  { %732 = vmatpush3.bf16.msra.mxu0 %v826_v6  ;;  %v835_v15 = vld [vmem:[%s1091_s1 + $0xa0] sm:$0xff]   ;;  %v839_v19 = vld [vmem:[%s1091_s1 + $0x98] sm:$0xff]   ;;  %v843_v23 = vld [vmem:[%s1091_s1 + $0x90] sm:$0xff]  }
   0x9   :  { %754 = vmatpush3.bf16.msra.mxu1 %v827_v7  ;;  %733 = vmatprep.subr.bf16.mxu0 %v828_v8  ;;  %v844_v24 = vld [vmem:[%s1091_s1 + $0x48] sm:$0xff]   ;;  %v848_v28 = vld [vmem:[%s1091_s1 + $0x40] sm:$0xff]   ;;  %v857_v38 = vld [vmem:[%s1091_s1 + $0x178] sm:$0xff]  }
   0xa   :  { %755 = vmatprep.subr.bf16.mxu1 %v829_v9  ;;  %v845_v25 = vld [vmem:[%s1091_s1 + $0xc8] sm:$0xff]   ;;  %v849_v29 = vld [vmem:[%s1091_s1 + $0xc0] sm:$0xff]   ;;  %v858_v40 = vld [vmem:[%s1091_s1 + $0x138] sm:$0xff]  }
   0xb   :  { %v846_v26 = vld [vmem:[%s1091_s1 + $0x8] sm:$0xff]   ;;  %v850_v30 = vld [vmem:[%s1091_s1] sm:$0xff]   ;;  %v859_v41 = vld [vmem:[%s1091_s1 + $0x170] sm:$0xff]  }
   0xc   :  { %734 = vmatpush3.bf16.msra.mxu0 %v830_v10  ;;  %v847_v27 = vld [vmem:[%s1091_s1 + $0x88] sm:$0xff]   ;;  %v851_v31 = vld [vmem:[%s1091_s1 + $0x80] sm:$0xff]   ;;  %v860_v42 = vld [vmem:[%s1091_s1 + $0x130] sm:$0xff]  }
   0xd   :  { %756 = vmatpush3.bf16.msra.mxu1 %v831_v11  ;;  %735 = vmatprep.subr.bf16.mxu0 %v832_v12  ;;  %v15_v32 = vld [vmem:[%s1092_s0] sm:$0xff]  ;;  %v16_v35 = vld [vmem:[%s1092_s0 + $0x8] sm:$0xff]  ;;  %v869_v49 = vld [vmem:[%s1091_s1 + $0x198] sm:$0xff]  }
   0xe   :  { %757 = vmatprep.subr.bf16.mxu1 %v833_v13  ;;  %v667_v33 = vcombine.low %v15_v32, %v15_v32  ;;  %v668_v34 = vcombine.high %v15_v32, %v15_v32  ;;  %v669_v36 = vcombine.low %v16_v35, %v16_v35  ;;  %v670_v37 = vcombine.high %v16_v35, %v16_v35  ;;  %v861_v43 = vld [vmem:[%s1091_s1 + $0x168] sm:$0xff]   ;;  %v864_v46 = vld [vmem:[%s1091_s1 + $0x160] sm:$0xff]   ;;  %v867_v50 = vld [vmem:[%s1091_s1 + $0x158] sm:$0xff]  }
   0xf   :  { %v863_v44 = vld [vmem:[%s1091_s1 + $0x1a8] sm:$0xff]   ;;  %v866_v47 = vld [vmem:[%s1091_s1 + $0x1a0] sm:$0xff]   ;;  %v868_v51 = vld [vmem:[%s1091_s1 + $0x118] sm:$0xff]  }
  0x10   :  { %736 = vmatpush3.bf16.msra.mxu0 %v834_v14  ;;  %511 = vmatprep.mubr.bf16.mxu0 %v668_v34  ;;  %v862_v45 = vld [vmem:[%s1091_s1 + $0x128] sm:$0xff]   ;;  %v865_v48 = vld [vmem:[%s1091_s1 + $0x120] sm:$0xff]   ;;  %v872_v52 = vld [vmem:[%s1091_s1 + $0x190] sm:$0xff]  }
  0x11   :  { %758 = vmatpush3.bf16.msra.mxu1 %v835_v15  ;;  %737 = vmatprep.subr.bf16.mxu0 %v836_v16  ;;  %v870_v53 = vld [vmem:[%s1091_s1 + $0x150] sm:$0xff]   ;;  %v875_v55 = vld [vmem:[%s1091_s1 + $0x188] sm:$0xff]   ;;  %v878_v60 = vld [vmem:[%s1091_s1 + $0x180] sm:$0xff]  }
  0x12   :  { %759 = vmatprep.subr.bf16.mxu1 %v837_v17  ;;  %551 = vmatprep.mubr.bf16.mxu1 %v670_v37  ;;  %v871_v54 = vld [vmem:[%s1091_s1 + $0x110] sm:$0xff]   ;;  %v873_v56 = vld [vmem:[%s1091_s1 + $0x148] sm:$0xff]   ;;  %v876_v61 = vld [vmem:[%s1091_s1 + $0x140] sm:$0xff]  }
  0x13   :  { %v17_v57 = vld [vmem:[%s1092_s0 + $0x10] sm:$0xff]  ;;  %v874_v59 = vld [vmem:[%s1091_s1 + $0x108] sm:$0xff]   ;;  %v854_v62 = vld [vmem:[%s1092_s0 + $0x18] ss:$0 sps:$4 sm:$0xff]  }
  0x14   :  { %738 = vmatpush3.bf16.msra.mxu0 %v838_v18  ;;  %v672_v58 = vcombine.high %v17_v57, %v17_v57  ;;  %v877_v63 = vld [vmem:[%s1091_s1 + $0x100] sm:$0xff]   ;;  %v671_v0 = vcombine.low %v17_v57, %v17_v57 }
  0x15   :  { %760 = vmatpush3.bf16.msra.mxu1 %v839_v19  ;;  %739 = vmatprep.subr.bf16.mxu0 %v840_v20 }
  0x16   :  { %761 = vmatprep.subr.bf16.mxu1 %v841_v21 }
  0x18   :  { %740 = vmatpush3.bf16.msra.mxu0 %v842_v22 }
  0x19   :  { %762 = vmatpush3.bf16.msra.mxu1 %v843_v23  ;;  %741 = vmatprep.subr.bf16.mxu0 %v844_v24 }
  0x1a   :  { %763 = vmatprep.subr.bf16.mxu1 %v845_v25 }
  0x1c   :  { %742 = vmatpush3.bf16.msra.mxu0 %v846_v26 }
  0x1d   :  { %764 = vmatpush3.bf16.msra.mxu1 %v847_v27  ;;  %743 = vmatprep.subr.bf16.mxu0 %v848_v28 }
  0x1e   :  { %765 = vmatprep.subr.bf16.mxu1 %v849_v29 }
  0x20   :  { %744 = vmatpush3.bf16.msra.mxu0 %v850_v30 }
  0x21   :  { %766 = vmatpush3.bf16.msra.mxu1 %v851_v31  ;;  %773 = vmatprep.subr.bf16.mxu0 %v857_v38 }
  0x22   :  { %802 = vmatprep.subr.bf16.mxu1 %v881_v39 }
  0x23   :  { %512 = vmatmul.mubr.bf16.vlgmr.msra.gmra.mxu0 %v667_v33 }
  0x24   :  { %552 = vmatmul.mubr.bf16.vlgmr.msra.gmra.mxu1 %v669_v36  ;;  %774 = vmatpush3.bf16.msra.mxu0 %v858_v40 }
  0x25   :  { %814 = vmatprep.mubr.msk.bf16.mxu1 %vm882_vm0, %v881_v39  ;;  %775 = vmatprep.subr.bf16.mxu0 %v859_v41 }
  0x26   :  { %803 = vmatpush3.bf16.msra.mxu1 %v863_v44  ;;  %591 = vmatprep.mubr.bf16.mxu0 %v672_v58 }
  0x27   :  { %804 = vmatprep.subr.bf16.mxu1 %v881_v39 }
  0x28   :  { %776 = vmatpush3.bf16.msra.mxu0 %v860_v42 }
  0x29   :  { %777 = vmatprep.subr.bf16.mxu0 %v861_v43 }
  0x2a   :  { %805 = vmatpush3.bf16.msra.mxu1 %v866_v47 }
  0x2b   :  { %806 = vmatprep.subr.bf16.mxu1 %v881_v39 }
  0x2c   :  { %778 = vmatpush3.bf16.msra.mxu0 %v862_v45 }
  0x2d   :  { %779 = vmatprep.subr.bf16.mxu0 %v864_v46 }
  0x2e   :  { %807 = vmatpush3.bf16.msra.mxu1 %v869_v49 }
  0x2f   :  { %808 = vmatprep.subr.bf16.mxu1 %v881_v39 }
  0x30   :  { %780 = vmatpush3.bf16.msra.mxu0 %v865_v48 }
  0x31   :  { %781 = vmatprep.subr.bf16.mxu0 %v867_v50 }
  0x32   :  { %809 = vmatpush3.bf16.msra.mxu1 %v872_v52 }
  0x33   :  { %810 = vmatprep.subr.bf16.mxu1 %v881_v39 }
  0x34   :  { %782 = vmatpush3.bf16.msra.mxu0 %v868_v51 }
  0x35   :  { %783 = vmatprep.subr.bf16.mxu0 %v870_v53 }
  0x36   :  { %811 = vmatpush3.bf16.msra.mxu1 %v875_v55 }
  0x37   :  { %812 = vmatprep.subr.bf16.mxu1 %v881_v39 }
  0x38   :  { %784 = vmatpush3.bf16.msra.mxu0 %v871_v54 }
  0x39   :  { %785 = vmatprep.subr.bf16.mxu0 %v873_v56 }
  0x3a   :  { %813 = vmatpush3.bf16.msra.mxu1 %v878_v60 }
  0x3c   :  { %786 = vmatpush3.bf16.msra.mxu0 %v874_v59 }
  0x3d   :  { %787 = vmatprep.subr.bf16.mxu0 %v876_v61  ;;  %815 = vmatmul.mubr.msk.bf16.vlgmr.msra.gmra.mxu1 %vm475_vm1, %v854_v62 }
  0x40   :  { %788 = vmatpush3.bf16.msra.mxu0 %v877_v63 }
  0x43   :  { %592 = vmatmul.mubr.bf16.vlgmr.msra.gmra.mxu0 %v671_v0 }
  0xe3   :  { %v745_v1 = vpop.f32.mrf.mxu0 }
  0xe4   :  { %v767_v2 = vpop.f32.mrf.mxu1 }
  0xe5   :  { %v746_v3 = vpop.f32.mrf.mxu0 }
  0xe6   :  { %v768_v4 = vpop.f32.mrf.mxu1  ;;  %v747_v11 = vadd.f32 %v746_v3, %v745_v1 }
  0xe7   :  { %v748_v5 = vpop.f32.mrf.mxu0  ;;  %v769_v12 = vadd.f32 %v768_v4, %v767_v2 }
  0xe8   :  { %v770_v6 = vpop.f32.mrf.mxu1 }
  0xe9   :  { %v749_v7 = vpop.f32.mrf.mxu0  ;;  %v554_v17 = vadd.f32 %v769_v12, %v747_v11 }
  0xea   :  { %v771_v8 = vpop.f32.mrf.mxu1 }
  0xfd   :  { %v633_v9 = vpop.f32.mrf.mxu1 }
  0xff   :  { %v816_v10 = vpop.f32.mrf.mxu1 }
 0x101   :  { %v636_v14 = vpop.f32.mrf.mxu1 }
 0x103   :  { %v789_v13 = vpop.f32.mrf.mxu0  ;;  %v817_v16 = vpop.f32.mrf.mxu1 }
 0x105   :  { %v790_v15 = vpop.f32.mrf.mxu0 }
 0x106   :  { %v791_v18 = vadd.f32 %v790_v15, %v789_v13 }
 0x107   :  { %v792_v19 = vpop.f32.mrf.mxu0 }
 0x108   :  { %v594_v20 = vadd.f32 %v791_v18, %v554_v17 }
 0x109   :  { %v793_v21 = vpop.f32.mrf.mxu0 }
 0x10a   :  { %v634_v22 = vadd.f32 %v633_v9, %v594_v20 }
 0x10c   :  { %639 = vst [vmem:[%s1093_s2] sm:$0xff] %v634_v22  ;;  %v640_v23 = vrot.slane %v634_v22, 4  ;;  %v647_v24 = vmul.f32 %v634_v22, %v634_v22 }
 0x10e   :  { %v641_v25 = vadd.f32 %v640_v23, %v634_v22  ;;  %v648_v26 = vrot.slane %v647_v24, 4 }
 0x110   :  { %v642_v27 = vrot.slane %v641_v25, 2  ;;  %v649_v28 = vadd.f32 %v648_v26, %v647_v24 }
 0x112   :  { %v643_v29 = vadd.f32 %v642_v27, %v641_v25  ;;  %v650_v30 = vrot.slane %v649_v28, 2 }
 0x114   :  { %v644_v31 = vrot.slane %v643_v29, 1  ;;  %v651_v32 = vadd.f32 %v650_v30, %v649_v28 }
 0x116   :  { %v645_v33 = vadd.f32 %v644_v31, %v643_v29  ;;  %v652_v34 = vrot.slane %v651_v32, 1 }
 0x118   :  { %646 = vst [vmem:[%s1094_s3] sm:$0x1] %v645_v33  ;;  %v653_v35 = vadd.f32 %v652_v34, %v651_v32 }
 0x11a   :  { %654 = vst [vmem:[%s1095_s4] sm:$0x1] %v653_v35 }

// kernel: resnet_forward.82
= control target key start
LH: loop header
LB: loop body
LE: loop exit
PB: predicated region body
PF: predicated region fallthrough
CT: control target
= control target key end

     0   :  { %s62_s20 = smov 64   ;;  %vm39_vm0 = vcmask 523264   ;;  %vm53_vm1 = vcmask 1048064   ;;  %s114_s3 = inlined_call_operand.vmem [shape: f32[1,128], index: 3, kind: input, shape index: {}]   ;;  %s115_s1 = inlined_call_operand.vmem [shape: f32[8,64], index: 1, kind: input, shape index: {}]   ;;  %s116_s4 = inlined_call_operand.vmem [shape: f32[1,128], index: 4, kind: input, shape index: {}]   ;;  %s117_s0 = inlined_call_operand.vmem [shape: f32[8,128], index: 0, kind: input, shape index: {}]   ;;  %s118_s5 = inlined_call_operand.vmem [shape: f32[8,128], index: 5, kind: output, shape index: {}]   ;;  %s119_s2 = inlined_call_operand.vmem [shape: f32[8,64], index: 2, kind: input, shape index: {}]  }
   0x1   :  { %v59_v0 = vld [vmem:[%s114_s3] ss:$0 sm:$0xff] }
   0x2   :  { %43 = vrot.lane.b32.xlu0 %v59_v0, %s62_s20  ;;  %v23_v1 = vld [vmem:[%s115_s1] sm:$0xff] }
   0x3   :  { %v30_v2 = vmul.f32 %v59_v0, %v23_v1  ;;  %v60_v3 = vld [vmem:[%s116_s4] ss:$0 sm:$0xff] }
   0x4   :  { %v22_v4 = vld [vmem:[%s117_s0] sm:$0xff] }
   0x5   :  { %v31_v5 = vadd.f32 %v30_v2, %v22_v4  ;;  %v42_v7 = vld [vmem:[%s119_s2] sm:$0xff] }
   0x7   :  { %v38_v6 = vadd.f32 %v60_v3, %v31_v5 }
   0x9   :  { %40 = vst.msk [vmem:[%s118_s5] sm:$0xff] %vm39_vm0, %v38_v6 }
  0x74   :  { %v44_v8 = vpop.permute.xlu0 %43 }
  0x75   :  { %v46_v9 = vmul.f32 %v44_v8, %v42_v7 }
  0x77   :  { %48 = vrot.lane.b32.xlu0 %v46_v9, %s62_s20 }
  0xe9   :  { %v49_v10 = vpop.permute.xlu0 %48 }
  0xea   :  { %v51_v11 = vadd.f32 %v49_v10, %v22_v4 }
  0xec   :  { %v52_v12 = vadd.f32 %v60_v3, %v51_v11 }
  0xee   :  { %54 = vst.msk [vmem:[%s118_s5] sm:$0xff] %vm53_vm1, %v52_v12 }

// kernel: resnet_forward.81
= control target key start
LH: loop header
LB: loop body
LE: loop exit
PB: predicated region body
PF: predicated region fallthrough
CT: control target
= control target key end

     0   :  { %v655_v36 = vmov 0.0   ;;  %vm326_vm0 = vcmask 523264   ;;  %vm656_vm1 = vmmov 0   ;;  %s657_s22 = smov 64   ;;  %vm459_vm2 = vcmask 516096   ;;  %s829_s1 = inlined_call_operand.vmem [shape: bf16[576,64], index: 1, kind: input, shape index: {}]   ;;  %s830_s0 = inlined_call_operand.vmem [shape: bf16[8,576], index: 0, kind: input, shape index: {}]   ;;  %s831_s2 = inlined_call_operand.vmem [shape: f32[8,64], index: 2, kind: input, shape index: {}]   ;;  %s832_s3 = inlined_call_operand.vmem [shape: f32[8,64], index: 3, kind: output, shape index: {0}]   ;;  %s833_s4 = inlined_call_operand.vmem [shape: f32[1,1,128], index: 4, kind: output, shape index: {1}]   ;;  %s834_s5 = inlined_call_operand.vmem [shape: f32[1,1,128], index: 5, kind: output, shape index: {2}]  }
   0x1   :  { %v614_v0 = vld [vmem:[%s829_s1 + $0x78] sm:$0xff]   ;;  %v618_v4 = vld [vmem:[%s829_s1 + $0x70] sm:$0xff]   ;;  %v622_v8 = vld [vmem:[%s829_s1 + $0x68] sm:$0xff]   ;;  %vm481_vm3 = vcmask 1040896  }
   0x2   :  { %v615_v1 = vld [vmem:[%s829_s1 + $0xf8] sm:$0xff]   ;;  %550 = vmatprep.subr.bf16.mxu0 %v614_v0  ;;  %v619_v5 = vld [vmem:[%s829_s1 + $0xf0] sm:$0xff]   ;;  %v623_v9 = vld [vmem:[%s829_s1 + $0xe8] sm:$0xff]  }
   0x3   :  { %v616_v2 = vld [vmem:[%s829_s1 + $0x38] sm:$0xff]   ;;  %572 = vmatprep.subr.bf16.mxu1 %v615_v1  ;;  %v620_v6 = vld [vmem:[%s829_s1 + $0x30] sm:$0xff]   ;;  %v624_v10 = vld [vmem:[%s829_s1 + $0x28] sm:$0xff]  }
   0x4   :  { %v617_v3 = vld [vmem:[%s829_s1 + $0xb8] sm:$0xff]   ;;  %551 = vmatpush3.bf16.msra.mxu0 %v616_v2  ;;  %v621_v7 = vld [vmem:[%s829_s1 + $0xb0] sm:$0xff]   ;;  %v625_v11 = vld [vmem:[%s829_s1 + $0xa8] sm:$0xff]  }
   0x5   :  { %573 = vmatpush3.bf16.msra.mxu1 %v617_v3  ;;  %552 = vmatprep.subr.bf16.mxu0 %v618_v4  ;;  %v626_v12 = vld [vmem:[%s829_s1 + $0x60] sm:$0xff]   ;;  %v630_v16 = vld [vmem:[%s829_s1 + $0x58] sm:$0xff]   ;;  %v634_v20 = vld [vmem:[%s829_s1 + $0x50] sm:$0xff]  }
   0x6   :  { %574 = vmatprep.subr.bf16.mxu1 %v619_v5  ;;  %v627_v13 = vld [vmem:[%s829_s1 + $0xe0] sm:$0xff]   ;;  %v631_v17 = vld [vmem:[%s829_s1 + $0xd8] sm:$0xff]   ;;  %v635_v21 = vld [vmem:[%s829_s1 + $0xd0] sm:$0xff]  }
   0x7   :  { %v628_v14 = vld [vmem:[%s829_s1 + $0x20] sm:$0xff]   ;;  %v632_v18 = vld [vmem:[%s829_s1 + $0x18] sm:$0xff]   ;;  %v636_v22 = vld [vmem:[%s829_s1 + $0x10] sm:$0xff]  }
   0x8   :  { %553 = vmatpush3.bf16.msra.mxu0 %v620_v6  ;;  %v629_v15 = vld [vmem:[%s829_s1 + $0xa0] sm:$0xff]   ;;  %v633_v19 = vld [vmem:[%s829_s1 + $0x98] sm:$0xff]   ;;  %v637_v23 = vld [vmem:[%s829_s1 + $0x90] sm:$0xff]  }
   0x9   :  { %575 = vmatpush3.bf16.msra.mxu1 %v621_v7  ;;  %554 = vmatprep.subr.bf16.mxu0 %v622_v8  ;;  %v638_v24 = vld [vmem:[%s829_s1 + $0x48] sm:$0xff]   ;;  %v642_v28 = vld [vmem:[%s829_s1 + $0x40] sm:$0xff]   ;;  %v651_v39 = vld [vmem:[%s829_s1 + $0x118] sm:$0xff]  }
   0xa   :  { %576 = vmatprep.subr.bf16.mxu1 %v623_v9  ;;  %v639_v25 = vld [vmem:[%s829_s1 + $0xc8] sm:$0xff]   ;;  %v643_v29 = vld [vmem:[%s829_s1 + $0xc0] sm:$0xff]   ;;  %v652_v40 = vld [vmem:[%s829_s1 + $0x110] sm:$0xff]  }
   0xb   :  { %v640_v26 = vld [vmem:[%s829_s1 + $0x8] sm:$0xff]   ;;  %v644_v30 = vld [vmem:[%s829_s1] sm:$0xff]   ;;  %v648_v56 = vld [vmem:[%s830_s0 + $0x10] ss:$0 sps:$4 sm:$0xff]  }
   0xc   :  { %555 = vmatpush3.bf16.msra.mxu0 %v624_v10  ;;  %v641_v27 = vld [vmem:[%s829_s1 + $0x88] sm:$0xff]   ;;  %v645_v31 = vld [vmem:[%s829_s1 + $0x80] sm:$0xff]  }
   0xd   :  { %577 = vmatpush3.bf16.msra.mxu1 %v625_v11  ;;  %556 = vmatprep.subr.bf16.mxu0 %v626_v12  ;;  %v18_v32 = vld [vmem:[%s830_s0] sm:$0xff]  ;;  %v19_v35 = vld [vmem:[%s830_s0 + $0x8] sm:$0xff] }
   0xe   :  { %578 = vmatprep.subr.bf16.mxu1 %v627_v13  ;;  %v508_v33 = vcombine.low %v18_v32, %v18_v32  ;;  %v509_v34 = vcombine.high %v18_v32, %v18_v32  ;;  %v510_v37 = vcombine.low %v19_v35, %v19_v35  ;;  %v511_v38 = vcombine.high %v19_v35, %v19_v35  ;;  %v451_v41 = vld [vmem:[%s831_s2] sm:$0xff]  ;;  %v653_v46 = vld [vmem:[%s829_s1 + $0x108] sm:$0xff]  }
   0xf   :  { %v470_v42 = vsel %vm326_vm0, %v451_v41, 0.0  ;;  %v483_v43 = vmul.f32 %v451_v41, %v451_v41  ;;  %v654_v51 = vld [vmem:[%s829_s1 + $0x100] sm:$0xff]  }
  0x10   :  { %557 = vmatpush3.bf16.msra.mxu0 %v628_v14  ;;  %362 = vmatprep.mubr.bf16.mxu0 %v509_v34  ;;  %v471_v44 = vrot.slane %v470_v42, 4 }
  0x11   :  { %579 = vmatpush3.bf16.msra.mxu1 %v629_v15  ;;  %558 = vmatprep.subr.bf16.mxu0 %v630_v16  ;;  %v484_v45 = vsel %vm326_vm0, %v483_v43, 0.0 }
  0x12   :  { %580 = vmatprep.subr.bf16.mxu1 %v631_v17  ;;  %402 = vmatprep.mubr.bf16.mxu1 %v511_v38  ;;  %v472_v47 = vadd.f32 %v471_v44, %v470_v42  ;;  %v485_v48 = vrot.slane %v484_v45, 4 }
  0x14   :  { %559 = vmatpush3.bf16.msra.mxu0 %v632_v18  ;;  %v473_v49 = vrot.slane %v472_v47, 2  ;;  %v486_v50 = vadd.f32 %v485_v48, %v484_v45 }
  0x15   :  { %581 = vmatpush3.bf16.msra.mxu1 %v633_v19  ;;  %560 = vmatprep.subr.bf16.mxu0 %v634_v20 }
  0x16   :  { %582 = vmatprep.subr.bf16.mxu1 %v635_v21  ;;  %v474_v52 = vadd.f32 %v473_v49, %v472_v47  ;;  %v487_v53 = vrot.slane %v486_v50, 2 }
  0x18   :  { %561 = vmatpush3.bf16.msra.mxu0 %v636_v22  ;;  %v475_v54 = vrot.slane %v474_v52, 1  ;;  %v488_v55 = vadd.f32 %v487_v53, %v486_v50 }
  0x19   :  { %583 = vmatpush3.bf16.msra.mxu1 %v637_v23  ;;  %562 = vmatprep.subr.bf16.mxu0 %v638_v24 }
  0x1a   :  { %584 = vmatprep.subr.bf16.mxu1 %v639_v25  ;;  %v476_v57 = vadd.f32 %v475_v54, %v474_v52  ;;  %v489_v58 = vrot.slane %v488_v55, 1 }
  0x1c   :  { %563 = vmatpush3.bf16.msra.mxu0 %v640_v26  ;;  %478 = vrot.lane.b32.xlu0 %v476_v57, %s657_s22  ;;  %v490_v59 = vadd.f32 %v489_v58, %v488_v55 }
  0x1d   :  { %585 = vmatpush3.bf16.msra.mxu1 %v641_v27  ;;  %564 = vmatprep.subr.bf16.mxu0 %v642_v28 }
  0x1e   :  { %586 = vmatprep.subr.bf16.mxu1 %v643_v29 }
  0x20   :  { %565 = vmatpush3.bf16.msra.mxu0 %v644_v30  ;;  %492 = vrot.lane.b32.xlu0 %v490_v59, %s657_s22 }
  0x21   :  { %587 = vmatpush3.bf16.msra.mxu1 %v645_v31  ;;  %599 = vmatprep.subr.bf16.mxu0 %v655_v36 }
  0x23   :  { %363 = vmatmul.mubr.bf16.vlgmr.msra.gmra.mxu0 %v508_v33 }
  0x24   :  { %403 = vmatmul.mubr.bf16.vlgmr.msra.gmra.mxu1 %v510_v37  ;;  %600 = vmatpush3.bf16.msra.mxu0 %v651_v39 }
  0x25   :  { %601 = vmatprep.subr.bf16.mxu0 %v655_v36  ;;  %607 = vmatprep.mubr.msk.bf16.mxu0 %vm656_vm1, %v655_v36 }
  0x28   :  { %602 = vmatpush3.bf16.msra.mxu0 %v652_v40 }
  0x29   :  { %603 = vmatprep.subr.bf16.mxu0 %v655_v36 }
  0x2c   :  { %604 = vmatpush3.bf16.msra.mxu0 %v653_v46 }
  0x2d   :  { %605 = vmatprep.subr.bf16.mxu0 %v655_v36 }
  0x30   :  { %606 = vmatpush3.bf16.msra.mxu0 %v654_v51 }
  0x33   :  { %608 = vmatmul.mubr.msk.bf16.vlgmr.msra.gmra.mxu0 %vm326_vm0, %v648_v56 }
  0x8e   :  { %v479_v22 = vpop.permute.xlu0 %478 }
  0x92   :  { %v493_v27 = vpop.permute.xlu0 %492 }
  0xe3   :  { %v566_v60 = vpop.f32.mrf.mxu0 }
  0xe4   :  { %v588_v61 = vpop.f32.mrf.mxu1 }
  0xe5   :  { %v567_v62 = vpop.f32.mrf.mxu0 }
  0xe6   :  { %v589_v63 = vpop.f32.mrf.mxu1  ;;  %v568_v4 = vadd.f32 %v567_v62, %v566_v60 }
  0xe7   :  { %v569_v0 = vpop.f32.mrf.mxu0  ;;  %v590_v5 = vadd.f32 %v589_v63, %v588_v61 }
  0xe8   :  { %v591_v1 = vpop.f32.mrf.mxu1 }
  0xe9   :  { %v570_v2 = vpop.f32.mrf.mxu0  ;;  %v405_v6 = vadd.f32 %v590_v5, %v568_v4 }
  0xea   :  { %v592_v3 = vpop.f32.mrf.mxu1 }
  0xf3   :  { %v444_v7 = vpop.f32.mrf.mxu0 }
  0xf4   :  { %v445_v8 = vadd.f32 %v444_v7, %v405_v6 }
  0xf5   :  { %v609_v9 = vpop.f32.mrf.mxu0 }
  0xf6   :  { %450 = vst.msk [vmem:[%s832_s3] sm:$0xff] %vm326_vm0, %v445_v8  ;;  %v452_v10 = vsel %vm326_vm0, %v445_v8, 0.0  ;;  %v461_v11 = vmul.f32 %v445_v8, %v445_v8 }
  0xf7   :  { %v453_v12 = vrot.slane %v452_v10, 4  ;;  %v447_v13 = vpop.f32.mrf.mxu0 }
  0xf8   :  { %v462_v14 = vsel %vm326_vm0, %v461_v11, 0.0 }
  0xf9   :  { %v454_v15 = vadd.f32 %v453_v12, %v452_v10  ;;  %v463_v16 = vrot.slane %v462_v14, 4  ;;  %v610_v17 = vpop.f32.mrf.mxu0 }
  0xfb   :  { %v455_v18 = vrot.slane %v454_v15, 2  ;;  %v464_v19 = vadd.f32 %v463_v16, %v462_v14 }
  0xfd   :  { %v456_v20 = vadd.f32 %v455_v18, %v454_v15  ;;  %v465_v21 = vrot.slane %v464_v19, 2 }
  0xff   :  { %v457_v23 = vrot.slane %v456_v20, 1  ;;  %v466_v24 = vadd.f32 %v465_v21, %v464_v19 }
 0x101   :  { %v458_v25 = vadd.f32 %v457_v23, %v456_v20  ;;  %v467_v26 = vrot.slane %v466_v24, 1 }
 0x103   :  { %460 = vst.msk [vmem:[%s833_s4] sm:$0x1] %vm459_vm2, %v458_v25  ;;  %v468_v28 = vadd.f32 %v467_v26, %v466_v24 }
 0x104   :  { %482 = vst.msk [vmem:[%s833_s4] sm:$0x1] %vm481_vm3, %v479_v22 }
 0x105   :  { %469 = vst.msk [vmem:[%s834_s5] sm:$0x1] %vm459_vm2, %v468_v28 }
 0x106   :  { %495 = vst.msk [vmem:[%s834_s5] sm:$0x1] %vm481_vm3, %v493_v27 }

</bundles_post_ra>
